<compile_context>
chip_gen: v5e
topology: v5e:2x2
jax: 0.10.0
libtpu: 0.0.40
codegen_flags: <defaults>
</compile_context>

<pallas_src>
import jax
import jax.numpy as jnp
from jax.experimental import pallas as pl
from jax.experimental.pallas import tpu as pltpu

EPS = 1e-5


def conv_bn_relu_kernel(w_ref, x_ref, gamma_ref, beta_ref, o_ref):
    # w_ref:     (Ct, Cin)  slice of the 1x1 conv weight (Cout rows tiled)
    # x_ref:     (Cin, P)   full flattened input (P = N*H*W pixels in lanes)
    # gamma_ref: (Ct, 1)    BN scale for this Cout slice
    # beta_ref:  (Ct, 1)    BN shift for this Cout slice
    # o_ref:     (Ct, P)
    # 1x1 conv == matmul on the MXU: (Ct, Cin) @ (Cin, P) -> (Ct, P)
    y = jnp.dot(w_ref[...], x_ref[...], preferred_element_type=jnp.float32)

    # BatchNorm (training mode, biased variance), single-pass statistics over
    # the pixel (lane) axis.  var = E[y^2] - mean^2; cancellation is benign
    # here (|mean| << std for these statistics) but clamp at 0 to be safe.
    p = y.shape[1]
    inv_p = 1.0 / p
    s = jnp.sum(y, axis=1, keepdims=True)            # (Ct, 1)
    ss = jnp.sum(y * y, axis=1, keepdims=True)       # (Ct, 1)
    mean = s * inv_p
    var = jnp.maximum(ss * inv_p - mean * mean, 0.0)
    inv_std = jax.lax.rsqrt(var + EPS)

    # Fold BN into a per-channel affine, then ReLU.
    scale = gamma_ref[...] * inv_std                 # (Ct, 1)
    shift = beta_ref[...] - mean * scale             # (Ct, 1)
    o_ref[...] = jnp.maximum(y * scale + shift, 0.0)


def _pick_cout_tile(cout):
    # 2-3 grid steps is the sweet spot; tile must be a multiple of 8.
    for t in (96, 64, 48, 32, 16, 8):
        if cout % t == 0:
            return t
    return cout


def conv_bn_relu(x_nchw, w_oihw, gamma, beta):
    """x_nchw: (N, Cin, H, W) f32;  w_oihw: (Cout, Cin, 1, 1) f32."""
    N, Cin, H, W = x_nchw.shape
    Cout = w_oihw.shape[0]
    P = N * H * W

    # Zero-copy glue for N == 1 (the module's shape); transpose fallback otherwise.
    if N == 1:
        x_cp = x_nchw.reshape(Cin, P)                              # (Cin, P)
    else:
        x_cp = jnp.transpose(x_nchw, (1, 0, 2, 3)).reshape(Cin, P)
    w_mat = w_oihw.reshape(Cout, Cin)                              # (Cout, Cin), no transpose
    gamma2 = gamma.reshape(Cout, 1)
    beta2 = beta.reshape(Cout, 1)

    ct = _pick_cout_tile(Cout)
    grid = (Cout // ct,)

    cost = pl.CostEstimate(
        flops=2 * P * Cin * Cout,
        transcendentals=Cout,  # rsqrt per output channel
        bytes_accessed=(P * Cin + Cin * Cout + P * Cout + 2 * Cout) * 4,
    )

    out_flat = pl.pallas_call(
        conv_bn_relu_kernel,
        out_shape=jax.ShapeDtypeStruct((Cout, P), jnp.float32),
        grid=grid,
        in_specs=[
            pl.BlockSpec((ct, Cin), lambda i: (i, 0)),   # W slice (pipelined)
            pl.BlockSpec((Cin, P), lambda i: (0, 0)),    # X, same block -> loaded once
            pl.BlockSpec((ct, 1), lambda i: (i, 0)),     # gamma slice
            pl.BlockSpec((ct, 1), lambda i: (i, 0)),     # beta slice
        ],
        out_specs=pl.BlockSpec((ct, P), lambda i: (i, 0)),
        compiler_params=pltpu.CompilerParams(
            # "arbitrary": keep on one core so X isn't fetched once per TC.
            dimension_semantics=("arbitrary",),
        ),
        cost_estimate=cost,
    )(w_mat, x_cp, gamma2, beta2)

    # Zero-copy back to NCHW for N == 1.
    if N == 1:
        return out_flat.reshape(1, Cout, H, W)
    return jnp.transpose(out_flat.reshape(Cout, N, H, W), (1, 0, 2, 3))


def reference(x_nchw, w_oihw, gamma, beta):
    """Pure-JAX reference (PyTorch forward semantics, batch statistics)."""
    N, Cin, H, W = x_nchw.shape
    Cout = w_oihw.shape[0]
    w_mat = w_oihw.reshape(Cout, Cin)
    x_flat = x_nchw.reshape(N, Cin, H * W)
    y = jnp.einsum('oc,ncp->nop', w_mat, x_flat)                    # (N, Cout, P)
    mean = jnp.mean(y, axis=(0, 2), keepdims=True)
    var = jnp.mean((y - mean) ** 2, axis=(0, 2), keepdims=True)
    out = (y - mean) / jnp.sqrt(var + EPS) * gamma.reshape(1, -1, 1) + beta.reshape(1, -1, 1)
    return jnp.maximum(out, 0.0).reshape(N, Cout, H, W)


if __name__ == "__main__":
    key = jax.random.PRNGKey(0)
    k_x, k_w, k_g, k_b = jax.random.split(key, 4)

    N, Cin, H, W, Cout = 1, 1200, 14, 14, 192

    x = jax.random.normal(k_x, (N, Cin, H, W), dtype=jnp.float32)
    # Conv2d weight (Cout, Cin, 1, 1), bias=False
    w = jax.random.normal(k_w, (Cout, Cin, 1, 1), dtype=jnp.float32) * 0.02
    # BatchNorm affine parameters
    gamma = 1.0 + 0.1 * jax.random.normal(k_g, (Cout,), dtype=jnp.float32)
    beta = 0.1 * jax.random.normal(k_b, (Cout,), dtype=jnp.float32)

    # TODO(synk): running_mean / running_var updates (track_running_stats) are
    # not produced; forward normalization uses batch statistics as in training.
    out = conv_bn_relu(x, w, gamma, beta)
    out = jax.block_until_ready(out)

    ref = reference(x, w, gamma, beta)
    assert out.shape == (N, Cout, H, W)
    assert jnp.allclose(out, ref, atol=1e-3, rtol=1e-3), "mismatch vs reference"

    print("KERNEL_OK")
</pallas_src>

<mosaic_0001>
module attributes {stable_mosaic.version = 11 : i64} {
  func.func @conv_bn_relu_kernel(%arg0: i32, %arg1: memref<96x1200xf32, #tpu.memory_space<vmem>>, %arg2: memref<1200x196xf32, #tpu.memory_space<vmem>>, %arg3: memref<96x1xf32, #tpu.memory_space<vmem>>, %arg4: memref<96x1xf32, #tpu.memory_space<vmem>>, %arg5: memref<96x196xf32, #tpu.memory_space<vmem>>) attributes {dimension_semantics = [#tpu.dimension_semantics<arbitrary>], iteration_bounds = array<i64: 2>, scalar_prefetch = 0 : i64, scratch_operands = 0 : i64, tpu.core_type = #tpu.core_type<tc>, window_params = [{transform_indices = @transform_0, window_bounds = array<i64: 96, 1200>}, {pipeline_mode = #tpu.pipeline_mode<synchronous>, transform_indices = @transform_1, window_bounds = array<i64: 1200, 196>}, {transform_indices = @transform_2, window_bounds = array<i64: 96, 1>}, {transform_indices = @transform_3, window_bounds = array<i64: 96, 1>}, {transform_indices = @transform_4, window_bounds = array<i64: 96, 196>}]} {
    %c0 = arith.constant 0 : index
    %c0_0 = arith.constant 0 : index
    %0 = vector.load %arg1[%c0, %c0_0] : memref<96x1200xf32, #tpu.memory_space<vmem>>, vector<96x1200xf32>
    %c0_1 = arith.constant 0 : index
    %c0_2 = arith.constant 0 : index
    %1 = vector.load %arg2[%c0_1, %c0_2] : memref<1200x196xf32, #tpu.memory_space<vmem>>, vector<1200x196xf32>
    %cst = arith.constant dense<0.000000e+00> : vector<96x196xf32>
    %2 = tpu.matmul %0, %1, %cst {dimension_numbers = #tpu.dot_dimension_numbers<[1], [0], [0], [1], [0, 0, 1, 1], [], []>} : vector<96x1200xf32>, vector<1200x196xf32>, vector<96x196xf32> -> vector<96x196xf32>
    %cst_3 = arith.constant dense<0.000000e+00> : vector<96xf32>
    %3 = vector.multi_reduction <add>, %2, %cst_3 [1] : vector<96x196xf32> to vector<96xf32>
    %4 = vector.shape_cast %3 : vector<96xf32> to vector<96x1xf32>
    %5 = arith.mulf %2, %2 : vector<96x196xf32>
    %cst_4 = arith.constant dense<0.000000e+00> : vector<96xf32>
    %6 = vector.multi_reduction <add>, %5, %cst_4 [1] : vector<96x196xf32> to vector<96xf32>
    %7 = vector.shape_cast %6 : vector<96xf32> to vector<96x1xf32>
    %cst_5 = arith.constant 0.00510204071 : f32
    %8 = vector.broadcast %cst_5 : f32 to vector<96x1xf32>
    %9 = arith.mulf %4, %8 : vector<96x1xf32>
    %cst_6 = arith.constant 0.00510204071 : f32
    %10 = vector.broadcast %cst_6 : f32 to vector<96x1xf32>
    %11 = arith.mulf %7, %10 : vector<96x1xf32>
    %12 = arith.mulf %9, %9 : vector<96x1xf32>
    %13 = arith.subf %11, %12 : vector<96x1xf32>
    %cst_7 = arith.constant 0.000000e+00 : f32
    %14 = vector.broadcast %cst_7 : f32 to vector<96x1xf32>
    %15 = arith.maximumf %13, %14 : vector<96x1xf32>
    %cst_8 = arith.constant 9.99999974E-6 : f32
    %16 = vector.broadcast %cst_8 : f32 to vector<96x1xf32>
    %17 = arith.addf %15, %16 : vector<96x1xf32>
    %18 = math.rsqrt %17 : vector<96x1xf32>
    %c0_9 = arith.constant 0 : index
    %c0_10 = arith.constant 0 : index
    %19 = vector.load %arg3[%c0_9, %c0_10] : memref<96x1xf32, #tpu.memory_space<vmem>>, vector<96x1xf32>
    %20 = arith.mulf %19, %18 : vector<96x1xf32>
    %c0_11 = arith.constant 0 : index
    %c0_12 = arith.constant 0 : index
    %21 = vector.load %arg4[%c0_11, %c0_12] : memref<96x1xf32, #tpu.memory_space<vmem>>, vector<96x1xf32>
    %22 = arith.mulf %9, %20 : vector<96x1xf32>
    %23 = arith.subf %21, %22 : vector<96x1xf32>
    %24 = vector.broadcast %20 : vector<96x1xf32> to vector<96x196xf32>
    %25 = arith.mulf %2, %24 : vector<96x196xf32>
    %26 = vector.broadcast %23 : vector<96x1xf32> to vector<96x196xf32>
    %27 = arith.addf %25, %26 : vector<96x196xf32>
    %cst_13 = arith.constant 0.000000e+00 : f32
    %28 = vector.broadcast %cst_13 : f32 to vector<96x196xf32>
    %29 = arith.maximumf %27, %28 : vector<96x196xf32>
    %c0_14 = arith.constant 0 : index
    %c0_15 = arith.constant 0 : index
    %30 = vector.load %arg5[%c0_14, %c0_15] : memref<96x196xf32, #tpu.memory_space<vmem>>, vector<96x196xf32>
    tpu.vector_store %arg5[%c0_14, %c0_15], %29 {strides = array<i32>} : memref<96x196xf32, #tpu.memory_space<vmem>>, vector<96x196xf32>,
    return
  }
  func.func @transform_0(%arg0: i32) -> (i32, i32) {
    %c0_i32 = arith.constant 0 : i32
    %c0_i32_0 = arith.constant 0 : i32
    return %arg0, %c0_i32 : i32, i32
  }
  func.func @transform_1(%arg0: i32) -> (i32, i32) {
    %c0_i32 = arith.constant 0 : i32
    %c0_i32_0 = arith.constant 0 : i32
    %c0_i32_1 = arith.constant 0 : i32
    return %c0_i32, %c0_i32_0 : i32, i32
  }
  func.func @transform_2(%arg0: i32) -> (i32, i32) {
    %c0_i32 = arith.constant 0 : i32
    %c0_i32_0 = arith.constant 0 : i32
    return %arg0, %c0_i32 : i32, i32
  }
  func.func @transform_3(%arg0: i32) -> (i32, i32) {
    %c0_i32 = arith.constant 0 : i32
    %c0_i32_0 = arith.constant 0 : i32
    return %arg0, %c0_i32 : i32, i32
  }
  func.func @transform_4(%arg0: i32) -> (i32, i32) {
    %c0_i32 = arith.constant 0 : i32
    %c0_i32_0 = arith.constant 0 : i32
    return %arg0, %c0_i32 : i32, i32
  }
}

</mosaic_0001>

<bundles_post_ra>
// kernel: tpu_custom_call.1
= control target key start
LH: loop header
LB: loop body
LE: loop exit
PB: predicated region body
PF: predicated region fallthrough
CT: control target
= control target key end

     0   :  { %9 = vsyncpa [#allocation3], 0  ;;  %s4627_s0 = inlined_call_operand.vmem [shape: f32[192,1200], index: 0, kind: input, shape index: {}]   ;;  %s4628_s1 = inlined_call_operand.vmem [shape: f32[1200,196], index: 1, kind: input, shape index: {}]   ;;  %s4629_s2 = inlined_call_operand.vmem [shape: f32[192,1], index: 2, kind: input, shape index: {}]   ;;  %s4630_s3 = inlined_call_operand.vmem [shape: f32[192,1], index: 3, kind: input, shape index: {}]   ;;  %s4631_s4 = inlined_call_operand.hbm [shape: f32[192,196], index: 4, kind: output, shape index: {}]  }
   0x1   :  { %11 = vsyncpa [#allocation3 + $0x1], 0  ;;  %s2748_s15 = smov 0   ;;  %s2750_s16 = smov 0  }
   0x2   :  { %s2752_s17 = smov 0   ;;  %s2754_s18 = smov 0  }
   0x3 LB: > { %s2769_s19 = sadd.s32 4294967295, %s2718_s18   ;;  %s2455_s20 = sadd.s32 4294967294, %s2718_s18   ;;  %s2718_s18 = sphi %s2754_s18, %s4660_s18   ;;  %s2714_s17 = sphi %s2752_s17, %s4659_s17   ;;  %s2710_s16 = sphi %s2750_s16, %s4658_s16   ;;  %s2706_s15 = sphi %s2748_s15, %s4657_s15  }
   0x4   : > { %s2773_s21 = sadd.s32 1, %s2718_s18   ;;  %s123_s22 = sadd.s32 1, %s2714_s17 }
   0x5   : > { %s120_s23 = ssub.s32 %s2718_s18, %s2773_s21  ;;  %p133_p0 = scmp.ne.s32.totalorder %s2714_s17, %s2710_s16 }
   0x6   : > { %p121_p1 = scmp.eq.s32.totalorder %s120_s23, 0  ;;  %p134_p2 = scmp.eq.s32.totalorder %s2769_s19, 1 }
   0x7   : > { %p139_p3 = scmp.ne.s32.totalorder %s2710_s16, %s2706_s15  ;;  %p140_p4 = scmp.eq.s32.totalorder %s2455_s20, 1 }
   0x8   : > { %s2784_s24 = scalar_select %p121_p1, %s2714_s17, %s123_s22  }
   0x9   : > { %p2786_p5 = por %p134_p2, %p133_p0  ;;  %p2790_p6 = por %p140_p4, %p139_p3 }
   0xa   : > { %p2458_p7 = scmp.ge.s32.totalorder %s2718_s18, 1  ;;  %p189_p8 = scmp.lt.s32.totalorder %s2718_s18, 3 }
   0xc   : > { %p190_p9 = pnand %p2458_p7, %p189_p8 }
   0xe   : > { %193 = sbr.rel (%p190_p9) target bundleno = 940 (0x3ac), region = 36 }
  0x13   : > { %v396_v0 = vld [vmem:[%s4628_s1 + $0xf0] sm:$0xff]  ;;  %v394_v3 = vld [vmem:[%s4628_s1 + $0xe0] sm:$0xff]  ;;  %s226_s28 = smul.u32 12, %s2769_s19  ;;  %vm666_vm0 = vcmask 392192   ;;  %vm1763_vm1 = vcmask 556032   ;;  %s223_s23 = sand.u32 1, %s2710_s16  }
  0x14   : > { %v460_v1 = vld [vmem:[%s4628_s1 + $0x2f0] sm:$0xff]  ;;  %703 = vmatpush.msra.mxu0 %v396_v0  ;;  %v458_v5 = vld [vmem:[%s4628_s1 + $0x2e0] sm:$0xff]  ;;  %s2493_s27 = smul.u32 192, %s223_s23  ;;  %s2353_s11 = scalar_lea.sflag [#allocation3], %s223_s23 }
  0x15   : > { %v492_v2 = vld [vmem:[%s4628_s1 + $0x3f0] sm:$0xff]  ;;  %809 = vmatpush.msra.mxu2 %v460_v1  ;;  %v490_v6 = vld [vmem:[%s4628_s1 + $0x3e0] sm:$0xff]  ;;  %p2901_p10 = scmp.lt.s32.totalorder %s226_s28, 23  ;;  %s2492_s6 = smul.u32 192, %s2769_s19 }
  0x16   : > { %v428_v4 = vld [vmem:[%s4628_s1 + $0x1f0] sm:$0xff]  ;;  %862 = vmatpush.msra.mxu3 %v492_v2  ;;  %v426_v8 = vld [vmem:[%s4628_s1 + $0x1e0] sm:$0xff]  ;;  %704 = vmatpush.msra.mxu0 %v394_v3  ;;  %s4533_s30 = scalar_lea.vmem [#allocation2], %s2493_s27 }
  0x17   : > { %756 = vmatpush.msra.mxu1 %v428_v4  ;;  %v392_v7 = vld [vmem:[%s4628_s1 + $0xd0] sm:$0xff]  ;;  %810 = vmatpush.msra.mxu2 %v458_v5  ;;  %v390_v11 = vld [vmem:[%s4628_s1 + $0xc0] sm:$0xff]  ;;  %s4662_s28 = smov (!%p2901_p10, %s226_s28), 23  ;;  %s2365_s10 = scalar_lea.hbm %s4631_s4, %s2492_s6 }
  0x18   : > { %v456_v9 = vld [vmem:[%s4628_s1 + $0x2d0] sm:$0xff]  ;;  %863 = vmatpush.msra.mxu3 %v490_v6  ;;  %v454_v13 = vld [vmem:[%s4628_s1 + $0x2c0] sm:$0xff]  ;;  %705 = vmatpush.msra.mxu0 %v392_v7  ;;  %s2494_s5 = smul.u32 80, %s4662_s28  ;;  %s2366_s29 = sshll.u32 %s4533_s30, 4  ;;  %s2367_s29 = int_to_ptr.vmem [resolvable:$true] %s2366_s29 }
  0x19   : > { %v488_v10 = vld [vmem:[%s4628_s1 + $0x3d0] sm:$0xff]  ;;  %757 = vmatpush.msra.mxu1 %v426_v8  ;;  %811 = vmatpush.msra.mxu2 %v456_v9  ;;  %v486_v14 = vld [vmem:[%s4628_s1 + $0x3c0] sm:$0xff]  ;;  %s2368_s19 = sshll.u32 %s2365_s10, 4  ;;  %s2369_s19 = int_to_ptr.hbm [resolvable:$true] %s2368_s19 }
  0x1a   : > { %v424_v12 = vld [vmem:[%s4628_s1 + $0x1d0] sm:$0xff]  ;;  %v422_v15 = vld [vmem:[%s4628_s1 + $0x1c0] sm:$0xff]  ;;  %864 = vmatpush.msra.mxu3 %v488_v10  ;;  %706 = vmatpush.msra.mxu0 %v390_v11  ;;  %s2987_s9 = scalar_lea.vmem %s4627_s0, %s2494_s5  ;;  %s2670_s12 = sshra.s32 %s2369_s19, 4  ;;  %s2671_s12 = int_to_ptr.hbm [resolvable:$true] %s2670_s12 }
  0x1b   : > { %758 = vmatpush.msra.mxu1 %v424_v12  ;;  %v388_v16 = vld [vmem:[%s4628_s1 + $0xb0] sm:$0xff]  ;;  %812 = vmatpush.msra.mxu2 %v454_v13  ;;  %v386_v20 = vld [vmem:[%s4628_s1 + $0xa0] sm:$0xff]  ;;  %v249_v1 = vld [vmem:[%s2987_s9 + $0x18] sm:$0xff]  ;;  %p2677_p0 = scmp.lt.s32.totalorder %s2671_s12, %s4631_s4 }
  0x1c   : > { %v452_v17 = vld [vmem:[%s4628_s1 + $0x2b0] sm:$0xff]  ;;  %865 = vmatpush.msra.mxu3 %v486_v14  ;;  %v450_v21 = vld [vmem:[%s4628_s1 + $0x2a0] sm:$0xff]  ;;  %707 = vmatpush.msra.mxu0 %v388_v16  ;;  %v247_v4 = vld [vmem:[%s2987_s9 + $0x8] sm:$0xff] }
  0x1d   : > { %v484_v18 = vld [vmem:[%s4628_s1 + $0x3b0] sm:$0xff]  ;;  %759 = vmatpush.msra.mxu1 %v422_v15  ;;  %813 = vmatpush.msra.mxu2 %v452_v17  ;;  %v482_v22 = vld [vmem:[%s4628_s1 + $0x3a0] sm:$0xff]  ;;  %v259_v17 = vld [vmem:[%s2987_s9 + $0x68] sm:$0xff] }
  0x1e   : > { %v420_v19 = vld [vmem:[%s4628_s1 + $0x1b0] sm:$0xff]  ;;  %v418_v23 = vld [vmem:[%s4628_s1 + $0x1a0] sm:$0xff]  ;;  %866 = vmatpush.msra.mxu3 %v484_v18  ;;  %708 = vmatpush.msra.mxu0 %v386_v20  ;;  %v257_v20 = vld [vmem:[%s2987_s9 + $0x58] sm:$0xff] }
  0x1f   : > { %760 = vmatpush.msra.mxu1 %v420_v19  ;;  %v384_v24 = vld [vmem:[%s4628_s1 + $0x90] sm:$0xff]  ;;  %814 = vmatpush.msra.mxu2 %v450_v21  ;;  %v382_v28 = vld [vmem:[%s4628_s1 + $0x80] sm:$0xff] }
  0x20   : > { %v448_v25 = vld [vmem:[%s4628_s1 + $0x290] sm:$0xff]  ;;  %867 = vmatpush.msra.mxu3 %v482_v22  ;;  %v446_v29 = vld [vmem:[%s4628_s1 + $0x280] sm:$0xff]  ;;  %709 = vmatpush.msra.mxu0 %v384_v24 }
  0x21   : > { %v480_v26 = vld [vmem:[%s4628_s1 + $0x390] sm:$0xff]  ;;  %761 = vmatpush.msra.mxu1 %v418_v23  ;;  %815 = vmatpush.msra.mxu2 %v448_v25  ;;  %v478_v30 = vld [vmem:[%s4628_s1 + $0x380] sm:$0xff] }
  0x22   : > { %v416_v27 = vld [vmem:[%s4628_s1 + $0x190] sm:$0xff]  ;;  %v414_v31 = vld [vmem:[%s4628_s1 + $0x180] sm:$0xff]  ;;  %868 = vmatpush.msra.mxu3 %v480_v26  ;;  %710 = vmatpush.msra.mxu0 %v382_v28 }
  0x23   : > { %762 = vmatpush.msra.mxu1 %v416_v27  ;;  %v380_v32 = vld [vmem:[%s4628_s1 + $0x70] sm:$0xff]  ;;  %816 = vmatpush.msra.mxu2 %v446_v29  ;;  %v378_v36 = vld [vmem:[%s4628_s1 + $0x60] sm:$0xff] }
  0x24   : > { %v444_v33 = vld [vmem:[%s4628_s1 + $0x270] sm:$0xff]  ;;  %869 = vmatpush.msra.mxu3 %v478_v30  ;;  %v442_v37 = vld [vmem:[%s4628_s1 + $0x260] sm:$0xff]  ;;  %711 = vmatpush.msra.mxu0 %v380_v32 }
  0x25   : > { %v476_v34 = vld [vmem:[%s4628_s1 + $0x370] sm:$0xff]  ;;  %763 = vmatpush.msra.mxu1 %v414_v31  ;;  %817 = vmatpush.msra.mxu2 %v444_v33  ;;  %v474_v38 = vld [vmem:[%s4628_s1 + $0x360] sm:$0xff]  ;;  %v269_v33 = vld [vmem:[%s2987_s9 + $0xb8] sm:$0xff] }
  0x26   : > { %v412_v35 = vld [vmem:[%s4628_s1 + $0x170] sm:$0xff]  ;;  %v410_v39 = vld [vmem:[%s4628_s1 + $0x160] sm:$0xff]  ;;  %870 = vmatpush.msra.mxu3 %v476_v34  ;;  %712 = vmatpush.msra.mxu0 %v378_v36  ;;  %v267_v36 = vld [vmem:[%s2987_s9 + $0xa8] sm:$0xff] }
  0x27   : > { %764 = vmatpush.msra.mxu1 %v412_v35  ;;  %v376_v40 = vld [vmem:[%s4628_s1 + $0x50] sm:$0xff]  ;;  %818 = vmatpush.msra.mxu2 %v442_v37  ;;  %v374_v44 = vld [vmem:[%s4628_s1 + $0x40] sm:$0xff] }
  0x28   : > { %v440_v41 = vld [vmem:[%s4628_s1 + $0x250] sm:$0xff]  ;;  %871 = vmatpush.msra.mxu3 %v474_v38  ;;  %v438_v45 = vld [vmem:[%s4628_s1 + $0x240] sm:$0xff]  ;;  %713 = vmatpush.msra.mxu0 %v376_v40 }
  0x29   : > { %v472_v42 = vld [vmem:[%s4628_s1 + $0x350] sm:$0xff]  ;;  %765 = vmatpush.msra.mxu1 %v410_v39  ;;  %819 = vmatpush.msra.mxu2 %v440_v41  ;;  %v470_v46 = vld [vmem:[%s4628_s1 + $0x340] sm:$0xff] }
  0x2a   : > { %v408_v43 = vld [vmem:[%s4628_s1 + $0x150] sm:$0xff]  ;;  %v406_v47 = vld [vmem:[%s4628_s1 + $0x140] sm:$0xff]  ;;  %872 = vmatpush.msra.mxu3 %v472_v42  ;;  %714 = vmatpush.msra.mxu0 %v374_v44 }
  0x2b   : > { %766 = vmatpush.msra.mxu1 %v408_v43  ;;  %v372_v48 = vld [vmem:[%s4628_s1 + $0x30] sm:$0xff]  ;;  %820 = vmatpush.msra.mxu2 %v438_v45  ;;  %v370_v52 = vld [vmem:[%s4628_s1 + $0x20] sm:$0xff] }
  0x2c   : > { %v436_v49 = vld [vmem:[%s4628_s1 + $0x230] sm:$0xff]  ;;  %873 = vmatpush.msra.mxu3 %v470_v46  ;;  %v434_v53 = vld [vmem:[%s4628_s1 + $0x220] sm:$0xff]  ;;  %715 = vmatpush.msra.mxu0 %v372_v48 }
  0x2d   : > { %v468_v50 = vld [vmem:[%s4628_s1 + $0x330] sm:$0xff]  ;;  %767 = vmatpush.msra.mxu1 %v406_v47  ;;  %821 = vmatpush.msra.mxu2 %v436_v49  ;;  %v466_v54 = vld [vmem:[%s4628_s1 + $0x320] sm:$0xff]  ;;  %v279_v49 = vld [vmem:[%s2987_s9 + $0x108] sm:$0xff] }
  0x2e   : > { %v404_v51 = vld [vmem:[%s4628_s1 + $0x130] sm:$0xff]  ;;  %v402_v55 = vld [vmem:[%s4628_s1 + $0x120] sm:$0xff]  ;;  %874 = vmatpush.msra.mxu3 %v468_v50  ;;  %716 = vmatpush.msra.mxu0 %v370_v52  ;;  %v3134_v52 = vld [vmem:[%s2987_s9 + $0xf8] sm:$0xff] }
  0x2f   : > { %768 = vmatpush.msra.mxu1 %v404_v51  ;;  %v368_v56 = vld [vmem:[%s4628_s1 + $0x10] sm:$0xff]  ;;  %822 = vmatpush.msra.mxu2 %v434_v53  ;;  %v366_v60 = vld [vmem:[%s4628_s1] sm:$0xff] }
  0x30   : > { %v432_v57 = vld [vmem:[%s4628_s1 + $0x210] sm:$0xff]  ;;  %875 = vmatpush.msra.mxu3 %v466_v54  ;;  %v430_v61 = vld [vmem:[%s4628_s1 + $0x200] sm:$0xff]  ;;  %717 = vmatpush.msra.mxu0 %v368_v56 }
  0x31   : > { %v464_v58 = vld [vmem:[%s4628_s1 + $0x310] sm:$0xff]  ;;  %769 = vmatpush.msra.mxu1 %v402_v55  ;;  %823 = vmatpush.msra.mxu2 %v432_v57  ;;  %v462_v62 = vld [vmem:[%s4628_s1 + $0x300] sm:$0xff] }
  0x32   : > { %v400_v59 = vld [vmem:[%s4628_s1 + $0x110] sm:$0xff]  ;;  %v246_v63 = vld [vmem:[%s2987_s9] sm:$0xff]  ;;  %876 = vmatpush.msra.mxu3 %v464_v58  ;;  %718 = vmatpush.msra.mxu0 %v366_v60 }
  0x33   : > { %770 = vmatpush.msra.mxu1 %v400_v59  ;;  %v248_v0 = vld [vmem:[%s2987_s9 + $0x10] sm:$0xff]  ;;  %824 = vmatpush.msra.mxu2 %v430_v61  ;;  %v398_v3 = vld [vmem:[%s4628_s1 + $0x100] sm:$0xff]  ;;  %v289_v61 = vld [vmem:[%s2987_s9 + $0x158] sm:$0xff] }
  0x34   : > { %v588_v2 = vld [vmem:[%s4628_s1 + $0x6f0] sm:$0xff]  ;;  %877 = vmatpush.msra.mxu3 %v462_v62  ;;  %719 = vmatmul.f32.vlgmr.msra.gmra.mxu0 %v246_v63  ;;  %v586_v8 = vld [vmem:[%s4628_s1 + $0x6e0] sm:$0xff]  ;;  %v3159_v62 = vld [vmem:[%s2987_s9 + $0x148] sm:$0xff] }
  0x35   : > { %v524_v5 = vld [vmem:[%s4628_s1 + $0x4f0] sm:$0xff]  ;;  %825 = vmatmul.f32.vlgmr.msra.gmra.mxu2 %v248_v0  ;;  %878 = vmatmul.f32.vlgmr.msra.gmra.mxu3 %v249_v1  ;;  %v522_v9 = vld [vmem:[%s4628_s1 + $0x4e0] sm:$0xff] }
  0x36   : > { %v620_v6 = vld [vmem:[%s4628_s1 + $0x7f0] sm:$0xff]  ;;  %1021 = vmatpush.msrb.mxu2 %v588_v2  ;;  %771 = vmatpush.msra.mxu1 %v398_v3  ;;  %v618_v10 = vld [vmem:[%s4628_s1 + $0x7e0] sm:$0xff] }
  0x37   : > { %v556_v7 = vld [vmem:[%s4628_s1 + $0x5f0] sm:$0xff]  ;;  %772 = vmatmul.f32.vlgmr.msra.gmra.mxu1 %v247_v4  ;;  %915 = vmatpush.msrb.mxu0 %v524_v5  ;;  %v554_v11 = vld [vmem:[%s4628_s1 + $0x5e0] sm:$0xff] }
  0x38   : > { %1074 = vmatpush.msrb.mxu3 %v620_v6  ;;  %968 = vmatpush.msrb.mxu1 %v556_v7  ;;  %v584_v12 = vld [vmem:[%s4628_s1 + $0x6d0] sm:$0xff]  ;;  %v258_v16 = vld [vmem:[%s2987_s9 + $0x60] sm:$0xff]  ;;  %v299_v6 = vld [vmem:[%s2987_s9 + $0x1a8] sm:$0xff] }
  0x39   : > { %v520_v13 = vld [vmem:[%s4628_s1 + $0x4d0] sm:$0xff]  ;;  %1022 = vmatpush.msrb.mxu2 %v586_v8  ;;  %916 = vmatpush.msrb.mxu0 %v522_v9  ;;  %v582_v19 = vld [vmem:[%s4628_s1 + $0x6c0] sm:$0xff]  ;;  %v297_v7 = vld [vmem:[%s2987_s9 + $0x198] sm:$0xff] }
  0x3a   : > { %v256_v14 = vld [vmem:[%s2987_s9 + $0x50] sm:$0xff]  ;;  %1075 = vmatpush.msrb.mxu3 %v618_v10  ;;  %969 = vmatpush.msrb.mxu1 %v554_v11  ;;  %v518_v21 = vld [vmem:[%s4628_s1 + $0x4c0] sm:$0xff] }
  0x3b   : > { %v616_v15 = vld [vmem:[%s4628_s1 + $0x7d0] sm:$0xff]  ;;  %1023 = vmatpush.msrb.mxu2 %v584_v12  ;;  %917 = vmatpush.msrb.mxu0 %v520_v13  ;;  %v614_v22 = vld [vmem:[%s4628_s1 + $0x7c0] sm:$0xff] }
  0x3c   : > { %v552_v18 = vld [vmem:[%s4628_s1 + $0x5d0] sm:$0xff]  ;;  %722 = vmatmul.f32.gmra.mxu0 %v256_v14  ;;  %1076 = vmatpush.msrb.mxu3 %v616_v15  ;;  %v550_v23 = vld [vmem:[%s4628_s1 + $0x5c0] sm:$0xff]  ;;  %v309_v15 = vld [vmem:[%s2987_s9 + $0x1f8] sm:$0xff] }
  0x3d   : > { %828 = vmatmul.f32.gmra.mxu2 %v258_v16  ;;  %881 = vmatmul.f32.gmra.mxu3 %v259_v17  ;;  %v580_v24 = vld [vmem:[%s4628_s1 + $0x6b0] sm:$0xff]  ;;  %v578_v28 = vld [vmem:[%s4628_s1 + $0x6a0] sm:$0xff]  ;;  %v307_v16 = vld [vmem:[%s2987_s9 + $0x1e8] sm:$0xff] }
  0x3e   : > { %970 = vmatpush.msrb.mxu1 %v552_v18  ;;  %1024 = vmatpush.msrb.mxu2 %v582_v19  ;;  %v516_v25 = vld [vmem:[%s4628_s1 + $0x4b0] sm:$0xff]  ;;  %v514_v29 = vld [vmem:[%s4628_s1 + $0x4a0] sm:$0xff] }
  0x3f   : > { %775 = vmatmul.f32.gmra.mxu1 %v257_v20  ;;  %918 = vmatpush.msrb.mxu0 %v518_v21  ;;  %v612_v26 = vld [vmem:[%s4628_s1 + $0x7b0] sm:$0xff]  ;;  %v266_v30 = vld [vmem:[%s2987_s9 + $0xa0] sm:$0xff] }
  0x40   : > { %v548_v27 = vld [vmem:[%s4628_s1 + $0x5b0] sm:$0xff]  ;;  %1077 = vmatpush.msrb.mxu3 %v614_v22  ;;  %971 = vmatpush.msrb.mxu1 %v550_v23  ;;  %v610_v31 = vld [vmem:[%s4628_s1 + $0x7a0] sm:$0xff] }
  0x41   : > { %1025 = vmatpush.msrb.mxu2 %v580_v24  ;;  %919 = vmatpush.msrb.mxu0 %v516_v25  ;;  %v268_v32 = vld [vmem:[%s2987_s9 + $0xb0] sm:$0xff]  ;;  %v546_v34 = vld [vmem:[%s4628_s1 + $0x5a0] sm:$0xff]  ;;  %v319_v25 = vld [vmem:[%s2987_s9 + $0x248] sm:$0xff] }
  0x42   : > { %1078 = vmatpush.msrb.mxu3 %v612_v26  ;;  %972 = vmatpush.msrb.mxu1 %v548_v27  ;;  %v576_v35 = vld [vmem:[%s4628_s1 + $0x690] sm:$0xff]  ;;  %v574_v40 = vld [vmem:[%s4628_s1 + $0x680] sm:$0xff]  ;;  %v317_v26 = vld [vmem:[%s2987_s9 + $0x238] sm:$0xff] }
  0x43   : > { %1026 = vmatpush.msrb.mxu2 %v578_v28  ;;  %920 = vmatpush.msrb.mxu0 %v514_v29  ;;  %v512_v37 = vld [vmem:[%s4628_s1 + $0x490] sm:$0xff]  ;;  %v510_v41 = vld [vmem:[%s4628_s1 + $0x480] sm:$0xff] }
  0x44   : > { %725 = vmatmul.f32.gmra.mxu0 %v266_v30  ;;  %1079 = vmatpush.msrb.mxu3 %v610_v31  ;;  %v608_v38 = vld [vmem:[%s4628_s1 + $0x790] sm:$0xff]  ;;  %v606_v42 = vld [vmem:[%s4628_s1 + $0x780] sm:$0xff] }
  0x45   : > { %831 = vmatmul.f32.gmra.mxu2 %v268_v32  ;;  %884 = vmatmul.f32.gmra.mxu3 %v269_v33  ;;  %v544_v39 = vld [vmem:[%s4628_s1 + $0x590] sm:$0xff]  ;;  %v542_v43 = vld [vmem:[%s4628_s1 + $0x580] sm:$0xff] }
  0x46   : > { %973 = vmatpush.msrb.mxu1 %v546_v34  ;;  %1027 = vmatpush.msrb.mxu2 %v576_v35  ;;  %v572_v44 = vld [vmem:[%s4628_s1 + $0x670] sm:$0xff]  ;;  %v278_v48 = vld [vmem:[%s2987_s9 + $0x100] sm:$0xff]  ;;  %v329_v34 = vld [vmem:[%s2987_s9 + $0x298] sm:$0xff] }
  0x47   : > { %778 = vmatmul.f32.gmra.mxu1 %v267_v36  ;;  %921 = vmatpush.msrb.mxu0 %v512_v37  ;;  %v508_v45 = vld [vmem:[%s4628_s1 + $0x470] sm:$0xff]  ;;  %v570_v51 = vld [vmem:[%s4628_s1 + $0x660] sm:$0xff]  ;;  %v327_v35 = vld [vmem:[%s2987_s9 + $0x288] sm:$0xff] }
  0x48   : > { %1080 = vmatpush.msrb.mxu3 %v608_v38  ;;  %974 = vmatpush.msrb.mxu1 %v544_v39  ;;  %v276_v46 = vld [vmem:[%s2987_s9 + $0xf0] sm:$0xff]  ;;  %v506_v53 = vld [vmem:[%s4628_s1 + $0x460] sm:$0xff]  ;;  %v397_v36 = vld [vmem:[%s4628_s1 + $0xf8] sm:$0xff] }
  0x49   : > { %1028 = vmatpush.msrb.mxu2 %v574_v40  ;;  %922 = vmatpush.msrb.mxu0 %v510_v41  ;;  %v604_v47 = vld [vmem:[%s4628_s1 + $0x770] sm:$0xff]  ;;  %v602_v54 = vld [vmem:[%s4628_s1 + $0x760] sm:$0xff]  ;;  %v429_v38 = vld [vmem:[%s4628_s1 + $0x1f8] sm:$0xff] }
  0x4a   : > { %1081 = vmatpush.msrb.mxu3 %v606_v42  ;;  %975 = vmatpush.msrb.mxu1 %v542_v43  ;;  %v540_v50 = vld [vmem:[%s4628_s1 + $0x570] sm:$0xff]  ;;  %v538_v55 = vld [vmem:[%s4628_s1 + $0x560] sm:$0xff]  ;;  %v395_v40 = vld [vmem:[%s4628_s1 + $0xe8] sm:$0xff] }
  0x4b   : > { %1029 = vmatpush.msrb.mxu2 %v572_v44  ;;  %923 = vmatpush.msrb.mxu0 %v508_v45  ;;  %v568_v56 = vld [vmem:[%s4628_s1 + $0x650] sm:$0xff]  ;;  %v286_v59 = vld [vmem:[%s2987_s9 + $0x140] sm:$0xff]  ;;  %v339_v43 = vld [vmem:[%s2987_s9 + $0x2e8] sm:$0xff] }
  0x4c   : > { %728 = vmatmul.f32.gmra.mxu0 %v276_v46  ;;  %1082 = vmatpush.msrb.mxu3 %v604_v47  ;;  %v504_v57 = vld [vmem:[%s4628_s1 + $0x450] sm:$0xff]  ;;  %v566_v0 = vld [vmem:[%s4628_s1 + $0x640] sm:$0xff]  ;;  %v337_v44 = vld [vmem:[%s2987_s9 + $0x2d8] sm:$0xff] }
  0x4d   : > { %834 = vmatmul.f32.gmra.mxu2 %v278_v48  ;;  %887 = vmatmul.f32.gmra.mxu3 %v279_v49  ;;  %v600_v58 = vld [vmem:[%s4628_s1 + $0x750] sm:$0xff]  ;;  %v502_v1 = vld [vmem:[%s4628_s1 + $0x440] sm:$0xff]  ;;  %v427_v46 = vld [vmem:[%s4628_s1 + $0x1e8] sm:$0xff] }
  0x4e   : > { %976 = vmatpush.msrb.mxu1 %v540_v50  ;;  %1030 = vmatpush.msrb.mxu2 %v570_v51  ;;  %v288_v60 = vld [vmem:[%s2987_s9 + $0x150] sm:$0xff]  ;;  %v598_v2 = vld [vmem:[%s4628_s1 + $0x740] sm:$0xff]  ;;  %v393_v47 = vld [vmem:[%s4628_s1 + $0xd8] sm:$0xff] }
  0x4f   : > { %781 = vmatmul.f32.gmra.mxu1 %v3134_v52  ;;  %924 = vmatpush.msrb.mxu0 %v506_v53  ;;  %v536_v63 = vld [vmem:[%s4628_s1 + $0x550] sm:$0xff]  ;;  %v534_v3 = vld [vmem:[%s4628_s1 + $0x540] sm:$0xff]  ;;  %v425_v49 = vld [vmem:[%s4628_s1 + $0x1d8] sm:$0xff] }
  0x50   : > { %1083 = vmatpush.msrb.mxu3 %v602_v54  ;;  %977 = vmatpush.msrb.mxu1 %v538_v55  ;;  %v296_v4 = vld [vmem:[%s2987_s9 + $0x190] sm:$0xff]  ;;  %v298_v5 = vld [vmem:[%s2987_s9 + $0x1a0] sm:$0xff]  ;;  %v349_v53 = vld [vmem:[%s2987_s9 + $0x338] sm:$0xff] }
  0x51   : > { %1031 = vmatpush.msrb.mxu2 %v568_v56  ;;  %925 = vmatpush.msrb.mxu0 %v504_v57  ;;  %v564_v8 = vld [vmem:[%s4628_s1 + $0x630] sm:$0xff]  ;;  %v562_v12 = vld [vmem:[%s4628_s1 + $0x620] sm:$0xff]  ;;  %v347_v54 = vld [vmem:[%s2987_s9 + $0x328] sm:$0xff] }
  0x52   : > { %1084 = vmatpush.msrb.mxu3 %v600_v58  ;;  %978 = vmatpush.msrb.mxu1 %v536_v63  ;;  %v500_v9 = vld [vmem:[%s4628_s1 + $0x430] sm:$0xff]  ;;  %v306_v13 = vld [vmem:[%s2987_s9 + $0x1e0] sm:$0xff]  ;;  %v391_v55 = vld [vmem:[%s4628_s1 + $0xc8] sm:$0xff] }
  0x53   : > { %1032 = vmatpush.msrb.mxu2 %v566_v0  ;;  %926 = vmatpush.msrb.mxu0 %v502_v1  ;;  %v596_v10 = vld [vmem:[%s4628_s1 + $0x730] sm:$0xff]  ;;  %v498_v17 = vld [vmem:[%s4628_s1 + $0x420] sm:$0xff]  ;;  %v423_v58 = vld [vmem:[%s4628_s1 + $0x1c8] sm:$0xff] }
  0x54   : > { %731 = vmatmul.f32.gmra.mxu0 %v286_v59  ;;  %1085 = vmatpush.msrb.mxu3 %v598_v2  ;;  %v532_v11 = vld [vmem:[%s4628_s1 + $0x530] sm:$0xff]  ;;  %v594_v18 = vld [vmem:[%s4628_s1 + $0x720] sm:$0xff]  ;;  %v357_v63 = vld [vmem:[%s2987_s9 + $0x378] sm:$0xff] }
  0x55   : > { %837 = vmatmul.f32.gmra.mxu2 %v288_v60  ;;  %890 = vmatmul.f32.gmra.mxu3 %v289_v61  ;;  %v308_v14 = vld [vmem:[%s2987_s9 + $0x1f0] sm:$0xff]  ;;  %v530_v19 = vld [vmem:[%s4628_s1 + $0x520] sm:$0xff]  ;;  %v359_v61 = vld [vmem:[%s2987_s9 + $0x388] sm:$0xff] }
  0x56   : > { %979 = vmatpush.msrb.mxu1 %v534_v3  ;;  %1033 = vmatpush.msrb.mxu2 %v564_v8  ;;  %v560_v20 = vld [vmem:[%s4628_s1 + $0x610] sm:$0xff]  ;;  %v318_v24 = vld [vmem:[%s2987_s9 + $0x240] sm:$0xff]  ;;  %v389_v0 = vld [vmem:[%s4628_s1 + $0xb8] sm:$0xff] }
  0x57   : > { %784 = vmatmul.f32.gmra.mxu1 %v3159_v62  ;;  %927 = vmatpush.msrb.mxu0 %v500_v9  ;;  %v496_v21 = vld [vmem:[%s4628_s1 + $0x410] sm:$0xff]  ;;  %v558_v28 = vld [vmem:[%s4628_s1 + $0x600] sm:$0xff]  ;;  %v421_v2 = vld [vmem:[%s4628_s1 + $0x1b8] sm:$0xff] }
  0x58   : > { %1086 = vmatpush.msrb.mxu3 %v596_v10  ;;  %980 = vmatpush.msrb.mxu1 %v532_v11  ;;  %v592_v22 = vld [vmem:[%s4628_s1 + $0x710] sm:$0xff]  ;;  %v494_v29 = vld [vmem:[%s4628_s1 + $0x400] sm:$0xff]  ;;  %v419_v9 = vld [vmem:[%s4628_s1 + $0x1a8] sm:$0xff] }
  0x59   : > { %1034 = vmatpush.msrb.mxu2 %v562_v12  ;;  %928 = vmatpush.msrb.mxu0 %v498_v17  ;;  %v316_v23 = vld [vmem:[%s2987_s9 + $0x230] sm:$0xff]  ;;  %v590_v30 = vld [vmem:[%s4628_s1 + $0x700] sm:$0xff]  ;;  %v263_v12 = vld [vmem:[%s2987_s9 + $0x88] sm:$0xff] }
  0x5a   : > { %1087 = vmatpush.msrb.mxu3 %v594_v18  ;;  %981 = vmatpush.msrb.mxu1 %v530_v19  ;;  %v528_v27 = vld [vmem:[%s4628_s1 + $0x510] sm:$0xff]  ;;  %v526_v31 = vld [vmem:[%s4628_s1 + $0x500] sm:$0xff]  ;;  %v417_v17 = vld [vmem:[%s4628_s1 + $0x198] sm:$0xff] }
  0x5b   : > { %1035 = vmatpush.msrb.mxu2 %v560_v20  ;;  %929 = vmatpush.msrb.mxu0 %v496_v21  ;;  %v326_v32 = vld [vmem:[%s2987_s9 + $0x280] sm:$0xff]  ;;  %v328_v33 = vld [vmem:[%s2987_s9 + $0x290] sm:$0xff]  ;;  %v383_v18 = vld [vmem:[%s4628_s1 + $0x88] sm:$0xff] }
  0x5c   : > { %734 = vmatmul.f32.gmra.mxu0 %v296_v4  ;;  %1088 = vmatpush.msrb.mxu3 %v592_v22  ;;  %v652_v37 = vld [vmem:[%s4628_s1 + $0x8f0] sm:$0xff]  ;;  %v338_v42 = vld [vmem:[%s2987_s9 + $0x2e0] sm:$0xff]  ;;  %v387_v4 = vld [vmem:[%s4628_s1 + $0xa8] sm:$0xff] }
  0x5d   : > { %840 = vmatmul.f32.gmra.mxu2 %v298_v5  ;;  %893 = vmatmul.f32.gmra.mxu3 %v299_v6  ;;  %v664_v39 = vld [vmem:[%s4628_s1 + $0x950] sm:$0xff]  ;;  %v650_v45 = vld [vmem:[%s4628_s1 + $0x8e0] sm:$0xff]  ;;  %v253_v6 = vld [vmem:[%s2987_s9 + $0x38] sm:$0xff] }
  0x5e   : > { %982 = vmatpush.msrb.mxu1 %v528_v27  ;;  %1036 = vmatpush.msrb.mxu2 %v558_v28  ;;  %v336_v41 = vld [vmem:[%s2987_s9 + $0x2d0] sm:$0xff]  ;;  %v346_v50 = vld [vmem:[%s2987_s9 + $0x320] sm:$0xff]  ;;  %v273_v21 = vld [vmem:[%s2987_s9 + $0xd8] sm:$0xff] }
  0x5f   : > { %787 = vmatmul.f32.gmra.mxu1 %v297_v7  ;;  %930 = vmatpush.msrb.mxu0 %v494_v29  ;;  %v648_v48 = vld [vmem:[%s4628_s1 + $0x8d0] sm:$0xff]  ;;  %v646_v56 = vld [vmem:[%s4628_s1 + $0x8c0] sm:$0xff]  ;;  %v251_v7 = vld [vmem:[%s2987_s9 + $0x28] sm:$0xff] }
  0x60   : > { %1089 = vmatpush.msrb.mxu3 %v590_v30  ;;  %983 = vmatpush.msrb.mxu1 %v526_v31  ;;  %v348_v51 = vld [vmem:[%s2987_s9 + $0x330] sm:$0xff]  ;;  %v662_v57 = vld [vmem:[%s4628_s1 + $0x940] sm:$0xff]  ;;  %v413_v27 = vld [vmem:[%s4628_s1 + $0x178] sm:$0xff] }
  0x61   : > { %1233 = vmatpush.msra.mxu2 %v397_v36  ;;  %1127 = vmatpush.msra.mxu0 %v652_v37  ;;  %v356_v59 = vld [vmem:[%s2987_s9 + $0x370] sm:$0xff]  ;;  %v358_v60 = vld [vmem:[%s2987_s9 + $0x380] sm:$0xff]  ;;  %v283_v30 = vld [vmem:[%s2987_s9 + $0x128] sm:$0xff] }
  0x62   : > { %1286 = vmatpush.msra.mxu3 %v429_v38  ;;  %1190 = vmatpush.msra.mxu1 %v664_v39  ;;  %v644_v1 = vld [vmem:[%s4628_s1 + $0x8b0] sm:$0xff]  ;;  %v250_v3 = vld [vmem:[%s2987_s9 + $0x20] sm:$0xff]  ;;  %v293_v39 = vld [vmem:[%s2987_s9 + $0x178] sm:$0xff] }
  0x63   : > { %1234 = vmatpush.msra.mxu2 %v395_v40  ;;  %1128 = vmatpush.msra.mxu0 %v650_v45  ;;  %v252_v5 = vld [vmem:[%s2987_s9 + $0x30] sm:$0xff]  ;;  %v642_v8 = vld [vmem:[%s4628_s1 + $0x8a0] sm:$0xff]  ;;  %v377_v40 = vld [vmem:[%s4628_s1 + $0x58] sm:$0xff] }
  0x64   : > { %737 = vmatmul.f32.gmra.mxu0 %v306_v13  ;;  %1287 = vmatpush.msra.mxu3 %v427_v46  ;;  %v260_v10 = vld [vmem:[%s2987_s9 + $0x70] sm:$0xff]  ;;  %v262_v11 = vld [vmem:[%s2987_s9 + $0x80] sm:$0xff]  ;;  %v375_v46 = vld [vmem:[%s4628_s1 + $0x48] sm:$0xff] }
  0x65   : > { %843 = vmatmul.f32.gmra.mxu2 %v308_v14  ;;  %896 = vmatmul.f32.gmra.mxu3 %v309_v15  ;;  %v660_v13 = vld [vmem:[%s4628_s1 + $0x930] sm:$0xff]  ;;  %v385_v14 = vld [vmem:[%s4628_s1 + $0x98] sm:$0xff]  ;;  %v270_v19 = vld [vmem:[%s2987_s9 + $0xc0] sm:$0xff] }
  0x66   : > { %1235 = vmatpush.msra.mxu2 %v393_v47  ;;  %1129 = vmatpush.msra.mxu0 %v648_v48  ;;  %v640_v15 = vld [vmem:[%s4628_s1 + $0x890] sm:$0xff]  ;;  %v638_v22 = vld [vmem:[%s4628_s1 + $0x880] sm:$0xff] }
  0x67   : > { %790 = vmatmul.f32.gmra.mxu1 %v307_v16  ;;  %1288 = vmatpush.msra.mxu3 %v425_v49  ;;  %v261_v16 = vld [vmem:[%s2987_s9 + $0x78] sm:$0xff]  ;;  %v272_v20 = vld [vmem:[%s2987_s9 + $0xd0] sm:$0xff]  ;;  %v282_v29 = vld [vmem:[%s2987_s9 + $0x120] sm:$0xff] }
  0x68   : > { %1236 = vmatpush.msra.mxu2 %v391_v55  ;;  %1130 = vmatpush.msra.mxu0 %v646_v56  ;;  %v280_v28 = vld [vmem:[%s2987_s9 + $0x110] sm:$0xff]  ;;  %v658_v31 = vld [vmem:[%s4628_s1 + $0x920] sm:$0xff] }
  0x69   : > { %1191 = vmatpush.msra.mxu1 %v662_v57  ;;  %1289 = vmatpush.msra.mxu3 %v423_v58  ;;  %v290_v37 = vld [vmem:[%s2987_s9 + $0x160] sm:$0xff]  ;;  %v292_v38 = vld [vmem:[%s2987_s9 + $0x170] sm:$0xff]  ;;  %v407_v58 = vld [vmem:[%s4628_s1 + $0x148] sm:$0xff] }
  0x6a   : > { %1237 = vmatpush.msra.mxu2 %v389_v0  ;;  %1131 = vmatpush.msra.mxu0 %v644_v1  ;;  %v630_v56 = vld [vmem:[%s4628_s1 + $0x840] sm:$0xff]  ;;  %v656_v57 = vld [vmem:[%s4628_s1 + $0x910] sm:$0xff]  ;;  %v405_v1 = vld [vmem:[%s4628_s1 + $0x138] sm:$0xff] }
  0x6b   : > { %1290 = vmatpush.msra.mxu3 %v421_v2  ;;  %1192 = vmatpush.msra.mxu1 %v660_v13  ;;  %v628_v0 = vld [vmem:[%s4628_s1 + $0x830] sm:$0xff]  ;;  %v626_v13 = vld [vmem:[%s4628_s1 + $0x820] sm:$0xff] }
  0x6c   : > { %740 = vmatmul.f32.gmra.mxu0 %v316_v23  ;;  %1238 = vmatpush.msra.mxu2 %v387_v4  ;;  %v415_v23 = vld [vmem:[%s4628_s1 + $0x188] sm:$0xff] }
  0x6d   : > { %846 = vmatmul.f32.gmra.mxu2 %v318_v24  ;;  %899 = vmatmul.f32.gmra.mxu3 %v319_v25  ;;  %v271_v24 = vld [vmem:[%s2987_s9 + $0xc8] sm:$0xff]  ;;  %v381_v25 = vld [vmem:[%s4628_s1 + $0x78] sm:$0xff] }
  0x6e   : > { %1132 = vmatpush.msra.mxu0 %v642_v8  ;;  %1291 = vmatpush.msra.mxu3 %v419_v9  ;;  %v313_v8 = vld [vmem:[%s2987_s9 + $0x218] sm:$0xff] }
  0x6f   : > { %793 = vmatmul.f32.gmra.mxu1 %v317_v26  ;;  %1239 = vmatpush.msra.mxu2 %v385_v14  ;;  %v636_v26 = vld [vmem:[%s4628_s1 + $0x870] sm:$0xff]  ;;  %v403_v14 = vld [vmem:[%s4628_s1 + $0x128] sm:$0xff] }
  0x70   : > { %1133 = vmatpush.msra.mxu0 %v640_v15  ;;  %1292 = vmatpush.msra.mxu3 %v417_v17 }
  0x71   : > { %1240 = vmatpush.msra.mxu2 %v383_v18  ;;  %1193 = vmatpush.msra.mxu1 %v658_v31  ;;  %v367_v31 = vld [vmem:[%s4628_s1 + $0x8] sm:$0xff] }
  0x72   : > { %1293 = vmatpush.msra.mxu3 %v415_v23  ;;  %1134 = vmatpush.msra.mxu0 %v638_v22  ;;  %v323_v22 = vld [vmem:[%s2987_s9 + $0x268] sm:$0xff] }
  0x73   : > { %1241 = vmatpush.msra.mxu2 %v381_v25  ;;  %1194 = vmatpush.msra.mxu1 %v656_v57  ;;  %v369_v25 = vld [vmem:[%s4628_s1 + $0x18] sm:$0xff] }
  0x74   : > { %743 = vmatmul.f32.gmra.mxu0 %v326_v32  ;;  %1294 = vmatpush.msra.mxu3 %v413_v27  ;;  %v379_v32 = vld [vmem:[%s4628_s1 + $0x68] sm:$0xff] }
  0x75   : > { %849 = vmatmul.f32.gmra.mxu2 %v328_v33  ;;  %902 = vmatmul.f32.gmra.mxu3 %v329_v34  ;;  %v281_v33 = vld [vmem:[%s2987_s9 + $0x118] sm:$0xff]  ;;  %v634_v34 = vld [vmem:[%s4628_s1 + $0x860] sm:$0xff] }
  0x76   : > { %1135 = vmatpush.msra.mxu0 %v636_v26  ;;  %1242 = vmatpush.msra.mxu2 %v379_v32  ;;  %v624_v26 = vld [vmem:[%s4628_s1 + $0x810] sm:$0xff] }
  0x77   : > { %796 = vmatmul.f32.gmra.mxu1 %v327_v35  ;;  %v411_v35 = vld [vmem:[%s4628_s1 + $0x168] sm:$0xff] }
  0x78   : > { %1136 = vmatpush.msra.mxu0 %v634_v34  ;;  %1295 = vmatpush.msra.mxu3 %v411_v35 }
  0x79   : > { %1243 = vmatpush.msra.mxu2 %v377_v40  ;;  %v622_v40 = vld [vmem:[%s4628_s1 + $0x800] sm:$0xff] }
  0x7b   : > { %1244 = vmatpush.msra.mxu2 %v375_v46  ;;  %v461_v46 = vld [vmem:[%s4628_s1 + $0x2f8] sm:$0xff] }
  0x7c   : > { %746 = vmatmul.f32.gmra.mxu0 %v336_v41  ;;  %v632_v41 = vld [vmem:[%s4628_s1 + $0x850] sm:$0xff] }
  0x7d   : > { %852 = vmatmul.f32.gmra.mxu2 %v338_v42  ;;  %905 = vmatmul.f32.gmra.mxu3 %v339_v43  ;;  %v409_v42 = vld [vmem:[%s4628_s1 + $0x158] sm:$0xff] }
  0x7e   : > { %1137 = vmatpush.msra.mxu0 %v632_v41  ;;  %1296 = vmatpush.msra.mxu3 %v409_v42  ;;  %v399_v41 = vld [vmem:[%s4628_s1 + $0x108] sm:$0xff] }
  0x7f   : > { %799 = vmatmul.f32.gmra.mxu1 %v337_v44  ;;  %v291_v44 = vld [vmem:[%s2987_s9 + $0x168] sm:$0xff] }
  0x80   : > { %1138 = vmatpush.msra.mxu0 %v630_v56  ;;  %1297 = vmatpush.msra.mxu3 %v407_v58  ;;  %v343_v56 = vld [vmem:[%s2987_s9 + $0x308] sm:$0xff]  ;;  %v493_v58 = vld [vmem:[%s4628_s1 + $0x3f8] sm:$0xff] }
  0x82   : > { %1139 = vmatpush.msra.mxu0 %v628_v0  ;;  %1298 = vmatpush.msra.mxu3 %v405_v1  ;;  %v555_v0 = vld [vmem:[%s4628_s1 + $0x5e8] sm:$0xff] }
  0x84   : > { %749 = vmatmul.f32.gmra.mxu0 %v346_v50  ;;  %1299 = vmatpush.msra.mxu3 %v403_v14  ;;  %v553_v14 = vld [vmem:[%s4628_s1 + $0x5d8] sm:$0xff] }
  0x85   : > { %855 = vmatmul.f32.gmra.mxu2 %v348_v51  ;;  %908 = vmatmul.f32.gmra.mxu3 %v349_v53  ;;  %v300_v51 = vld [vmem:[%s2987_s9 + $0x1b0] sm:$0xff]  ;;  %v302_v53 = vld [vmem:[%s2987_s9 + $0x1c0] sm:$0xff] }
  0x86   : > { %1140 = vmatpush.msra.mxu0 %v626_v13  ;;  %v457_v13 = vld [vmem:[%s4628_s1 + $0x2d8] sm:$0xff] }
  0x87   : > { %802 = vmatmul.f32.gmra.mxu1 %v347_v54  ;;  %v303_v54 = vld [vmem:[%s2987_s9 + $0x1c8] sm:$0xff] }
  0x88   : > { %1141 = vmatpush.msra.mxu0 %v624_v26  ;;  %v362_v26 = vld [vmem:[%s2987_s9 + $0x3a0] sm:$0xff] }
  0x8a   : > { %1142 = vmatpush.msra.mxu0 %v622_v40 }
  0x8c   : > { %752 = vmatmul.f32.gmra.mxu0 %v356_v59 }
  0x8d   : > { %858 = vmatmul.f32.gmra.mxu2 %v358_v60  ;;  %911 = vmatmul.f32.gmra.mxu3 %v359_v61  ;;  %v301_v60 = vld [vmem:[%s2987_s9 + $0x1b8] sm:$0xff] }
  0x8e   : > { %v373_v61 = vld [vmem:[%s4628_s1 + $0x38] sm:$0xff] }
  0x8f   : > { %805 = vmatmul.f32.gmra.mxu1 %v357_v63  ;;  %1245 = vmatpush.msra.mxu2 %v373_v61  ;;  %v341_v61 = vld [vmem:[%s2987_s9 + $0x2f8] sm:$0xff] }
  0x94   : > { %931 = vmatmul.f32.vlgmr.msrb.gmra.mxu0 %v250_v3 }
  0x95   : > { %1037 = vmatmul.f32.vlgmr.msrb.gmra.mxu2 %v252_v5  ;;  %1090 = vmatmul.f32.vlgmr.msrb.gmra.mxu3 %v253_v6  ;;  %v310_v6 = vld [vmem:[%s2987_s9 + $0x200] sm:$0xff] }
  0x96   : > { %1339 = vmatpush.msrb.mxu0 %v461_v46  ;;  %v515_v46 = vld [vmem:[%s4628_s1 + $0x4a8] sm:$0xff] }
  0x97   : > { %984 = vmatmul.f32.vlgmr.msrb.gmra.mxu1 %v251_v7  ;;  %v312_v7 = vld [vmem:[%s2987_s9 + $0x210] sm:$0xff] }
  0x9c   : > { %934 = vmatmul.f32.gmra.mxu0 %v260_v10  ;;  %v371_v10 = vld [vmem:[%s4628_s1 + $0x28] sm:$0xff] }
  0x9d   : > { %1040 = vmatmul.f32.gmra.mxu2 %v262_v11  ;;  %1093 = vmatmul.f32.gmra.mxu3 %v263_v12  ;;  %v311_v12 = vld [vmem:[%s2987_s9 + $0x208] sm:$0xff] }
  0x9e   : > { %1246 = vmatpush.msra.mxu2 %v371_v10  ;;  %v353_v10 = vld [vmem:[%s2987_s9 + $0x358] sm:$0xff] }
  0x9f   : > { %987 = vmatmul.f32.gmra.mxu1 %v261_v16 }
  0xa0   : > { %1247 = vmatpush.msra.mxu2 %v369_v25  ;;  %v3511_v25 = vld [vmem:[%s2987_s9 + $0x390] sm:$0xff] }
  0xa2   : > { %1248 = vmatpush.msra.mxu2 %v367_v31  ;;  %v487_v31 = vld [vmem:[%s4628_s1 + $0x3c8] sm:$0xff] }
  0xa4   : > { %937 = vmatmul.f32.gmra.mxu0 %v270_v19 }
  0xa5   : > { %1043 = vmatmul.f32.gmra.mxu2 %v272_v20  ;;  %1096 = vmatmul.f32.gmra.mxu3 %v273_v21  ;;  %v320_v20 = vld [vmem:[%s2987_s9 + $0x250] sm:$0xff]  ;;  %v322_v21 = vld [vmem:[%s2987_s9 + $0x260] sm:$0xff] }
  0xa7   : > { %990 = vmatmul.f32.gmra.mxu1 %v271_v24  ;;  %v654_v24 = vld [vmem:[%s4628_s1 + $0x900] sm:$0xff] }
  0xa8   : > { %1195 = vmatpush.msra.mxu1 %v654_v24 }
  0xaa   : > { %1392 = vmatpush.msrb.mxu1 %v493_v58 }
  0xac   : > { %940 = vmatmul.f32.gmra.mxu0 %v280_v28  ;;  %v321_v28 = vld [vmem:[%s2987_s9 + $0x258] sm:$0xff] }
  0xad   : > { %1046 = vmatmul.f32.gmra.mxu2 %v282_v29  ;;  %1099 = vmatmul.f32.gmra.mxu3 %v283_v30  ;;  %v401_v29 = vld [vmem:[%s4628_s1 + $0x118] sm:$0xff] }
  0xae   : > { %1300 = vmatpush.msra.mxu3 %v401_v29  ;;  %v455_v29 = vld [vmem:[%s4628_s1 + $0x2c8] sm:$0xff] }
  0xaf   : > { %993 = vmatmul.f32.gmra.mxu1 %v281_v33 }
  0xb0   : > { %1301 = vmatpush.msra.mxu3 %v399_v41 }
  0xb1   : > { %v720_v36 = vpop.f32.mrf.mxu0 }
  0xb4   : > { %v773_v43 = vpop.f32.mrf.mxu1  ;;  %943 = vmatmul.f32.gmra.mxu0 %v290_v37  ;;  %v332_v37 = vld [vmem:[%s2987_s9 + $0x2b0] sm:$0xff] }
  0xb5   : > { %1049 = vmatmul.f32.gmra.mxu2 %v292_v38  ;;  %1102 = vmatmul.f32.gmra.mxu3 %v293_v39  ;;  %v774_v45 = vadd.f32 %v773_v43, %v720_v36  ;;  %v330_v36 = vld [vmem:[%s2987_s9 + $0x2a0] sm:$0xff]  ;;  %v333_v38 = vld [vmem:[%s2987_s9 + $0x2b8] sm:$0xff]  ;;  %v331_v43 = vld [vmem:[%s2987_s9 + $0x2a8] sm:$0xff] }
  0xb7   : > { %996 = vmatmul.f32.gmra.mxu1 %v291_v44  ;;  %v525_v44 = vld [vmem:[%s4628_s1 + $0x4f8] sm:$0xff] }
  0xb8   : > { %v826_v47 = vpop.f32.mrf.mxu2  ;;  %v879_v48 = vpop.f32.mrf.mxu3  ;;  %1445 = vmatpush.msrb.mxu2 %v525_v44 }
  0xb9   : > { %v827_v49 = vadd.f32 %v826_v47, %v774_v45  ;;  %v723_v50 = vpop.f32.mrf.mxu0  ;;  %v557_v47 = vld [vmem:[%s4628_s1 + $0x5f8] sm:$0xff] }
  0xba   : > { %1498 = vmatpush.msrb.mxu3 %v557_v47 }
  0xbb   : > { %v3390_v55 = vadd.f32 %v879_v48, %v827_v49 }
  0xbc   : > { %v776_v59 = vpop.f32.mrf.mxu1  ;;  %946 = vmatmul.f32.gmra.mxu0 %v300_v51  ;;  %1499 = vmatpush.msrb.mxu3 %v555_v0 }
  0xbd   : > { %1052 = vmatmul.f32.gmra.mxu2 %v302_v53  ;;  %1105 = vmatmul.f32.gmra.mxu3 %v303_v54  ;;  %v777_v63 = vadd.f32 %v776_v59, %v723_v50  ;;  %v340_v53 = vld [vmem:[%s2987_s9 + $0x2f0] sm:$0xff]  ;;  %v342_v54 = vld [vmem:[%s2987_s9 + $0x300] sm:$0xff]  ;;  %v523_v59 = vld [vmem:[%s4628_s1 + $0x4e8] sm:$0xff] }
  0xbe   : > { %1446 = vmatpush.msrb.mxu2 %v523_v59  ;;  %1500 = vmatpush.msrb.mxu3 %v553_v14 }
  0xbf   : > { %999 = vmatmul.f32.gmra.mxu1 %v301_v60 }
  0xc0   : > { %v829_v2 = vpop.f32.mrf.mxu2  ;;  %v882_v3 = vpop.f32.mrf.mxu3 }
  0xc1   : > { %v830_v4 = vadd.f32 %v829_v2, %v777_v63  ;;  %v726_v5 = vpop.f32.mrf.mxu0  ;;  %v459_v63 = vld [vmem:[%s4628_s1 + $0x2e8] sm:$0xff] }
  0xc2   : > { %1340 = vmatpush.msrb.mxu0 %v459_v63  ;;  %v491_v2 = vld [vmem:[%s4628_s1 + $0x3e8] sm:$0xff]  ;;  %v3569_v63 = vld [vmem:[%s2987_s9 + $0x90] sm:$0xff] }
  0xc3   : > { %v3414_v9 = vadd.f32 %v882_v3, %v830_v4  ;;  %1393 = vmatpush.msrb.mxu1 %v491_v2  ;;  %v449_v2 = vld [vmem:[%s4628_s1 + $0x298] sm:$0xff] }
  0xc4   : > { %v779_v11 = vpop.f32.mrf.mxu1  ;;  %949 = vmatmul.f32.gmra.mxu0 %v310_v6 }
  0xc5   : > { %1055 = vmatmul.f32.gmra.mxu2 %v312_v7  ;;  %1108 = vmatmul.f32.gmra.mxu3 %v313_v8  ;;  %v780_v15 = vadd.f32 %v779_v11, %v726_v5  ;;  %v350_v7 = vld [vmem:[%s2987_s9 + $0x340] sm:$0xff]  ;;  %v352_v8 = vld [vmem:[%s2987_s9 + $0x350] sm:$0xff] }
  0xc6   : > { %1341 = vmatpush.msrb.mxu0 %v457_v13 }
  0xc7   : > { %1002 = vmatmul.f32.gmra.mxu1 %v311_v12  ;;  %v521_v12 = vld [vmem:[%s4628_s1 + $0x4d8] sm:$0xff] }
  0xc8   : > { %v832_v16 = vpop.f32.mrf.mxu2  ;;  %v885_v17 = vpop.f32.mrf.mxu3  ;;  %1447 = vmatpush.msrb.mxu2 %v521_v12  ;;  %1342 = vmatpush.msrb.mxu0 %v455_v29  ;;  %v511_v12 = vld [vmem:[%s4628_s1 + $0x488] sm:$0xff]  ;;  %v509_v29 = vld [vmem:[%s4628_s1 + $0x478] sm:$0xff] }
  0xc9   : > { %v833_v18 = vadd.f32 %v832_v16, %v780_v15  ;;  %v729_v19 = vpop.f32.mrf.mxu0  ;;  %v351_v16 = vld [vmem:[%s2987_s9 + $0x348] sm:$0xff] }
  0xcb   : > { %v3429_v23 = vadd.f32 %v885_v17, %v833_v18  ;;  %v489_v17 = vld [vmem:[%s4628_s1 + $0x3d8] sm:$0xff] }
  0xcc   : > { %v782_v27 = vpop.f32.mrf.mxu1  ;;  %952 = vmatmul.f32.gmra.mxu0 %v320_v20  ;;  %1394 = vmatpush.msrb.mxu1 %v489_v17  ;;  %v3597_v17 = vld [vmem:[%s2987_s9 + $0xe0] sm:$0xff] }
  0xcd   : > { %1058 = vmatmul.f32.gmra.mxu2 %v322_v21  ;;  %1111 = vmatmul.f32.gmra.mxu3 %v323_v22  ;;  %v783_v30 = vadd.f32 %v782_v27, %v729_v19  ;;  %v519_v19 = vld [vmem:[%s4628_s1 + $0x4c8] sm:$0xff] }
  0xce   : > { %1448 = vmatpush.msrb.mxu2 %v519_v19  ;;  %v363_v27 = vld [vmem:[%s2987_s9 + $0x3a8] sm:$0xff]  ;;  %1395 = vmatpush.msrb.mxu1 %v487_v31  ;;  %v445_v31 = vld [vmem:[%s4628_s1 + $0x278] sm:$0xff] }
  0xcf   : > { %1005 = vmatmul.f32.gmra.mxu1 %v321_v28  ;;  %v447_v19 = vld [vmem:[%s4628_s1 + $0x288] sm:$0xff] }
  0xd0   : > { %v835_v32 = vpop.f32.mrf.mxu2  ;;  %v888_v33 = vpop.f32.mrf.mxu3 }
  0xd1   : > { %v836_v34 = vadd.f32 %v835_v32, %v783_v30  ;;  %v732_v35 = vpop.f32.mrf.mxu0  ;;  %v551_v30 = vld [vmem:[%s4628_s1 + $0x5c8] sm:$0xff] }
  0xd2   : > { %1501 = vmatpush.msrb.mxu3 %v551_v30 }
  0xd3   : > { %v3450_v39 = vadd.f32 %v888_v33, %v836_v34  ;;  %v3528_v33 = vld [vmem:[%s2987_s9 + $0x398] sm:$0xff] }
  0xd4   : > { %v785_v42 = vpop.f32.mrf.mxu1  ;;  %955 = vmatmul.f32.gmra.mxu0 %v330_v36  ;;  %v517_v34 = vld [vmem:[%s4628_s1 + $0x4b8] sm:$0xff] }
  0xd5   : > { %1061 = vmatmul.f32.gmra.mxu2 %v332_v37  ;;  %1114 = vmatmul.f32.gmra.mxu3 %v333_v38  ;;  %v786_v45 = vadd.f32 %v785_v42, %v732_v35  ;;  %v453_v36 = vld [vmem:[%s4628_s1 + $0x2b8] sm:$0xff] }
  0xd6   : > { %1449 = vmatpush.msrb.mxu2 %v517_v34  ;;  %v549_v37 = vld [vmem:[%s4628_s1 + $0x5b8] sm:$0xff]  ;;  %1343 = vmatpush.msrb.mxu0 %v453_v36 }
  0xd7   : > { %1008 = vmatmul.f32.gmra.mxu1 %v331_v43  ;;  %1502 = vmatpush.msrb.mxu3 %v549_v37  ;;  %v3541_v43 = vld [vmem:[%s2987_s9 + $0x40] sm:$0xff] }
  0xd8   : > { %v838_v48 = vpop.f32.mrf.mxu2  ;;  %v891_v49 = vpop.f32.mrf.mxu3  ;;  %1450 = vmatpush.msrb.mxu2 %v515_v46  ;;  %v3640_v46 = vld [vmem:[%s2987_s9 + $0x138] sm:$0xff] }
  0xd9   : > { %v839_v50 = vadd.f32 %v838_v48, %v786_v45  ;;  %v735_v51 = vpop.f32.mrf.mxu0  ;;  %v485_v45 = vld [vmem:[%s4628_s1 + $0x3b8] sm:$0xff]  ;;  %v3553_v48 = vld [vmem:[%s2987_s9 + $0x48] sm:$0xff] }
  0xda   : > { %1396 = vmatpush.msrb.mxu1 %v485_v45 }
  0xdb   : > { %v3471_v57 = vadd.f32 %v891_v49, %v839_v50  ;;  %v2564_v49 = vld [vmem:[%s2987_s9] sm:$0xff]  ;;  %v2565_v50 = vld [vmem:[%s2987_s9 + $0x8] sm:$0xff] }
  0xdc   : > { %v788_v60 = vpop.f32.mrf.mxu1  ;;  %958 = vmatmul.f32.gmra.mxu0 %v340_v53  ;;  %v547_v53 = vld [vmem:[%s4628_s1 + $0x5a8] sm:$0xff] }
  0xdd   : > { %1064 = vmatmul.f32.gmra.mxu2 %v342_v54  ;;  %1117 = vmatmul.f32.gmra.mxu3 %v343_v56  ;;  %v789_v1 = vadd.f32 %v788_v60, %v735_v51  ;;  %v451_v51 = vld [vmem:[%s4628_s1 + $0x2a8] sm:$0xff] }
  0xde   : > { %1344 = vmatpush.msrb.mxu0 %v451_v51  ;;  %1503 = vmatpush.msrb.mxu3 %v547_v53  ;;  %v483_v56 = vld [vmem:[%s4628_s1 + $0x3a8] sm:$0xff] }
  0xdf   : > { %1011 = vmatmul.f32.gmra.mxu1 %v341_v61 }
  0xe0   : > { %v841_v3 = vpop.f32.mrf.mxu2  ;;  %v894_v4 = vpop.f32.mrf.mxu3  ;;  %1397 = vmatpush.msrb.mxu1 %v483_v56  ;;  %1345 = vmatpush.msrb.mxu0 %v449_v2  ;;  %v441_v2 = vld [vmem:[%s4628_s1 + $0x258] sm:$0xff] }
  0xe1   : > { %v842_v5 = vadd.f32 %v841_v3, %v789_v1  ;;  %v738_v6 = vpop.f32.mrf.mxu0  ;;  %v513_v1 = vld [vmem:[%s4628_s1 + $0x498] sm:$0xff] }
  0xe2   : > { %v545_v3 = vld [vmem:[%s4628_s1 + $0x598] sm:$0xff]  ;;  %1451 = vmatpush.msrb.mxu2 %v513_v1  ;;  %1346 = vmatpush.msrb.mxu0 %v447_v19 }
  0xe3   : > { %v3492_v11 = vadd.f32 %v894_v4, %v842_v5  ;;  %v3584_v5 = vld [vmem:[%s2987_s9 + $0x98] sm:$0xff]  ;;  %1504 = vmatpush.msrb.mxu3 %v545_v3 }
  0xe4   : > { %v791_v15 = vpop.f32.mrf.mxu1  ;;  %961 = vmatmul.f32.gmra.mxu0 %v350_v7  ;;  %v2567_v7 = vld [vmem:[%s2987_s9 + $0x58] sm:$0xff]  ;;  %1452 = vmatpush.msrb.mxu2 %v511_v12 }
  0xe5   : > { %1067 = vmatmul.f32.gmra.mxu2 %v352_v8  ;;  %1120 = vmatmul.f32.gmra.mxu3 %v353_v10  ;;  %v792_v18 = vadd.f32 %v791_v15, %v738_v6  ;;  %v2566_v6 = vld [vmem:[%s2987_s9 + $0x50] sm:$0xff]  ;;  %v481_v8 = vld [vmem:[%s4628_s1 + $0x398] sm:$0xff] }
  0xe6   : > { %1398 = vmatpush.msrb.mxu1 %v481_v8  ;;  %1453 = vmatpush.msrb.mxu2 %v509_v29  ;;  %v505_v1 = vld [vmem:[%s4628_s1 + $0x458] sm:$0xff]  ;;  %v2572_v29 = vld [vmem:[%s2987_s9 + $0x190] sm:$0xff] }
  0xe7   : > { %1014 = vmatmul.f32.gmra.mxu1 %v351_v16  ;;  %1347 = vmatpush.msrb.mxu0 %v445_v31  ;;  %v537_v3 = vld [vmem:[%s4628_s1 + $0x558] sm:$0xff] }
  0xe8   : > { %v844_v20 = vpop.f32.mrf.mxu2  ;;  %v897_v21 = vpop.f32.mrf.mxu3 }
  0xe9   : > { %v845_v22 = vadd.f32 %v844_v20, %v792_v18  ;;  %v741_v24 = vpop.f32.mrf.mxu0  ;;  %v543_v20 = vld [vmem:[%s4628_s1 + $0x588] sm:$0xff] }
  0xea   : > { %1505 = vmatpush.msrb.mxu3 %v543_v20  ;;  %v439_v20 = vld [vmem:[%s4628_s1 + $0x248] sm:$0xff] }
  0xeb   : > { %v3515_v28 = vadd.f32 %v897_v21, %v845_v22  ;;  %v479_v21 = vld [vmem:[%s4628_s1 + $0x388] sm:$0xff] }
  0xec   : > { %v794_v32 = vpop.f32.mrf.mxu1  ;;  %964 = vmatmul.f32.gmra.mxu0 %v3511_v25  ;;  %1399 = vmatpush.msrb.mxu1 %v479_v21  ;;  %v535_v21 = vld [vmem:[%s4628_s1 + $0x548] sm:$0xff] }
  0xed   : > { %1070 = vmatmul.f32.gmra.mxu2 %v362_v26  ;;  %1123 = vmatmul.f32.gmra.mxu3 %v363_v27  ;;  %v795_v35 = vadd.f32 %v794_v32, %v741_v24  ;;  %v3612_v24 = vld [vmem:[%s2987_s9 + $0xe8] sm:$0xff]  ;;  %v2568_v26 = vld [vmem:[%s2987_s9 + $0xa0] sm:$0xff]  ;;  %v541_v32 = vld [vmem:[%s4628_s1 + $0x578] sm:$0xff] }
  0xee   : > { %v2569_v27 = vld [vmem:[%s2987_s9 + $0xa8] sm:$0xff]  ;;  %1506 = vmatpush.msrb.mxu3 %v541_v32  ;;  %v437_v32 = vld [vmem:[%s4628_s1 + $0x238] sm:$0xff] }
  0xef   : > { %1017 = vmatmul.f32.gmra.mxu1 %v3528_v33 }
  0xf0   : > { %v847_v38 = vpop.f32.mrf.mxu2  ;;  %v900_v40 = vpop.f32.mrf.mxu3 }
  0xf1   : > { %v848_v41 = vadd.f32 %v847_v38, %v795_v35  ;;  %v744_v42 = vpop.f32.mrf.mxu0  ;;  %v3628_v38 = vld [vmem:[%s2987_s9 + $0x130] sm:$0xff] }
  0xf3   : > { %v3543_v44 = vadd.f32 %v900_v40, %v848_v41  ;;  %v477_v41 = vld [vmem:[%s4628_s1 + $0x378] sm:$0xff] }
  0xf4   : > { %v797_v47 = vpop.f32.mrf.mxu1  ;;  %1143 = vmatmul.f32.vlgmr.msra.gmra.mxu0 %v3541_v43  ;;  %1400 = vmatpush.msrb.mxu1 %v477_v41 }
  0xf5   : > { %1249 = vmatmul.f32.vlgmr.msra.gmra.mxu2 %v2564_v49  ;;  %1302 = vmatmul.f32.vlgmr.msra.gmra.mxu3 %v2565_v50  ;;  %v798_v54 = vadd.f32 %v797_v47, %v744_v42  ;;  %v507_v42 = vld [vmem:[%s4628_s1 + $0x468] sm:$0xff]  ;;  %v2570_v47 = vld [vmem:[%s2987_s9 + $0xf0] sm:$0xff] }
  0xf6   : > { %v443_v49 = vld [vmem:[%s4628_s1 + $0x268] sm:$0xff]  ;;  %1454 = vmatpush.msrb.mxu2 %v507_v42  ;;  %v3717_v42 = vld [vmem:[%s2987_s9 + $0x220] sm:$0xff] }
  0xf7   : > { %2462 = vmatmul.msk.f32.vlgmr.msra.gmra.mxu1 %vm666_vm0, %v3553_v48  ;;  %v539_v50 = vld [vmem:[%s4628_s1 + $0x568] sm:$0xff]  ;;  %1348 = vmatpush.msrb.mxu0 %v443_v49  ;;  %v469_v49 = vld [vmem:[%s4628_s1 + $0x338] sm:$0xff] }
  0xf8   : > { %v850_v58 = vpop.f32.mrf.mxu2  ;;  %v903_v59 = vpop.f32.mrf.mxu3  ;;  %1507 = vmatpush.msrb.mxu3 %v539_v50  ;;  %1455 = vmatpush.msrb.mxu2 %v505_v1  ;;  %v499_v50 = vld [vmem:[%s4628_s1 + $0x428] sm:$0xff] }
  0xf9   : > { %v851_v60 = vadd.f32 %v850_v58, %v798_v54  ;;  %v747_v61 = vpop.f32.mrf.mxu0  ;;  %1349 = vmatpush.msrb.mxu0 %v441_v2 }
  0xfa   : > { %1508 = vmatpush.msrb.mxu3 %v537_v3 }
  0xfb   : > { %v3571_v0 = vadd.f32 %v903_v59, %v851_v60  ;;  %v3656_v59 = vld [vmem:[%s2987_s9 + $0x180] sm:$0xff]  ;;  %1350 = vmatpush.msrb.mxu0 %v439_v20  ;;  %v465_v20 = vld [vmem:[%s4628_s1 + $0x318] sm:$0xff] }
  0xfc   : > { %v800_v4 = vpop.f32.mrf.mxu1  ;;  %1146 = vmatmul.f32.gmra.mxu0 %v3569_v63  ;;  %1509 = vmatpush.msrb.mxu3 %v535_v21 }
  0xfd   : > { %1252 = vmatmul.f32.gmra.mxu2 %v2566_v6  ;;  %1305 = vmatmul.f32.gmra.mxu3 %v2567_v7  ;;  %v801_v10 = vadd.f32 %v800_v4, %v747_v61  ;;  %v3672_v6 = vld [vmem:[%s2987_s9 + $0x188] sm:$0xff]  ;;  %v473_v7 = vld [vmem:[%s4628_s1 + $0x358] sm:$0xff] }
  0xfe   : > { %1351 = vmatpush.msrb.mxu0 %v437_v32 }
  0xff   : > { %2463 = vmatmul.msk.f32.gmra.mxu1 %vm666_vm0, %v3584_v5 }
 0x100   : > { %v853_v13 = vpop.f32.mrf.mxu2  ;;  %v906_v14 = vpop.f32.mrf.mxu3 }
 0x101   : > { %v854_v15 = vadd.f32 %v853_v13, %v801_v10  ;;  %v750_v16 = vpop.f32.mrf.mxu0  ;;  %v503_v10 = vld [vmem:[%s4628_s1 + $0x448] sm:$0xff] }
 0x102   : > { %1456 = vmatpush.msrb.mxu2 %v503_v10  ;;  %v497_v10 = vld [vmem:[%s4628_s1 + $0x418] sm:$0xff] }
 0x103   : > { %v3599_v18 = vadd.f32 %v906_v14, %v854_v15  ;;  %v3685_v15 = vld [vmem:[%s2987_s9 + $0x1d0] sm:$0xff] }
 0x104   : > { %v803_v22 = vpop.f32.mrf.mxu1  ;;  %1149 = vmatmul.f32.gmra.mxu0 %v3597_v17 }
 0x105   : > { %1255 = vmatmul.f32.gmra.mxu2 %v2568_v26  ;;  %1308 = vmatmul.f32.gmra.mxu3 %v2569_v27  ;;  %v804_v30 = vadd.f32 %v803_v22, %v750_v16  ;;  %v471_v22 = vld [vmem:[%s4628_s1 + $0x348] sm:$0xff]  ;;  %v3701_v27 = vld [vmem:[%s2987_s9 + $0x1d8] sm:$0xff] }
 0x107   : > { %2464 = vmatmul.msk.f32.gmra.mxu1 %vm666_vm0, %v3612_v24 }
 0x108   : > { %v856_v34 = vpop.f32.mrf.mxu2  ;;  %v909_v35 = vpop.f32.mrf.mxu3 }
 0x109   : > { %v857_v36 = vadd.f32 %v856_v34, %v804_v30  ;;  %v753_v37 = vpop.f32.mrf.mxu0  ;;  %v501_v30 = vld [vmem:[%s4628_s1 + $0x438] sm:$0xff] }
 0x10a   : > { %1457 = vmatpush.msrb.mxu2 %v501_v30  ;;  %v533_v34 = vld [vmem:[%s4628_s1 + $0x538] sm:$0xff] }
 0x10b   : > { %v3630_v40 = vadd.f32 %v909_v35, %v857_v36  ;;  %1510 = vmatpush.msrb.mxu3 %v533_v34 }
 0x10c   : > { %v806_v45 = vpop.f32.mrf.mxu1  ;;  %1152 = vmatmul.f32.gmra.mxu0 %v3628_v38  ;;  %1458 = vmatpush.msrb.mxu2 %v499_v50  ;;  %v653_v50 = vld [vmem:[%s4628_s1 + $0x8f8] sm:$0xff] }
 0x10d   : > { %1258 = vmatmul.f32.gmra.mxu2 %v2570_v47  ;;  %1311 = vmatmul.f32.gmra.mxu3 %v3134_v52  ;;  %v807_v51 = vadd.f32 %v806_v45, %v753_v37  ;;  %v475_v52 = vld [vmem:[%s4628_s1 + $0x368] sm:$0xff] }
 0x10e   : > { %1401 = vmatpush.msrb.mxu1 %v475_v52  ;;  %v3730_v52 = vld [vmem:[%s2987_s9 + $0x228] sm:$0xff]  ;;  %1459 = vmatpush.msrb.mxu2 %v497_v10 }
 0x10f   : > { %2465 = vmatmul.msk.f32.gmra.mxu1 %vm666_vm0, %v3640_v46 }
 0x110   : > { %v859_v53 = vpop.f32.mrf.mxu2  ;;  %v912_v54 = vpop.f32.mrf.mxu3  ;;  %1402 = vmatpush.msrb.mxu1 %v473_v7 }
 0x111   : > { %v860_v56 = vadd.f32 %v859_v53, %v807_v51  ;;  %v932_v58 = vpop.f32.mrf.mxu0  ;;  %v2574_v53 = vld [vmem:[%s2987_s9 + $0x1e0] sm:$0xff] }
 0x112   : > { %v933_v61 = vadd.f32 %v932_v58, %v3390_v55  ;;  %v2571_v55 = vld [vmem:[%s2987_s9 + $0x140] sm:$0xff]  ;;  %1403 = vmatpush.msrb.mxu1 %v471_v22  ;;  %v495_v22 = vld [vmem:[%s4628_s1 + $0x408] sm:$0xff] }
 0x113   : > { %v3658_v60 = vadd.f32 %v912_v54, %v860_v56  ;;  %v2575_v54 = vld [vmem:[%s2987_s9 + $0x1e8] sm:$0xff]  ;;  %1460 = vmatpush.msrb.mxu2 %v495_v22 }
 0x114   : > { %v985_v4 = vpop.f32.mrf.mxu1  ;;  %1155 = vmatmul.f32.gmra.mxu0 %v3656_v59  ;;  %1404 = vmatpush.msrb.mxu1 %v469_v49  ;;  %v531_v56 = vld [vmem:[%s4628_s1 + $0x528] sm:$0xff]  ;;  %v2578_v49 = vld [vmem:[%s2987_s9 + $0x280] sm:$0xff] }
 0x115   : > { %1261 = vmatmul.f32.gmra.mxu2 %v2571_v55  ;;  %1314 = vmatmul.f32.gmra.mxu3 %v3159_v62  ;;  %v986_v8 = vadd.f32 %v985_v4, %v933_v61  ;;  %v467_v61 = vld [vmem:[%s4628_s1 + $0x328] sm:$0xff]  ;;  %v3746_v55 = vld [vmem:[%s2987_s9 + $0x270] sm:$0xff] }
 0x116   : > { %1511 = vmatpush.msrb.mxu3 %v531_v56  ;;  %1405 = vmatpush.msrb.mxu1 %v467_v61 }
 0x117   : > { %2466 = vmatmul.msk.f32.gmra.mxu1 %vm666_vm0, %v3672_v6  ;;  %1657 = vmatpush.msra.mxu2 %v653_v50  ;;  %v647_v50 = vld [vmem:[%s4628_s1 + $0x8c8] sm:$0xff] }
 0x118   : > { %v1038_v12 = vpop.f32.mrf.mxu2  ;;  %v1091_v13 = vpop.f32.mrf.mxu3  ;;  %1406 = vmatpush.msrb.mxu1 %v465_v20 }
 0x119   : > { %v1039_v62 = vadd.f32 %v1038_v12, %v986_v8  ;;  %v935_v14 = vpop.f32.mrf.mxu0  ;;  %v433_v12 = vld [vmem:[%s4628_s1 + $0x218] sm:$0xff] }
 0x11a   : > { %v936_v19 = vadd.f32 %v935_v14, %v3414_v9  ;;  %v2573_v9 = vld [vmem:[%s2987_s9 + $0x198] sm:$0xff] }
 0x11b   : > { %v3687_v16 = vadd.f32 %v1091_v13, %v1039_v62  ;;  %v529_v13 = vld [vmem:[%s4628_s1 + $0x518] sm:$0xff] }
 0x11c   : > { %v988_v26 = vpop.f32.mrf.mxu1  ;;  %1158 = vmatmul.f32.gmra.mxu0 %v3685_v15  ;;  %v3762_v14 = vld [vmem:[%s2987_s9 + $0x278] sm:$0xff]  ;;  %1512 = vmatpush.msrb.mxu3 %v529_v13  ;;  %v2580_v13 = vld [vmem:[%s2987_s9 + $0x2d0] sm:$0xff] }
 0x11d   : > { %1264 = vmatmul.f32.gmra.mxu2 %v2572_v29  ;;  %1317 = vmatmul.f32.gmra.mxu3 %v2573_v9  ;;  %v989_v31 = vadd.f32 %v988_v26, %v936_v19  ;;  %v2576_v19 = vld [vmem:[%s2987_s9 + $0x230] sm:$0xff] }
 0x11f   : > { %2467 = vmatmul.msk.f32.gmra.mxu1 %vm666_vm0, %v3701_v27 }
 0x120   : > { %v1041_v35 = vpop.f32.mrf.mxu2  ;;  %v1094_v36 = vpop.f32.mrf.mxu3 }
 0x121   : > { %v1042_v37 = vadd.f32 %v1041_v35, %v989_v31  ;;  %v938_v41 = vpop.f32.mrf.mxu0  ;;  %v3775_v31 = vld [vmem:[%s2987_s9 + $0x2c0] sm:$0xff]  ;;  %v431_v35 = vld [vmem:[%s4628_s1 + $0x208] sm:$0xff] }
 0x122   : > { %v939_v47 = vadd.f32 %v938_v41, %v3429_v23  ;;  %v435_v23 = vld [vmem:[%s4628_s1 + $0x228] sm:$0xff] }
 0x123   : > { %v3719_v45 = vadd.f32 %v1094_v36, %v1042_v37  ;;  %1352 = vmatpush.msrb.mxu0 %v435_v23  ;;  %v527_v36 = vld [vmem:[%s4628_s1 + $0x508] sm:$0xff] }
 0x124   : > { %v991_v51 = vpop.f32.mrf.mxu1  ;;  %1161 = vmatmul.f32.gmra.mxu0 %v3717_v42  ;;  %v463_v37 = vld [vmem:[%s4628_s1 + $0x308] sm:$0xff]  ;;  %1513 = vmatpush.msrb.mxu3 %v527_v36 }
 0x125   : > { %1267 = vmatmul.f32.gmra.mxu2 %v2574_v53  ;;  %1320 = vmatmul.f32.gmra.mxu3 %v2575_v54  ;;  %v992_v58 = vadd.f32 %v991_v51, %v939_v47  ;;  %v3791_v47 = vld [vmem:[%s2987_s9 + $0x2c8] sm:$0xff]  ;;  %v589_v53 = vld [vmem:[%s4628_s1 + $0x6f8] sm:$0xff] }
 0x126   : > { %1353 = vmatpush.msrb.mxu0 %v433_v12  ;;  %1407 = vmatpush.msrb.mxu1 %v463_v37  ;;  %v665_v54 = vld [vmem:[%s4628_s1 + $0x958] sm:$0xff]  ;;  %v3846_v37 = vld [vmem:[%s2987_s9 + $0x368] sm:$0xff] }
 0x127   : > { %2468 = vmatmul.msk.f32.gmra.mxu1 %vm666_vm0, %v3730_v52  ;;  %1720 = vmatpush.msra.mxu3 %v665_v54  ;;  %v3820_v12 = vld [vmem:[%s2987_s9 + $0x318] sm:$0xff] }
 0x128   : > { %v1044_v1 = vpop.f32.mrf.mxu2  ;;  %v1097_v2 = vpop.f32.mrf.mxu3  ;;  %1354 = vmatpush.msrb.mxu0 %v431_v35  ;;  %v585_v35 = vld [vmem:[%s4628_s1 + $0x6d8] sm:$0xff] }
 0x129   : > { %v1045_v3 = vadd.f32 %v1044_v1, %v992_v58  ;;  %v941_v4 = vpop.f32.mrf.mxu0  ;;  %v3807_v1 = vld [vmem:[%s2987_s9 + $0x310] sm:$0xff] }
 0x12a   : > { %v942_v8 = vadd.f32 %v941_v4, %v3450_v39  ;;  %v2577_v39 = vld [vmem:[%s2987_s9 + $0x238] sm:$0xff]  ;;  %1551 = vmatpush.msra.mxu0 %v589_v53 }
 0x12b   : > { %v3748_v7 = vadd.f32 %v1097_v2, %v1045_v3  ;;  %v621_v4 = vld [vmem:[%s4628_s1 + $0x7f8] sm:$0xff] }
 0x12c   : > { %v994_v62 = vpop.f32.mrf.mxu1  ;;  %1164 = vmatmul.f32.gmra.mxu0 %v3746_v55  ;;  %1604 = vmatpush.msra.mxu1 %v621_v4  ;;  %v583_v4 = vld [vmem:[%s4628_s1 + $0x6c8] sm:$0xff] }
 0x12d   : > { %1270 = vmatmul.f32.gmra.mxu2 %v2576_v19  ;;  %1323 = vmatmul.f32.gmra.mxu3 %v2577_v39  ;;  %v995_v21 = vadd.f32 %v994_v62, %v942_v8  ;;  %v651_v8 = vld [vmem:[%s4628_s1 + $0x8e8] sm:$0xff]  ;;  %v2581_v62 = vld [vmem:[%s2987_s9 + $0x2d8] sm:$0xff] }
 0x12e   : > { %1658 = vmatpush.msra.mxu2 %v651_v8  ;;  %v619_v39 = vld [vmem:[%s4628_s1 + $0x7e8] sm:$0xff] }
 0x12f   : > { %2469 = vmatmul.msk.f32.gmra.mxu1 %vm666_vm0, %v3762_v14  ;;  %v615_v8 = vld [vmem:[%s4628_s1 + $0x7c8] sm:$0xff] }
 0x130   : > { %v1047_v26 = vpop.f32.mrf.mxu2  ;;  %v1100_v29 = vpop.f32.mrf.mxu3  ;;  %1605 = vmatpush.msra.mxu1 %v619_v39  ;;  %v581_v39 = vld [vmem:[%s4628_s1 + $0x6b8] sm:$0xff] }
 0x131   : > { %v1048_v9 = vadd.f32 %v1047_v26, %v995_v21  ;;  %v944_v30 = vpop.f32.mrf.mxu0 }
 0x132   : > { %v945_v34 = vadd.f32 %v944_v30, %v3471_v57  ;;  %v2579_v57 = vld [vmem:[%s2987_s9 + $0x288] sm:$0xff] }
 0x133   : > { %v3777_v32 = vadd.f32 %v1100_v29, %v1048_v9  ;;  %v3833_v29 = vld [vmem:[%s2987_s9 + $0x360] sm:$0xff] }
 0x134   : > { %v997_v41 = vpop.f32.mrf.mxu1  ;;  %1167 = vmatmul.f32.gmra.mxu0 %v3775_v31 }
 0x135   : > { %1273 = vmatmul.f32.gmra.mxu2 %v2578_v49  ;;  %1326 = vmatmul.f32.gmra.mxu3 %v2579_v57  ;;  %v998_v51 = vadd.f32 %v997_v41, %v945_v34  ;;  %v649_v34 = vld [vmem:[%s4628_s1 + $0x8d8] sm:$0xff]  ;;  %v2582_v41 = vld [vmem:[%s2987_s9 + $0x320] sm:$0xff]  ;;  %v2583_v49 = vld [vmem:[%s2987_s9 + $0x328] sm:$0xff] }
 0x136   : > { %1659 = vmatpush.msra.mxu2 %v649_v34 }
 0x137   : > { %2470 = vmatmul.msk.f32.gmra.mxu1 %vm666_vm0, %v3791_v47 }
 0x138   : > { %v1050_v23 = vpop.f32.mrf.mxu2  ;;  %v1103_v56 = vpop.f32.mrf.mxu3  ;;  %1660 = vmatpush.msra.mxu2 %v647_v50 }
 0x139   : > { %v1051_v58 = vadd.f32 %v1050_v23, %v998_v51  ;;  %v947_v61 = vpop.f32.mrf.mxu0  ;;  %v663_v51 = vld [vmem:[%s4628_s1 + $0x948] sm:$0xff] }
 0x13a   : > { %v948_v3 = vadd.f32 %v947_v61, %v3492_v11  ;;  %v587_v11 = vld [vmem:[%s4628_s1 + $0x6e8] sm:$0xff]  ;;  %1721 = vmatpush.msra.mxu3 %v663_v51  ;;  %v2589_v51 = vld [vmem:[%s2987_s9 + $0x18] sm:$0xff] }
 0x13b   : > { %v3809_v2 = vadd.f32 %v1103_v56, %v1051_v58  ;;  %1552 = vmatpush.msra.mxu0 %v587_v11  ;;  %v3862_v58 = vld [vmem:[%s2987_s9 + $0x3b0] sm:$0xff]  ;;  %v2585_v11 = vld [vmem:[%s2987_s9 + $0x378] sm:$0xff] }
 0x13c   : > { %v1000_v10 = vpop.f32.mrf.mxu1  ;;  %1170 = vmatmul.f32.gmra.mxu0 %v3807_v1 }
 0x13d   : > { %1276 = vmatmul.f32.gmra.mxu2 %v2580_v13  ;;  %1329 = vmatmul.f32.gmra.mxu3 %v2581_v62  ;;  %v1001_v19 = vadd.f32 %v1000_v10, %v948_v3  ;;  %v3875_v13 = vld [vmem:[%s2987_s9 + $0x3b8] sm:$0xff]  ;;  %v2584_v62 = vld [vmem:[%s2987_s9 + $0x370] sm:$0xff] }
 0x13e   : > { %1553 = vmatpush.msra.mxu0 %v585_v35  ;;  %v613_v35 = vld [vmem:[%s4628_s1 + $0x7b8] sm:$0xff] }
 0x13f   : > { %2471 = vmatmul.msk.f32.gmra.mxu1 %vm666_vm0, %v3820_v12 }
 0x140   : > { %v1053_v20 = vpop.f32.mrf.mxu2  ;;  %v1106_v21 = vpop.f32.mrf.mxu3  ;;  %1554 = vmatpush.msra.mxu0 %v583_v4 }
 0x141   : > { %v1054_v22 = vadd.f32 %v1053_v20, %v1001_v19  ;;  %v950_v26 = vpop.f32.mrf.mxu0 }
 0x142   : > { %v951_v30 = vadd.f32 %v950_v26, %v3515_v28  ;;  %v617_v28 = vld [vmem:[%s4628_s1 + $0x7d8] sm:$0xff]  ;;  %1555 = vmatpush.msra.mxu0 %v581_v39  ;;  %v2591_v39 = vld [vmem:[%s2987_s9 + $0x70] sm:$0xff] }
 0x143   : > { %v3835_v9 = vadd.f32 %v1106_v21, %v1054_v22  ;;  %1606 = vmatpush.msra.mxu1 %v617_v28  ;;  %v2587_v28 = vld [vmem:[%s2987_s9 + $0x20] sm:$0xff] }
 0x144   : > { %v1003_v36 = vpop.f32.mrf.mxu1  ;;  %1173 = vmatmul.f32.gmra.mxu0 %v3833_v29 }
 0x145   : > { %1279 = vmatmul.f32.gmra.mxu2 %v2582_v41  ;;  %1332 = vmatmul.f32.gmra.mxu3 %v2583_v49  ;;  %v1004_v57 = vadd.f32 %v1003_v36, %v951_v30  ;;  %v643_v36 = vld [vmem:[%s4628_s1 + $0x8a8] sm:$0xff]  ;;  %v2586_v49 = vld [vmem:[%s2987_s9 + $0x10] sm:$0xff] }
 0x146   : > { %1607 = vmatpush.msra.mxu1 %v615_v8  ;;  %v641_v8 = vld [vmem:[%s4628_s1 + $0x898] sm:$0xff] }
 0x147   : > { %2472 = vmatmul.msk.f32.gmra.mxu1 %vm666_vm0, %v3846_v37 }
 0x148   : > { %v1056_v53 = vpop.f32.mrf.mxu2  ;;  %v1109_v54 = vpop.f32.mrf.mxu3  ;;  %1608 = vmatpush.msra.mxu1 %v613_v35 }
 0x149   : > { %v1057_v23 = vadd.f32 %v1056_v53, %v1004_v57  ;;  %v953_v56 = vpop.f32.mrf.mxu0  ;;  %v2588_v57 = vld [vmem:[%s2987_s9 + $0x28] sm:$0xff] }
 0x14a   : > { %v954_v3 = vadd.f32 %v953_v56, %v3543_v44  ;;  %v645_v44 = vld [vmem:[%s4628_s1 + $0x8b8] sm:$0xff]  ;;  %v611_v53 = vld [vmem:[%s4628_s1 + $0x7a8] sm:$0xff] }
 0x14b   : > { %v3864_v61 = vadd.f32 %v1109_v54, %v1057_v23  ;;  %1661 = vmatpush.msra.mxu2 %v645_v44  ;;  %v661_v54 = vld [vmem:[%s4628_s1 + $0x938] sm:$0xff]  ;;  %1609 = vmatpush.msra.mxu1 %v611_v53  ;;  %v2595_v53 = vld [vmem:[%s2987_s9 + $0xc0] sm:$0xff] }
 0x14c   : > { %v1006_v10 = vpop.f32.mrf.mxu1  ;;  %1176 = vmatmul.f32.gmra.mxu0 %v3862_v58  ;;  %1722 = vmatpush.msra.mxu3 %v661_v54  ;;  %v2596_v54 = vld [vmem:[%s2987_s9 + $0xc8] sm:$0xff] }
 0x14d   : > { %1282 = vmatmul.f32.gmra.mxu2 %v2584_v62  ;;  %1335 = vmatmul.f32.gmra.mxu3 %v2585_v11  ;;  %v1007_v19 = vadd.f32 %v1006_v10, %v954_v3  ;;  %v577_v10 = vld [vmem:[%s4628_s1 + $0x698] sm:$0xff] }
 0x14e   : > { %1662 = vmatpush.msra.mxu2 %v643_v36 }
 0x14f   : > { %2473 = vmatmul.msk.f32.gmra.mxu1 %vm666_vm0, %v3875_v13 }
 0x150   : > { %v1059_v20 = vpop.f32.mrf.mxu2  ;;  %v1112_v21 = vpop.f32.mrf.mxu3  ;;  %1663 = vmatpush.msra.mxu2 %v641_v8 }
 0x151   : > { %v1060_v22 = vadd.f32 %v1059_v20, %v1007_v19  ;;  %v956_v26 = vpop.f32.mrf.mxu0  ;;  %v2590_v19 = vld [vmem:[%s2987_s9 + $0x60] sm:$0xff]  ;;  %v2592_v20 = vld [vmem:[%s2987_s9 + $0x78] sm:$0xff] }
 0x152   : > { %v957_v34 = vadd.f32 %v956_v26, %v3571_v0  ;;  %v579_v0 = vld [vmem:[%s4628_s1 + $0x6a8] sm:$0xff] }
 0x153   : > { %v3887_v30 = vadd.f32 %v1112_v21, %v1060_v22  ;;  %1556 = vmatpush.msra.mxu0 %v579_v0  ;;  %v609_v21 = vld [vmem:[%s4628_s1 + $0x798] sm:$0xff]  ;;  %v2593_v26 = vld [vmem:[%s2987_s9 + $0x68] sm:$0xff] }
 0x154   : > { %v1009_v41 = vpop.f32.mrf.mxu1  ;;  %1355 = vmatmul.f32.vlgmr.msrb.gmra.mxu0 %v2586_v49  ;;  %1610 = vmatpush.msra.mxu1 %v609_v21  ;;  %v575_v49 = vld [vmem:[%s4628_s1 + $0x688] sm:$0xff] }
 0x155   : > { %1461 = vmatmul.f32.vlgmr.msrb.gmra.mxu2 %v2587_v28  ;;  %1514 = vmatmul.f32.vlgmr.msrb.gmra.mxu3 %v2588_v57  ;;  %v1010_v50 = vadd.f32 %v1009_v41, %v957_v34  ;;  %v607_v28 = vld [vmem:[%s4628_s1 + $0x788] sm:$0xff] }
 0x156   : > { %1557 = vmatpush.msra.mxu0 %v577_v10  ;;  %1611 = vmatpush.msra.mxu1 %v607_v28 }
 0x157   : > { %1408 = vmatmul.f32.vlgmr.msrb.gmra.mxu1 %v2589_v51  ;;  %v2594_v51 = vld [vmem:[%s2987_s9 + $0xb0] sm:$0xff] }
 0x158   : > { %v1062_v23 = vpop.f32.mrf.mxu2  ;;  %v1115_v56 = vpop.f32.mrf.mxu3  ;;  %1558 = vmatpush.msra.mxu0 %v575_v49 }
 0x159   : > { %v1063_v3 = vadd.f32 %v1062_v23, %v1010_v50  ;;  %v959_v4 = vpop.f32.mrf.mxu0  ;;  %v637_v23 = vld [vmem:[%s4628_s1 + $0x878] sm:$0xff] }
 0x15a   : > { %v960_v11 = vadd.f32 %v959_v4, %v3599_v18  ;;  %v639_v18 = vld [vmem:[%s4628_s1 + $0x888] sm:$0xff] }
 0x15b   : > { %v3915_v62 = vadd.f32 %v1115_v56, %v1063_v3  ;;  %1664 = vmatpush.msra.mxu2 %v639_v18  ;;  %v2597_v3 = vld [vmem:[%s2987_s9 + $0xb8] sm:$0xff]  ;;  %v659_v4 = vld [vmem:[%s4628_s1 + $0x928] sm:$0xff]  ;;  %v2599_v18 = vld [vmem:[%s2987_s9 + $0x110] sm:$0xff] }
 0x15c   : > { %v1012_v44 = vpop.f32.mrf.mxu1  ;;  %1358 = vmatmul.f32.gmra.mxu0 %v2590_v19  ;;  %1723 = vmatpush.msra.mxu3 %v659_v4  ;;  %v605_v19 = vld [vmem:[%s4628_s1 + $0x778] sm:$0xff] }
 0x15d   : > { %4635 = vst [vmem:[#allocation5_spill] sm:$0xff] %v3915_v62  ;;  %1464 = vmatmul.f32.gmra.mxu2 %v2591_v39  ;;  %1517 = vmatmul.f32.gmra.mxu3 %v2592_v20  ;;  %v1013_v22 = vadd.f32 %v1012_v44, %v960_v11  ;;  %v635_v39 = vld [vmem:[%s4628_s1 + $0x868] sm:$0xff]  ;;  %v601_v4 = vld [vmem:[%s4628_s1 + $0x758] sm:$0xff]  ;;  %v2630_v62 = vld [vmem:[%s2987_s9 + $0x380] sm:$0xff] }
 0x15e   : > { %1665 = vmatpush.msra.mxu2 %v637_v23  ;;  %1612 = vmatpush.msra.mxu1 %v605_v19 }
 0x15f   : > { %1411 = vmatmul.f32.gmra.mxu1 %v2593_v26  ;;  %v2598_v26 = vld [vmem:[%s2987_s9 + $0x100] sm:$0xff] }
 0x160   : > { %v1065_v34 = vpop.f32.mrf.mxu2  ;;  %v1118_v35 = vpop.f32.mrf.mxu3  ;;  %1666 = vmatpush.msra.mxu2 %v635_v39 }
 0x161   : > { %v1066_v36 = vadd.f32 %v1065_v34, %v1013_v22  ;;  %v962_v41 = vpop.f32.mrf.mxu0  ;;  %v2600_v34 = vld [vmem:[%s2987_s9 + $0x118] sm:$0xff] }
 0x162   : > { %v963_v0 = vadd.f32 %v962_v41, %v3630_v40  ;;  %v573_v40 = vld [vmem:[%s4628_s1 + $0x678] sm:$0xff]  ;;  %v2601_v41 = vld [vmem:[%s2987_s9 + $0x108] sm:$0xff] }
 0x163   : > { %v3934_v57 = vadd.f32 %v1118_v35, %v1066_v36  ;;  %1559 = vmatpush.msra.mxu0 %v573_v40  ;;  %v571_v35 = vld [vmem:[%s4628_s1 + $0x668] sm:$0xff] }
 0x164   : > { %v1015_v50 = vpop.f32.mrf.mxu1  ;;  %1361 = vmatmul.f32.gmra.mxu0 %v2594_v51  ;;  %v633_v51 = vld [vmem:[%s4628_s1 + $0x858] sm:$0xff]  ;;  %v2604_v40 = vld [vmem:[%s2987_s9 + $0x168] sm:$0xff] }
 0x165   : > { %4636 = vst [vmem:[#allocation6_spill] sm:$0xff] %v3934_v57  ;;  %1467 = vmatmul.f32.gmra.mxu2 %v2595_v53  ;;  %1520 = vmatmul.f32.gmra.mxu3 %v2596_v54  ;;  %v1016_v56 = vadd.f32 %v1015_v50, %v963_v0  ;;  %v569_v53 = vld [vmem:[%s4628_s1 + $0x658] sm:$0xff] }
 0x166   : > { %1560 = vmatpush.msra.mxu0 %v571_v35  ;;  %1667 = vmatpush.msra.mxu2 %v633_v51  ;;  %v2607_v35 = vld [vmem:[%s2987_s9 + $0x1b0] sm:$0xff] }
 0x167   : > { %1414 = vmatmul.f32.gmra.mxu1 %v2597_v3  ;;  %v2603_v3 = vld [vmem:[%s2987_s9 + $0x160] sm:$0xff] }
 0x168   : > { %v1068_v8 = vpop.f32.mrf.mxu2  ;;  %v1121_v10 = vpop.f32.mrf.mxu3  ;;  %1561 = vmatpush.msra.mxu0 %v569_v53 }
 0x169   : > { %v1069_v11 = vadd.f32 %v1068_v8, %v1016_v56  ;;  %v965_v44 = vpop.f32.mrf.mxu0  ;;  %v2602_v56 = vld [vmem:[%s2987_s9 + $0x150] sm:$0xff]  ;;  %v2605_v8 = vld [vmem:[%s2987_s9 + $0x158] sm:$0xff] }
 0x16a   : > { %v966_v21 = vadd.f32 %v965_v44, %v3658_v60  ;;  %v603_v60 = vld [vmem:[%s4628_s1 + $0x768] sm:$0xff] }
 0x16b   : > { %v3956_v20 = vadd.f32 %v1121_v10, %v1069_v11  ;;  %1613 = vmatpush.msra.mxu1 %v603_v60  ;;  %v631_v10 = vld [vmem:[%s4628_s1 + $0x848] sm:$0xff]  ;;  %v657_v11 = vld [vmem:[%s4628_s1 + $0x918] sm:$0xff] }
 0x16c   : > { %v1018_v22 = vpop.f32.mrf.mxu1  ;;  %1364 = vmatmul.f32.gmra.mxu0 %v2598_v26  ;;  %1668 = vmatpush.msra.mxu2 %v631_v10  ;;  %v599_v26 = vld [vmem:[%s4628_s1 + $0x748] sm:$0xff] }
 0x16d   : > { %4637 = vst [vmem:[#allocation7_spill] sm:$0xff] %v3956_v20  ;;  %1470 = vmatmul.f32.gmra.mxu2 %v2599_v18  ;;  %1523 = vmatmul.f32.gmra.mxu3 %v2600_v34  ;;  %v1019_v36 = vadd.f32 %v1018_v22, %v966_v21  ;;  %v567_v22 = vld [vmem:[%s4628_s1 + $0x648] sm:$0xff]  ;;  %v2606_v34 = vld [vmem:[%s2987_s9 + $0x1a0] sm:$0xff]  ;;  %v2629_v20 = vld [vmem:[%s2987_s9 + $0x338] sm:$0xff] }
 0x16e   : > { %1614 = vmatpush.msra.mxu1 %v601_v4  ;;  %1724 = vmatpush.msra.mxu3 %v657_v11  ;;  %v2609_v60 = vld [vmem:[%s2987_s9 + $0x1a8] sm:$0xff]  ;;  %v2610_v4 = vld [vmem:[%s2987_s9 + $0x1f0] sm:$0xff] }
 0x16f   : > { %1417 = vmatmul.f32.gmra.mxu1 %v2601_v41  ;;  %1562 = vmatpush.msra.mxu0 %v567_v22  ;;  %v629_v41 = vld [vmem:[%s4628_s1 + $0x838] sm:$0xff]  ;;  %v2612_v10 = vld [vmem:[%s2987_s9 + $0x208] sm:$0xff] }
 0x170   : > { %v1071_v49 = vpop.f32.mrf.mxu2  ;;  %v1124_v28 = vpop.f32.mrf.mxu3  ;;  %1615 = vmatpush.msra.mxu1 %v599_v26  ;;  %1669 = vmatpush.msra.mxu2 %v629_v41  ;;  %v563_v11 = vld [vmem:[%s4628_s1 + $0x628] sm:$0xff]  ;;  %v625_v41 = vld [vmem:[%s4628_s1 + $0x818] sm:$0xff] }
 0x171   : > { %v1072_v0 = vadd.f32 %v1071_v49, %v1019_v36  ;;  %v3969_v50 = vpop.f32.mrf.mxu0  ;;  %v2608_v36 = vld [vmem:[%s2987_s9 + $0x1b8] sm:$0xff]  ;;  %v655_v22 = vld [vmem:[%s4628_s1 + $0x908] sm:$0xff] }
 0x172   : > { %v565_v49 = vld [vmem:[%s4628_s1 + $0x638] sm:$0xff]  ;;  %1725 = vmatpush.msra.mxu3 %v655_v22  ;;  %v559_v22 = vld [vmem:[%s4628_s1 + $0x608] sm:$0xff] }
 0x173   : > { %v3977_v54 = vadd.f32 %v1124_v28, %v1072_v0  ;;  %1563 = vmatpush.msra.mxu0 %v565_v49 }
 0x174   : > { %v3979_v23 = vpop.f32.mrf.mxu1  ;;  %1367 = vmatmul.f32.gmra.mxu0 %v2602_v56  ;;  %v597_v56 = vld [vmem:[%s4628_s1 + $0x738] sm:$0xff] }
 0x175   : > { %4638 = vst [vmem:[#allocation8_spill] sm:$0xff] %v3977_v54  ;;  %1473 = vmatmul.f32.gmra.mxu2 %v2603_v3  ;;  %1526 = vmatmul.f32.gmra.mxu3 %v2604_v40  ;;  %v627_v3 = vld [vmem:[%s4628_s1 + $0x828] sm:$0xff]  ;;  %v2626_v54 = vld [vmem:[%s2987_s9 + $0x330] sm:$0xff] }
 0x176   : > { %1616 = vmatpush.msra.mxu1 %v597_v56  ;;  %1670 = vmatpush.msra.mxu2 %v627_v3  ;;  %v2616_v56 = vld [vmem:[%s2987_s9 + $0x258] sm:$0xff] }
 0x177   : > { %1420 = vmatmul.f32.gmra.mxu1 %v2605_v8  ;;  %v2611_v8 = vld [vmem:[%s2987_s9 + $0x200] sm:$0xff]  ;;  %1564 = vmatpush.msra.mxu0 %v563_v11  ;;  %v593_v3 = vld [vmem:[%s4628_s1 + $0x718] sm:$0xff] }
 0x178   : > { %v1250_v44 = vpop.f32.mrf.mxu2  ;;  %v1303_v19 = vpop.f32.mrf.mxu3  ;;  %1671 = vmatpush.msra.mxu2 %v625_v41  ;;  %v2618_v41 = vld [vmem:[%s2987_s9 + $0x290] sm:$0xff] }
 0x179   : > { %v3994_v39 = vadd.f32 %v1303_v19, %v1250_v44  ;;  %v3996_v21 = vpop.f32.mrf.mxu0  ;;  %v2613_v44 = vld [vmem:[%s2987_s9 + $0x1f8] sm:$0xff]  ;;  %v595_v19 = vld [vmem:[%s4628_s1 + $0x728] sm:$0xff] }
 0x17a   : > { %1617 = vmatpush.msra.mxu1 %v595_v19 }
 0x17c   : > { %v4004_v18 = vpop.f32.mrf.mxu1  ;;  %1370 = vmatmul.f32.gmra.mxu0 %v2606_v34  ;;  %1618 = vmatpush.msra.mxu1 %v593_v3 }
 0x17d   : > { %1476 = vmatmul.f32.gmra.mxu2 %v2607_v35  ;;  %1529 = vmatmul.f32.gmra.mxu3 %v2608_v36 }
 0x17f   : > { %1423 = vmatmul.f32.gmra.mxu1 %v2609_v60  ;;  %v561_v60 = vld [vmem:[%s4628_s1 + $0x618] sm:$0xff] }
 0x180   : > { %v1253_v28 = vpop.f32.mrf.mxu2  ;;  %v1306_v0 = vpop.f32.mrf.mxu3  ;;  %1565 = vmatpush.msra.mxu0 %v561_v60  ;;  %v2619_v60 = vld [vmem:[%s2987_s9 + $0x2a0] sm:$0xff] }
 0x181   : > { %v4016_v51 = vadd.f32 %v1306_v0, %v1253_v28  ;;  %v4018_v53 = vpop.f32.mrf.mxu0  ;;  %v2614_v28 = vld [vmem:[%s2987_s9 + $0x240] sm:$0xff]  ;;  %v2615_v0 = vld [vmem:[%s2987_s9 + $0x250] sm:$0xff] }
 0x182   : > { %1566 = vmatpush.msra.mxu0 %v559_v22  ;;  %v2623_v22 = vld [vmem:[%s2987_s9 + $0x2f0] sm:$0xff] }
 0x184   : > { %v4026_v40 = vpop.f32.mrf.mxu1  ;;  %1373 = vmatmul.f32.gmra.mxu0 %v2610_v4  ;;  %v2617_v4 = vld [vmem:[%s2987_s9 + $0x248] sm:$0xff] }
 0x185   : > { %1479 = vmatmul.f32.gmra.mxu2 %v2611_v8  ;;  %1532 = vmatmul.f32.gmra.mxu3 %v2612_v10  ;;  %v623_v8 = vld [vmem:[%s4628_s1 + $0x808] sm:$0xff] }
 0x186   : > { %1672 = vmatpush.msra.mxu2 %v623_v8 }
 0x187   : > { %1426 = vmatmul.f32.gmra.mxu1 %v2613_v44 }
 0x188   : > { %v1256_v26 = vpop.f32.mrf.mxu2  ;;  %v1309_v34 = vpop.f32.mrf.mxu3 }
 0x189   : > { %v4041_v35 = vadd.f32 %v1309_v34, %v1256_v26  ;;  %v4043_v36 = vpop.f32.mrf.mxu0  ;;  %v591_v26 = vld [vmem:[%s4628_s1 + $0x708] sm:$0xff] }
 0x18a   : > { %1619 = vmatpush.msra.mxu1 %v591_v26  ;;  %v2624_v26 = vld [vmem:[%s2987_s9 + $0x2f8] sm:$0xff] }
 0x18c   : > { %v4051_v49 = vpop.f32.mrf.mxu1  ;;  %1376 = vmatmul.f32.gmra.mxu0 %v2614_v28  ;;  %v2620_v28 = vld [vmem:[%s2987_s9 + $0x2a8] sm:$0xff] }
 0x18d   : > { %1482 = vmatmul.f32.gmra.mxu2 %v2615_v0  ;;  %1535 = vmatmul.f32.gmra.mxu3 %v2616_v56  ;;  %v2621_v0 = vld [vmem:[%s2987_s9 + $0x298] sm:$0xff] }
 0x18f   : > { %1429 = vmatmul.f32.gmra.mxu1 %v2617_v4 }
 0x190   : > { %v1259_v10 = vpop.f32.mrf.mxu2  ;;  %v1312_v11 = vpop.f32.mrf.mxu3 }
 0x191   : > { %v4063_v44 = vadd.f32 %v1312_v11, %v1259_v10  ;;  %v4065_v19 = vpop.f32.mrf.mxu0  ;;  %v2622_v11 = vld [vmem:[%s2987_s9 + $0x2e0] sm:$0xff] }
 0x194   : > { %v4073_v34 = vpop.f32.mrf.mxu1  ;;  %1379 = vmatmul.f32.gmra.mxu0 %v2618_v41  ;;  %v2625_v41 = vld [vmem:[%s2987_s9 + $0x2e8] sm:$0xff] }
 0x195   : > { %1485 = vmatmul.f32.gmra.mxu2 %v2619_v60  ;;  %1538 = vmatmul.f32.gmra.mxu3 %v2620_v28 }
 0x197   : > { %1432 = vmatmul.f32.gmra.mxu1 %v2621_v0 }
 0x198   : > { %v1262_v56 = vpop.f32.mrf.mxu2  ;;  %v1315_v3 = vpop.f32.mrf.mxu3 }
 0x199   : > { %v4079_v4 = vadd.f32 %v1315_v3, %v1262_v56  ;;  %v4081_v8 = vpop.f32.mrf.mxu0 }
 0x19c   : > { %v4083_v10 = vpop.f32.mrf.mxu1  ;;  %1382 = vmatmul.f32.gmra.mxu0 %v2622_v11  ;;  %v2627_v11 = vld [vmem:[%s2987_s9 + $0x340] sm:$0xff] }
 0x19d   : > { %1488 = vmatmul.f32.gmra.mxu2 %v2623_v22  ;;  %1541 = vmatmul.f32.gmra.mxu3 %v2624_v26  ;;  %v2628_v22 = vld [vmem:[%s2987_s9 + $0x348] sm:$0xff] }
 0x19f   : > { %1435 = vmatmul.f32.gmra.mxu1 %v2625_v41 }
 0x1a0   : > { %v1265_v60 = vpop.f32.mrf.mxu2  ;;  %v1318_v28 = vpop.f32.mrf.mxu3 }
 0x1a1   : > { %v4089_v0 = vadd.f32 %v1318_v28, %v1265_v60  ;;  %v4091_v56 = vpop.f32.mrf.mxu0 }
 0x1a4   : > { %v4093_v3 = vpop.f32.mrf.mxu1  ;;  %1385 = vmatmul.f32.gmra.mxu0 %v2626_v54  ;;  %v2631_v54 = vld [vmem:[%s2987_s9 + $0x388] sm:$0xff] }
 0x1a5   : > { %1491 = vmatmul.f32.gmra.mxu2 %v2627_v11  ;;  %1544 = vmatmul.f32.gmra.mxu3 %v2628_v22 }
 0x1a7   : > { %1438 = vmatmul.f32.gmra.mxu1 %v2629_v20 }
 0x1a8   : > { %v1268_v26 = vpop.f32.mrf.mxu2  ;;  %v1321_v41 = vpop.f32.mrf.mxu3 }
 0x1a9   : > { %v4099_v57 = vadd.f32 %v1321_v41, %v1268_v26  ;;  %v4101_v60 = vpop.f32.mrf.mxu0 }
 0x1ac   : > { %v4103_v28 = vpop.f32.mrf.mxu1  ;;  %1388 = vmatmul.f32.gmra.mxu0 %v2630_v62 }
 0x1ad   : > { %4639 = vst [vmem:[#allocation9_spill] sm:$0xff] %v4103_v28  ;;  %1494 = vmatmul.f32.gmra.mxu2 %v3511_v25  ;;  %1547 = vmatmul.f32.gmra.mxu3 %v3528_v33  ;;  %v2632_v28 = vld [vmem:[%s2987_s9 + $0x30] sm:$0xff]  ;;  %v2633_v25 = vld [vmem:[%s2987_s9 + $0x38] sm:$0xff] }
 0x1af   : > { %1441 = vmatmul.f32.gmra.mxu1 %v2631_v54 }
 0x1b0   : > { %v1271_v11 = vpop.f32.mrf.mxu2  ;;  %v1324_v20 = vpop.f32.mrf.mxu3 }
 0x1b1   : > { %v4109_v22 = vadd.f32 %v1324_v20, %v1271_v11  ;;  %v4111_v26 = vpop.f32.mrf.mxu0 }
 0x1b4   : > { %v4113_v41 = vpop.f32.mrf.mxu1  ;;  %1567 = vmatmul.f32.vlgmr.msra.gmra.mxu0 %v2632_v28 }
 0x1b5   : > { %4640 = vst [vmem:[#allocation10_spill] sm:$0xff] %v4113_v41  ;;  %1673 = vmatmul.f32.vlgmr.msra.gmra.mxu2 %v3541_v43  ;;  %2474 = vmatmul.msk.f32.vlgmr.msra.gmra.mxu3 %vm666_vm0, %v3553_v48  ;;  %v2634_v41 = vld [vmem:[%s2987_s9 + $0x80] sm:$0xff]  ;;  %v2635_v43 = vld [vmem:[%s2987_s9 + $0x88] sm:$0xff] }
 0x1b7   : > { %1620 = vmatmul.f32.vlgmr.msra.gmra.mxu1 %v2633_v25 }
 0x1b8   : > { %v1274_v33 = vpop.f32.mrf.mxu2  ;;  %v1327_v62 = vpop.f32.mrf.mxu3 }
 0x1b9   : > { %v4120_v54 = vadd.f32 %v1327_v62, %v1274_v33  ;;  %v4122_v11 = vpop.f32.mrf.mxu0 }
 0x1bc   : > { %v4124_v20 = vpop.f32.mrf.mxu1  ;;  %1570 = vmatmul.f32.gmra.mxu0 %v2634_v41 }
 0x1bd   : > { %4641 = vst [vmem:[#allocation11_spill] sm:$0xff] %v4124_v20  ;;  %1676 = vmatmul.f32.gmra.mxu2 %v3569_v63  ;;  %2475 = vmatmul.msk.f32.gmra.mxu3 %vm666_vm0, %v3584_v5  ;;  %v2636_v20 = vld [vmem:[%s2987_s9 + $0xd0] sm:$0xff]  ;;  %v2637_v63 = vld [vmem:[%s2987_s9 + $0xd8] sm:$0xff] }
 0x1bf   : > { %1623 = vmatmul.f32.gmra.mxu1 %v2635_v43 }
 0x1c0   : > { %v1277_v48 = vpop.f32.mrf.mxu2  ;;  %v1330_v28 = vpop.f32.mrf.mxu3 }
 0x1c1   : > { %v4131_v25 = vadd.f32 %v1330_v28, %v1277_v48  ;;  %v4133_v33 = vpop.f32.mrf.mxu0 }
 0x1c2   : > { %4642 = vst [vmem:[#allocation12_spill] sm:$0xff] %v4133_v33 }
 0x1c4   : > { %v4135_v62 = vpop.f32.mrf.mxu1  ;;  %1573 = vmatmul.f32.gmra.mxu0 %v2636_v20 }
 0x1c5   : > { %4643 = vst [vmem:[#allocation13_spill] sm:$0xff] %v4135_v62  ;;  %1679 = vmatmul.f32.gmra.mxu2 %v3597_v17  ;;  %2476 = vmatmul.msk.f32.gmra.mxu3 %vm666_vm0, %v3612_v24  ;;  %v2638_v62 = vld [vmem:[%s2987_s9 + $0x120] sm:$0xff]  ;;  %v2639_v17 = vld [vmem:[%s2987_s9 + $0x128] sm:$0xff] }
 0x1c7   : > { %1626 = vmatmul.f32.gmra.mxu1 %v2637_v63 }
 0x1c8   : > { %v1280_v5 = vpop.f32.mrf.mxu2  ;;  %v1333_v41 = vpop.f32.mrf.mxu3 }
 0x1c9   : > { %v4142_v43 = vadd.f32 %v1333_v41, %v1280_v5  ;;  %v4144_v48 = vpop.f32.mrf.mxu0 }
 0x1ca   : > { %4644 = vst [vmem:[#allocation14_spill] sm:$0xff] %v4144_v48 }
 0x1cc   : > { %v4146_v28 = vpop.f32.mrf.mxu1  ;;  %1576 = vmatmul.f32.gmra.mxu0 %v2638_v62 }
 0x1cd   : > { %4645 = vst [vmem:[#allocation15_spill] sm:$0xff] %v4146_v28  ;;  %1682 = vmatmul.f32.gmra.mxu2 %v3628_v38  ;;  %2477 = vmatmul.msk.f32.gmra.mxu3 %vm666_vm0, %v3640_v46  ;;  %v2640_v28 = vld [vmem:[%s2987_s9 + $0x170] sm:$0xff]  ;;  %v2641_v38 = vld [vmem:[%s2987_s9 + $0x178] sm:$0xff] }
 0x1cf   : > { %1629 = vmatmul.f32.gmra.mxu1 %v2639_v17 }
 0x1d0   : > { %v1283_v24 = vpop.f32.mrf.mxu2  ;;  %v1336_v20 = vpop.f32.mrf.mxu3 }
 0x1d1   : > { %v4153_v63 = vadd.f32 %v1336_v20, %v1283_v24  ;;  %v1356_v5 = vpop.f32.mrf.mxu0 }
 0x1d2   : > { %v1357_v41 = vadd.f32 %v1356_v5, %v3994_v39 }
 0x1d4   : > { %v1409_v48 = vpop.f32.mrf.mxu1  ;;  %1579 = vmatmul.f32.gmra.mxu0 %v2640_v28  ;;  %v2642_v28 = vld [vmem:[%s2987_s9 + $0x1c0] sm:$0xff] }
 0x1d5   : > { %v1410_v62 = vadd.f32 %v1409_v48, %v1357_v41  ;;  %1685 = vmatmul.f32.gmra.mxu2 %v3656_v59  ;;  %2478 = vmatmul.msk.f32.gmra.mxu3 %vm666_vm0, %v3672_v6  ;;  %v2643_v59 = vld [vmem:[%s2987_s9 + $0x1c8] sm:$0xff] }
 0x1d7   : > { %1632 = vmatmul.f32.gmra.mxu1 %v2641_v38 }
 0x1d8   : > { %v1462_v46 = vpop.f32.mrf.mxu2  ;;  %v1515_v17 = vpop.f32.mrf.mxu3 }
 0x1d9   : > { %v1463_v24 = vadd.f32 %v1462_v46, %v1410_v62  ;;  %v1359_v20 = vpop.f32.mrf.mxu0 }
 0x1da   : > { %v1360_v33 = vadd.f32 %v1359_v20, %v4016_v51 }
 0x1db   : > { %v4162_v39 = vadd.f32 %v1515_v17, %v1463_v24  ;;  %v2644_v24 = vld [vmem:[%s2987_s9 + $0x210] sm:$0xff] }
 0x1dc   : > { %v1412_v5 = vpop.f32.mrf.mxu1  ;;  %1582 = vmatmul.f32.gmra.mxu0 %v2642_v28 }
 0x1dd   : > { %v1413_v48 = vadd.f32 %v1412_v5, %v1360_v33  ;;  %1688 = vmatmul.f32.gmra.mxu2 %v3685_v15  ;;  %2479 = vmatmul.msk.f32.gmra.mxu3 %vm666_vm0, %v3701_v27  ;;  %v2645_v15 = vld [vmem:[%s2987_s9 + $0x218] sm:$0xff] }
 0x1df   : > { %1635 = vmatmul.f32.gmra.mxu1 %v2643_v59 }
 0x1e0   : > { %v1465_v6 = vpop.f32.mrf.mxu2  ;;  %v1518_v41 = vpop.f32.mrf.mxu3 }
 0x1e1   : > { %v1466_v62 = vadd.f32 %v1465_v6, %v1413_v48  ;;  %v1362_v38 = vpop.f32.mrf.mxu0  ;;  %v2646_v6 = vld [vmem:[%s2987_s9 + $0x260] sm:$0xff] }
 0x1e2   : > { %v1363_v51 = vadd.f32 %v1362_v38, %v4041_v35 }
 0x1e3   : > { %v4170_v46 = vadd.f32 %v1518_v41, %v1466_v62 }
 0x1e4   : > { %v1415_v17 = vpop.f32.mrf.mxu1  ;;  %1585 = vmatmul.f32.gmra.mxu0 %v2644_v24 }
 0x1e5   : > { %v1416_v33 = vadd.f32 %v1415_v17, %v1363_v51  ;;  %1691 = vmatmul.f32.gmra.mxu2 %v3717_v42  ;;  %2480 = vmatmul.msk.f32.gmra.mxu3 %vm666_vm0, %v3730_v52  ;;  %v2647_v42 = vld [vmem:[%s2987_s9 + $0x268] sm:$0xff] }
 0x1e7   : > { %1638 = vmatmul.f32.gmra.mxu1 %v2645_v15 }
 0x1e8   : > { %v1468_v27 = vpop.f32.mrf.mxu2  ;;  %v1521_v20 = vpop.f32.mrf.mxu3 }
 0x1e9   : > { %v1469_v5 = vadd.f32 %v1468_v27, %v1416_v33  ;;  %v1365_v28 = vpop.f32.mrf.mxu0  ;;  %v2648_v33 = vld [vmem:[%s2987_s9 + $0x2b0] sm:$0xff] }
 0x1ea   : > { %v1366_v35 = vadd.f32 %v1365_v28, %v4063_v44 }
 0x1eb   : > { %v4178_v48 = vadd.f32 %v1521_v20, %v1469_v5 }
 0x1ec   : > { %v1418_v59 = vpop.f32.mrf.mxu1  ;;  %1588 = vmatmul.f32.gmra.mxu0 %v2646_v6 }
 0x1ed   : > { %v1419_v41 = vadd.f32 %v1418_v59, %v1366_v35  ;;  %1694 = vmatmul.f32.gmra.mxu2 %v3746_v55  ;;  %2481 = vmatmul.msk.f32.gmra.mxu3 %vm666_vm0, %v3762_v14  ;;  %v2649_v55 = vld [vmem:[%s2987_s9 + $0x2b8] sm:$0xff]  ;;  %v2650_v59 = vld [vmem:[%s2987_s9 + $0x300] sm:$0xff] }
 0x1ef   : > { %1641 = vmatmul.f32.gmra.mxu1 %v2647_v42 }
 0x1f0   : > { %v1471_v52 = vpop.f32.mrf.mxu2  ;;  %v1524_v62 = vpop.f32.mrf.mxu3 }
 0x1f1   : > { %v1472_v38 = vadd.f32 %v1471_v52, %v1419_v41  ;;  %v1368_v51 = vpop.f32.mrf.mxu0 }
 0x1f2   : > { %v1369_v44 = vadd.f32 %v1368_v51, %v4079_v4  ;;  %v2652_v51 = vld [vmem:[%s2987_s9 + $0x350] sm:$0xff] }
 0x1f3   : > { %v4186_v17 = vadd.f32 %v1524_v62, %v1472_v38 }
 0x1f4   : > { %v1421_v24 = vpop.f32.mrf.mxu1  ;;  %1591 = vmatmul.f32.gmra.mxu0 %v2648_v33 }
 0x1f5   : > { %v1422_v15 = vadd.f32 %v1421_v24, %v1369_v44  ;;  %1697 = vmatmul.f32.gmra.mxu2 %v3775_v31  ;;  %2482 = vmatmul.msk.f32.gmra.mxu3 %vm666_vm0, %v3791_v47  ;;  %v2651_v31 = vld [vmem:[%s2987_s9 + $0x308] sm:$0xff] }
 0x1f7   : > { %1644 = vmatmul.f32.gmra.mxu1 %v2649_v55 }
 0x1f8   : > { %v1474_v14 = vpop.f32.mrf.mxu2  ;;  %v1527_v27 = vpop.f32.mrf.mxu3 }
 0x1f9   : > { %v1475_v20 = vadd.f32 %v1474_v14, %v1422_v15  ;;  %v1371_v5 = vpop.f32.mrf.mxu0 }
 0x1fa   : > { %v1372_v4 = vadd.f32 %v1371_v5, %v4089_v0 }
 0x1fb   : > { %v4194_v28 = vadd.f32 %v1527_v27, %v1475_v20  ;;  %v2654_v27 = vld [vmem:[%s2987_s9 + $0x3a0] sm:$0xff] }
 0x1fc   : > { %v1424_v35 = vpop.f32.mrf.mxu1  ;;  %1594 = vmatmul.f32.gmra.mxu0 %v2650_v59 }
 0x1fd   : > { %v1425_v6 = vadd.f32 %v1424_v35, %v1372_v4  ;;  %1700 = vmatmul.f32.gmra.mxu2 %v3807_v1  ;;  %2483 = vmatmul.msk.f32.gmra.mxu3 %vm666_vm0, %v3820_v12  ;;  %v2653_v1 = vld [vmem:[%s2987_s9 + $0x358] sm:$0xff] }
 0x1ff   : > { %1647 = vmatmul.f32.gmra.mxu1 %v2651_v31 }
 0x200   : > { %v1477_v47 = vpop.f32.mrf.mxu2  ;;  %v1530_v41 = vpop.f32.mrf.mxu3 }
 0x201   : > { %v1478_v42 = vadd.f32 %v1477_v47, %v1425_v6  ;;  %v1374_v52 = vpop.f32.mrf.mxu0 }
 0x202   : > { %v1375_v0 = vadd.f32 %v1374_v52, %v4099_v57 }
 0x203   : > { %v4202_v62 = vadd.f32 %v1530_v41, %v1478_v42 }
 0x204   : > { %v1427_v38 = vpop.f32.mrf.mxu1  ;;  %1597 = vmatmul.f32.gmra.mxu0 %v2652_v51 }
 0x205   : > { %v1428_v44 = vadd.f32 %v1427_v38, %v1375_v0  ;;  %1703 = vmatmul.f32.gmra.mxu2 %v3833_v29  ;;  %2484 = vmatmul.msk.f32.gmra.mxu3 %vm666_vm0, %v3846_v37  ;;  %v2655_v29 = vld [vmem:[%s2987_s9 + $0x3a8] sm:$0xff]  ;;  %s2460_s9 = sshll.u32 %s4662_s28, 3 }
 0x206   : > { %s4441_s5 = scalar_lea.vmem %s4629_s2, %s2460_s9  ;;  %s4451_s22 = scalar_lea.vmem %s4630_s3, %s2460_s9 }
 0x207   : > { %1650 = vmatmul.f32.gmra.mxu1 %v2653_v1  ;;  %s2672_s9 = scalar_lea.hbm %s2671_s12, 192 }
 0x208   : > { %v1480_v12 = vpop.f32.mrf.mxu2  ;;  %v1533_v24 = vpop.f32.mrf.mxu3  ;;  %p2673_p11 = scmp.ne.s32.totalorder %s2671_s12, %s2672_s9 }
 0x209   : > { %v1481_v33 = vadd.f32 %v1480_v12, %v1428_v44  ;;  %v1377_v15 = vpop.f32.mrf.mxu0 }
 0x20a   : > { %v1378_v57 = vadd.f32 %v1377_v15, %v4109_v22  ;;  %p2674_p12 = pnand %p2673_p11, %p2786_p5 }
 0x20b   : > { %v4210_v55 = vadd.f32 %v1533_v24, %v1481_v33 }
 0x20c   : > { %v1430_v14 = vpop.f32.mrf.mxu1  ;;  %1600 = vmatmul.f32.gmra.mxu0 %v2654_v27  ;;  %p2675_p13 = pneg %p2674_p12 }
 0x20d   : > { %v1431_v20 = vadd.f32 %v1430_v14, %v1378_v57  ;;  %1706 = vmatmul.f32.gmra.mxu2 %v3862_v58  ;;  %2485 = vmatmul.msk.f32.gmra.mxu3 %vm666_vm0, %v3875_v13 }
 0x20f   : > { %1653 = vmatmul.f32.gmra.mxu1 %v2655_v29 }
 0x210   : > { %v1483_v37 = vpop.f32.mrf.mxu2  ;;  %v1536_v5 = vpop.f32.mrf.mxu3 }
 0x211   : > { %v1484_v4 = vadd.f32 %v1483_v37, %v1431_v20  ;;  %v1380_v35 = vpop.f32.mrf.mxu0 }
 0x212   : > { %v1381_v59 = vadd.f32 %v1380_v35, %v4120_v54 }
 0x213   : > { %v4218_v22 = vadd.f32 %v1536_v5, %v1484_v4 }
 0x214   : > { %v1433_v6 = vpop.f32.mrf.mxu1 }
 0x215   : > { %v1434_v31 = vadd.f32 %v1433_v6, %v1381_v59 }
 0x218   : > { %v1486_v47 = vpop.f32.mrf.mxu2  ;;  %v1539_v41 = vpop.f32.mrf.mxu3 }
 0x219   : > { %v1487_v42 = vadd.f32 %v1486_v47, %v1434_v31  ;;  %v1383_v52 = vpop.f32.mrf.mxu0 }
 0x21a   : > { %v1384_v58 = vadd.f32 %v1383_v52, %v4131_v25 }
 0x21b   : > { %v4221_v0 = vadd.f32 %v1539_v41, %v1487_v42  ;;  %v1145_v42 = vadd.f32 %v3969_v50, %v3687_v16 }
 0x21c   : > { %v1436_v13 = vpop.f32.mrf.mxu1 }
 0x21d   : > { %v1437_v38 = vadd.f32 %v1436_v13, %v1384_v58 }
 0x220   : > { %v1489_v51 = vpop.f32.mrf.mxu2  ;;  %v1542_v44 = vpop.f32.mrf.mxu3 }
 0x221   : > { %v1490_v1 = vadd.f32 %v1489_v51, %v1437_v38  ;;  %v1386_v12 = vpop.f32.mrf.mxu0 }
 0x222   : > { %v1387_v54 = vadd.f32 %v1386_v12, %v4142_v43  ;;  %v1148_v12 = vadd.f32 %v3996_v21, %v3719_v45 }
 0x223   : > { %v4224_v24 = vadd.f32 %v1542_v44, %v1490_v1  ;;  %v4238_v44 = vadd.f32 %v3979_v23, %v1145_v42 }
 0x224   : > { %v1439_v33 = vpop.f32.mrf.mxu1  ;;  %v4248_v23 = vadd.f32 %v4004_v18, %v1148_v12 }
 0x225   : > { %v1440_v15 = vadd.f32 %v1439_v33, %v1387_v54 }
 0x226   : > { %v1814_v18 = vmul.f32 %v4248_v23, %v4248_v23 }
 0x228   : > { %v1492_v57 = vpop.f32.mrf.mxu2  ;;  %v1545_v14 = vpop.f32.mrf.mxu3 }
 0x229   : > { %v1493_v27 = vadd.f32 %v1492_v57, %v1440_v15  ;;  %v1389_v20 = vpop.f32.mrf.mxu0 }
 0x22a   : > { %v1390_v25 = vadd.f32 %v1389_v20, %v4153_v63  ;;  %v1812_v20 = vmul.f32 %v4238_v44, %v4238_v44 }
 0x22b   : > { %v4227_v29 = vadd.f32 %v1545_v14, %v1493_v27 }
 0x22c   : > { %v1442_v37 = vpop.f32.mrf.mxu1 }
 0x22d   : > { %v1443_v5 = vadd.f32 %v1442_v37, %v1390_v25  ;;  %v1151_v37 = vadd.f32 %v4018_v53, %v3748_v7 }
 0x230   : > { %v1495_v4 = vpop.f32.mrf.mxu2  ;;  %v1548_v35 = vpop.f32.mrf.mxu3 }
 0x231   : > { %v1496_v59 = vadd.f32 %v1495_v4, %v1443_v5  ;;  %v1568_v6 = vpop.f32.mrf.mxu0 }
 0x232   : > { %v1569_v43 = vadd.f32 %v1568_v6, %v4162_v39 }
 0x233   : > { %v4229_v31 = vadd.f32 %v1548_v35, %v1496_v59 }
 0x234   : > { %v1621_v47 = vpop.f32.mrf.mxu1 }
 0x235   : > { %v1622_v41 = vadd.f32 %v1621_v47, %v1569_v43 }
 0x238   : > { %v1674_v52 = vpop.f32.mrf.mxu2  ;;  %v1727_v58 = vpop.f32.mrf.mxu3 }
 0x239   : > { %v1675_v63 = vadd.f32 %v1674_v52, %v1622_v41  ;;  %v1571_v13 = vpop.f32.mrf.mxu0  ;;  %v4264_v41 = vadd.f32 %v4026_v40, %v1151_v37 }
 0x23a   : > { %v1572_v38 = vadd.f32 %v1571_v13, %v4170_v46  ;;  %v1154_v13 = vadd.f32 %v4043_v36, %v3777_v32 }
 0x23b   : > { %v4235_v51 = vadd.f32 %v1727_v58, %v1675_v63 }
 0x23c   : > { %v1624_v1 = vpop.f32.mrf.mxu1 }
 0x23d   : > { %v1764_v39 = vsel %vm1763_vm1, %v4235_v51, 0.0  ;;  %v1625_v50 = vadd.f32 %v1624_v1, %v1572_v38  ;;  %v1813_v54 = vmul.f32 %v4235_v51, %v4235_v51 }
 0x23e   : > { %v1765_v16 = vadd.f32 %v1764_v39, %v4238_v44 }
 0x23f   : > { %v1836_v45 = vsel %vm1763_vm1, %v1813_v54, 0.0 }
 0x240   : > { %v1677_v33 = vpop.f32.mrf.mxu2  ;;  %1766 = vadd.xlane.f32.xlu0 %v1765_v16  ;;  %v1730_v46 = vpop.f32.mrf.mxu3  ;;  %v1837_v5 = vadd.f32 %v1836_v45, %v1812_v20  ;;  %v1157_v45 = vadd.f32 %v4065_v19, %v3809_v2 }
 0x241   : > { %v1678_v15 = vadd.f32 %v1677_v33, %v1625_v50  ;;  %v1574_v57 = vpop.f32.mrf.mxu0 }
 0x242   : > { %v1575_v14 = vadd.f32 %v1574_v57, %v4178_v48 }
 0x243   : > { %v4251_v27 = vadd.f32 %v1730_v46, %v1678_v15  ;;  %v4283_v46 = vadd.f32 %v4051_v49, %v1154_v13 }
 0x244   : > { %v1627_v21 = vpop.f32.mrf.mxu1 }
 0x245   : > { %v1815_v25 = vmul.f32 %v4251_v27, %v4251_v27  ;;  %v1628_v4 = vadd.f32 %v1627_v21, %v1575_v14  ;;  %v1768_v53 = vsel %vm1763_vm1, %v4251_v27, 0.0  ;;  %v1818_v49 = vmul.f32 %v4283_v46, %v4283_v46 }
 0x246   : > { %v1769_v40 = vadd.f32 %v1768_v53, %v4248_v23 }
 0x247   : > { %v1840_v48 = vsel %vm1763_vm1, %v1815_v25, 0.0 }
 0x248   : > { %v1680_v35 = vpop.f32.mrf.mxu2  ;;  %1838 = vadd.xlane.f32.xlu0 %v1837_v5  ;;  %v1733_v59 = vpop.f32.mrf.mxu3  ;;  %v1841_v6 = vadd.f32 %v1840_v48, %v1814_v18  ;;  %v4299_v48 = vadd.f32 %v4073_v34, %v1157_v45 }
 0x249   : > { %v1681_v43 = vadd.f32 %v1680_v35, %v1628_v4  ;;  %v1577_v47 = vpop.f32.mrf.mxu0 }
 0x24a   : > { %1842 = vadd.xlane.f32.xlu1 %v1841_v6  ;;  %v1578_v42 = vadd.f32 %v1577_v47, %v4186_v17  ;;  %v1816_v17 = vmul.f32 %v4264_v41, %v4264_v41  ;;  %v1820_v47 = vmul.f32 %v4299_v48, %v4299_v48 }
 0x24b   : > { %v4267_v7 = vadd.f32 %v1733_v59, %v1681_v43 }
 0x24c   : > { %v1630_v52 = vpop.f32.mrf.mxu1 }
 0x24d   : > { %v1817_v58 = vmul.f32 %v4267_v7, %v4267_v7  ;;  %v1772_v63 = vsel %vm1763_vm1, %v4267_v7, 0.0  ;;  %v1631_v38 = vadd.f32 %v1630_v52, %v1578_v42 }
 0x24e   : > { %v1773_v50 = vadd.f32 %v1772_v63, %v4264_v41 }
 0x24f   : > { %v1844_v1 = vsel %vm1763_vm1, %v1817_v58, 0.0 }
 0x250   : > { %v1683_v39 = vpop.f32.mrf.mxu2  ;;  %1770 = vadd.xlane.f32.xlu0 %v1769_v40  ;;  %v1736_v12 = vpop.f32.mrf.mxu3  ;;  %v1845_v16 = vadd.f32 %v1844_v1, %v1816_v17 }
 0x251   : > { %v1684_v54 = vadd.f32 %v1683_v39, %v1631_v38  ;;  %v1580_v33 = vpop.f32.mrf.mxu0 }
 0x252   : > { %1846 = vadd.xlane.f32.xlu2 %v1845_v16  ;;  %1774 = vadd.xlane.f32.xlu1 %v1773_v50  ;;  %v1581_v32 = vadd.f32 %v1580_v33, %v4194_v28  ;;  %v1163_v16 = vadd.f32 %v4091_v56, %v3864_v61 }
 0x253   : > { %v4286_v36 = vadd.f32 %v1736_v12, %v1684_v54 }
 0x254   : > { %v1633_v15 = vpop.f32.mrf.mxu1 }
 0x255   : > { %v1776_v57 = vsel %vm1763_vm1, %v4286_v36, 0.0  ;;  %v1819_v14 = vmul.f32 %v4286_v36, %v4286_v36  ;;  %v1634_v21 = vadd.f32 %v1633_v15, %v1581_v32 }
 0x256   : > { %v1777_v37 = vadd.f32 %v1776_v57, %v4283_v46  ;;  %v4332_v57 = vadd.f32 %v4093_v3, %v1163_v16 }
 0x257   : > { %v1848_v20 = vsel %vm1763_vm1, %v1819_v14, 0.0 }
 0x258   : > { %v1686_v25 = vpop.f32.mrf.mxu2  ;;  %v1739_v28 = vpop.f32.mrf.mxu3  ;;  %v1849_v5 = vadd.f32 %v1848_v20, %v1818_v49  ;;  %v1166_v20 = vadd.f32 %v4101_v60, %v3887_v30 }
 0x259   : > { %v1687_v18 = vadd.f32 %v1686_v25, %v1634_v21  ;;  %v1583_v4 = vpop.f32.mrf.mxu0 }
 0x25a   : > { %1778 = vadd.xlane.f32.xlu1 %v1777_v37  ;;  %1850 = vadd.xlane.f32.xlu0 %v1849_v5  ;;  %v1584_v2 = vadd.f32 %v1583_v4, %v4202_v62  ;;  %v1160_v62 = vadd.f32 %v4081_v8, %v3835_v9 }
 0x25b   : > { %v4302_v19 = vadd.f32 %v1739_v28, %v1687_v18 }
 0x25c   : > { %v1636_v35 = vpop.f32.mrf.mxu1  ;;  %v4318_v38 = vadd.f32 %v4083_v10, %v1160_v62 }
 0x25d   : > { %v1780_v59 = vsel %vm1763_vm1, %v4302_v19, 0.0  ;;  %v1821_v6 = vmul.f32 %v4302_v19, %v4302_v19  ;;  %v1637_v34 = vadd.f32 %v1636_v35, %v1584_v2  ;;  %v4646_v2 = vld [vmem:[#allocation9_spill] sm:$0xff] }
 0x25e   : > { %v1781_v43 = vadd.f32 %v1780_v59, %v4299_v48  ;;  %v1822_v45 = vmul.f32 %v4318_v38, %v4318_v38  ;;  %v4348_v35 = vadd.f32 %v4646_v2, %v1166_v20 }
 0x25f   : > { %v1852_v42 = vsel %vm1763_vm1, %v1821_v6, 0.0  ;;  %v1824_v6 = vmul.f32 %v4332_v57, %v4332_v57 }
 0x260   : > { %v1689_v53 = vpop.f32.mrf.mxu2  ;;  %1782 = vadd.xlane.f32.xlu2 %v1781_v43  ;;  %v1742_v52 = vpop.f32.mrf.mxu3  ;;  %v1853_v58 = vadd.f32 %v1852_v42, %v1820_v47 }
 0x261   : > { %v1690_v63 = vadd.f32 %v1689_v53, %v1637_v34  ;;  %v1586_v13 = vpop.f32.mrf.mxu0  ;;  %v4647_v34 = vld [vmem:[#allocation5_spill] sm:$0xff] }
 0x262   : > { %1854 = vadd.xlane.f32.xlu1 %v1853_v58  ;;  %v1587_v40 = vadd.f32 %v1586_v13, %v4210_v55  ;;  %v1169_v42 = vadd.f32 %v4111_v26, %v4647_v34 }
 0x263   : > { %v4315_v17 = vadd.f32 %v1742_v52, %v1690_v63 }
 0x264   : > { %v1639_v1 = vpop.f32.mrf.mxu1 }
 0x265   : > { %v1784_v39 = vsel %vm1763_vm1, %v4315_v17, 0.0  ;;  %v1640_v8 = vadd.f32 %v1639_v1, %v1587_v40  ;;  %v1823_v12 = vmul.f32 %v4315_v17, %v4315_v17  ;;  %v4648_v1 = vld [vmem:[#allocation10_spill] sm:$0xff] }
 0x266   : > { %v1785_v9 = vadd.f32 %v1784_v39, %v4318_v38  ;;  %v4364_v39 = vadd.f32 %v4648_v1, %v1169_v42  ;;  %v4655_v1 = vld [vmem:[#allocation14_spill] sm:$0xff] }
 0x267   : > { %v1856_v15 = vsel %vm1763_vm1, %v1823_v12, 0.0 }
 0x268   : > { %v1692_v50 = vpop.f32.mrf.mxu2  ;;  %1786 = vadd.xlane.f32.xlu2 %v1785_v9  ;;  %v1745_v55 = vpop.f32.mrf.mxu3  ;;  %v1857_v56 = vadd.f32 %v1856_v15, %v1822_v45  ;;  %v1828_v20 = vmul.f32 %v4364_v39, %v4364_v39 }
 0x269   : > { %v1693_v54 = vadd.f32 %v1692_v50, %v1640_v8  ;;  %v1589_v33 = vpop.f32.mrf.mxu0  ;;  %v1826_v8 = vmul.f32 %v4348_v35, %v4348_v35 }
 0x26a   : > { %v1590_v10 = vadd.f32 %v1589_v33, %v4218_v22 }
 0x26b   : > { %v4328_v32 = vadd.f32 %v1745_v55, %v1693_v54  ;;  %v4649_v55 = vld [vmem:[#allocation6_spill] sm:$0xff] }
 0x26c   : > { %v1642_v14 = vpop.f32.mrf.mxu1  ;;  %v1172_v54 = vadd.f32 %v4122_v11, %v4649_v55 }
 0x26d   : > { %v1788_v61 = vsel %vm1763_vm1, %v4328_v32, 0.0  ;;  %v1643_v21 = vadd.f32 %v1642_v14, %v1590_v10  ;;  %v1825_v22 = vmul.f32 %v4328_v32, %v4328_v32 }
 0x26e   : > { %v1789_v49 = vadd.f32 %v1788_v61, %v4332_v57 }
 0x26f   : > { %v1860_v4 = vsel %vm1763_vm1, %v1825_v22, 0.0 }
 0x270   : > { %v1695_v25 = vpop.f32.mrf.mxu2  ;;  %1858 = vadd.xlane.f32.xlu2 %v1857_v56  ;;  %1790 = vadd.xlane.f32.xlu0 %v1789_v49  ;;  %v1748_v3 = vpop.f32.mrf.mxu3  ;;  %v1861_v43 = vadd.f32 %v1860_v4, %v1824_v6  ;;  %v4650_v49 = vld [vmem:[#allocation11_spill] sm:$0xff] }
 0x271   : > { %v1696_v28 = vadd.f32 %v1695_v25, %v1643_v21  ;;  %v1592_v37 = vpop.f32.mrf.mxu0  ;;  %v4380_v21 = vadd.f32 %v4650_v49, %v1172_v54 }
 0x272   : > { %v1593_v5 = vadd.f32 %v1592_v37, %v4221_v0  ;;  %v4651_v37 = vld [vmem:[#allocation7_spill] sm:$0xff] }
 0x273   : > { %v4344_v18 = vadd.f32 %v1748_v3, %v1696_v28 }
 0x274   : > { %v1645_v59 = vpop.f32.mrf.mxu1 }
 0x275   : > { %v1792_v30 = vsel %vm1763_vm1, %v4344_v18, 0.0  ;;  %v1646_v47 = vadd.f32 %v1645_v59, %v1593_v5  ;;  %v1827_v0 = vmul.f32 %v4344_v18, %v4344_v18  ;;  %v4652_v5 = vld [vmem:[#allocation12_spill] sm:$0xff] }
 0x276   : > { %v1793_v60 = vadd.f32 %v1792_v30, %v4348_v35  ;;  %v1175_v4 = vadd.f32 %v4652_v5, %v4651_v37 }
 0x277   : > { %v1864_v40 = vsel %vm1763_vm1, %v1827_v0, 0.0  ;;  %v4653_v0 = vld [vmem:[#allocation13_spill] sm:$0xff] }
 0x278   : > { %v1698_v62 = vpop.f32.mrf.mxu2  ;;  %1794 = vadd.xlane.f32.xlu1 %v1793_v60  ;;  %1862 = vadd.xlane.f32.xlu0 %v1861_v43  ;;  %v1751_v53 = vpop.f32.mrf.mxu3  ;;  %v1865_v16 = vadd.f32 %v1864_v40, %v1826_v8  ;;  %v4396_v34 = vadd.f32 %v4653_v0, %v1175_v4  ;;  %v4654_v40 = vld [vmem:[#allocation8_spill] sm:$0xff] }
 0x279   : > { %v1699_v52 = vadd.f32 %v1698_v62, %v1646_v47  ;;  %v1595_v58 = vpop.f32.mrf.mxu0  ;;  %v1830_v62 = vmul.f32 %v4380_v21, %v4380_v21 }
 0x27a   : > { %v1596_v63 = vadd.f32 %v1595_v58, %v4224_v24  ;;  %v1832_v54 = vmul.f32 %v4396_v34, %v4396_v34 }
 0x27b   : > { %v4360_v13 = vadd.f32 %v1751_v53, %v1699_v52 }
 0x27c   : > { %v1648_v9 = vpop.f32.mrf.mxu1 }
 0x27d   : > { %v1796_v26 = vsel %vm1763_vm1, %v4360_v13, 0.0  ;;  %v1649_v50 = vadd.f32 %v1648_v9, %v1596_v63  ;;  %v1829_v24 = vmul.f32 %v4360_v13, %v4360_v13  ;;  %v1178_v9 = vadd.f32 %v4655_v1, %v4654_v40 }
 0x27e   : > { %v1797_v12 = vadd.f32 %v1796_v26, %v4364_v39 }
 0x27f   : > { %v1868_v56 = vsel %vm1763_vm1, %v1829_v24, 0.0  ;;  %v4656_v24 = vld [vmem:[#allocation15_spill] sm:$0xff] }
 0x280   : > { %v1701_v33 = vpop.f32.mrf.mxu2  ;;  %1798 = vadd.xlane.f32.xlu2 %v1797_v12  ;;  %1866 = vadd.xlane.f32.xlu1 %v1865_v16  ;;  %v1754_v10 = vpop.f32.mrf.mxu3  ;;  %v1869_v25 = vadd.f32 %v1868_v56, %v1828_v20  ;;  %v4411_v55 = vadd.f32 %v4656_v24, %v1178_v9 }
 0x281   : > { %v1702_v15 = vadd.f32 %v1701_v33, %v1649_v50  ;;  %v1598_v14 = vpop.f32.mrf.mxu0 }
 0x282   : > { %v1599_v45 = vadd.f32 %v1598_v14, %v4227_v29  ;;  %v1834_v56 = vmul.f32 %v4411_v55, %v4411_v55 }
 0x283   : > { %v4376_v61 = vadd.f32 %v1754_v10, %v1702_v15 }
 0x284   : > { %v1651_v22 = vpop.f32.mrf.mxu1 }
 0x285   : > { %v1800_v11 = vsel %vm1763_vm1, %v4376_v61, 0.0  ;;  %v1652_v28 = vadd.f32 %v1651_v22, %v1599_v45  ;;  %v1831_v29 = vmul.f32 %v4376_v61, %v4376_v61 }
 0x286   : > { %v1801_v3 = vadd.f32 %v1800_v11, %v4380_v21  ;;  %v2720_v11 = vmov 0  }
 0x287   : > { %v1872_v47 = vsel %vm1763_vm1, %v1831_v29, 0.0  ;;  %2537 = vset.pattern.permute.xlu0 %v2720_v11  ;;  %2538 = vset.pattern.permute.xlu1 %v2720_v11 }
 0x288   : > { %v1704_v2 = vpop.f32.mrf.mxu2  ;;  %1870 = vadd.xlane.f32.xlu2 %v1869_v25  ;;  %1802 = vadd.xlane.f32.xlu0 %v1801_v3  ;;  %v1757_v59 = vpop.f32.mrf.mxu3  ;;  %v1873_v58 = vadd.f32 %v1872_v47, %v1830_v62 }
 0x289   : > { %v1705_v6 = vadd.f32 %v1704_v2, %v1652_v28  ;;  %v1601_v30 = vpop.f32.mrf.mxu0  ;;  %2539 = vset.pattern.permute.xlu2 %v2720_v11 }
 0x28a   : > { %v1602_v60 = vadd.f32 %v1601_v30, %v4229_v31 }
 0x28b   : > { %v4392_v43 = vadd.f32 %v1757_v59, %v1705_v6 }
 0x28c   : > { %v1654_v42 = vpop.f32.mrf.mxu1 }
 0x28d   : > { %v1804_v53 = vsel %vm1763_vm1, %v4392_v43, 0.0  ;;  %v1655_v63 = vadd.f32 %v1654_v42, %v1602_v60  ;;  %v1833_v31 = vmul.f32 %v4392_v43, %v4392_v43 }
 0x28e   : > { %v1805_v52 = vadd.f32 %v1804_v53, %v4396_v34 }
 0x28f   : > { %v1876_v50 = vsel %vm1763_vm1, %v1833_v31, 0.0 }
 0x290   : > { %v1707_v8 = vpop.f32.mrf.mxu2  ;;  %1806 = vadd.xlane.f32.xlu1 %v1805_v52  ;;  %1874 = vadd.xlane.f32.xlu0 %v1873_v58  ;;  %v1760_v26 = vpop.f32.mrf.mxu3  ;;  %v1877_v10 = vadd.f32 %v1876_v50, %v1832_v54 }
 0x291   : > { %v1708_v12 = vadd.f32 %v1707_v8, %v1655_v63 }
 0x293   : > { %v4407_v16 = vadd.f32 %v1760_v26, %v1708_v12 }
 0x295   : > { %v1808_v33 = vsel %vm1763_vm1, %v4407_v16, 0.0  ;;  %v1835_v14 = vmul.f32 %v4407_v16, %v4407_v16 }
 0x296   : > { %v1809_v15 = vadd.f32 %v1808_v33, %v4411_v55 }
 0x297   : > { %v1880_v45 = vsel %vm1763_vm1, %v1835_v14, 0.0 }
 0x298   : > { %1878 = vadd.xlane.f32.xlu1 %v1877_v10  ;;  %1810 = vadd.xlane.f32.xlu2 %v1809_v15  ;;  %v1881_v49 = vadd.f32 %v1880_v45, %v1834_v56  ;;  %v2076_v56 = vld [vmem:[%s4441_s5] sm:$0xff] }
 0x2a0   : > { %1882 = vadd.xlane.f32.xlu2 %v1881_v49 }
 0x2b3   : > { %v1767_v22 = vpop.xlane.xlu0 %1766 }
 0x2b4   : > { %v4423_v20 = vmul.f32 0.0051020407, %v1767_v22 }
 0x2b6   : > { %v1908_v3 = vmul.f32 %v4423_v20, %v4423_v20 }
 0x2bb   : > { %v1839_v25 = vpop.xlane.xlu0 %1838 }
 0x2bc   : > { %v1896_v28 = vmul.f32 0.0051020407, %v1839_v25 }
 0x2bd   : > { %v1843_v29 = vpop.xlane.xlu1 %1842 }
 0x2be   : > { %v1920_v37 = vsub.f32 %v1896_v28, %v1908_v3  ;;  %v1897_v60 = vmul.f32 0.0051020407, %v1843_v29 }
 0x2c0   : > { %v1932_v5 = vmax.f32 %v1920_v37, 0.0 }
 0x2c2   : > { %v1944_v4 = vadd.f32 1e-05, %v1932_v5 }
 0x2c3   : > { %v1771_v2 = vpop.xlane.xlu0 %1770 }
 0x2c4   : > { %2540 = vrsqrt.f32 %v1944_v4  ;;  %v4427_v59 = vmul.f32 0.0051020407, %v1771_v2  ;;  %vm1962_vm3 = vweird.f32 %v1944_v4 }
 0x2c5   : > { %v1847_v6 = vpop.xlane.xlu2 %1846  ;;  %v1775_v30 = vpop.xlane.xlu1 %1774 }
 0x2c6   : > { %v1909_v47 = vmul.f32 %v4427_v59, %v4427_v59  ;;  %v4431_v0 = vmul.f32 0.0051020407, %v1775_v30  ;;  %v1898_v62 = vmul.f32 0.0051020407, %v1847_v6 }
 0x2c8   : > { %v1921_v42 = vsub.f32 %v1897_v60, %v1909_v47  ;;  %v1910_v53 = vmul.f32 %v4431_v0, %v4431_v0  ;;  %v2100_v60 = vld [vmem:[%s4451_s22] sm:$0xff] }
 0x2ca   : > { %v2541_v52 = vpop.eup %2540  ;;  %v1933_v58 = vmax.f32 %v1921_v42, 0.0  ;;  %v1922_v63 = vsub.f32 %v1898_v62, %v1910_v53 }
 0x2cb   : > { %v1957_v31 = vmul.f32 %v2541_v52, %v1944_v4  ;;  %vm1963_vm2 = vweird.f32 %v2541_v52 }
 0x2cc   : > { %v1945_v40 = vadd.f32 1e-05, %v1933_v58  ;;  %v1934_v1 = vmax.f32 %v1922_v63, 0.0  ;;  %vm1964_vm4 = vmor %vm1962_vm3, %vm1963_vm2 }
 0x2cd   : > { %v1958_v9 = vmul.f32 %v2541_v52, %v1957_v31  ;;  %v1779_v8 = vpop.xlane.xlu1 %1778  ;;  %v1851_v26 = vpop.xlane.xlu0 %1850 }
 0x2ce   : > { %2542 = vrsqrt.f32 %v1945_v40  ;;  %v1946_v12 = vadd.f32 1e-05, %v1934_v1  ;;  %v4436_v50 = vmul.f32 0.0051020407, %v1779_v8  ;;  %v1899_v33 = vmul.f32 0.0051020407, %v1851_v26 }
 0x2cf   : > { %v1959_v24 = vmul.f32 0.5, %v1958_v9  ;;  %v2077_v8 = vld [vmem:[%s4441_s5 + $0x8] sm:$0xff]  ;;  %vm1972_vm6 = vweird.f32 %v1945_v40 }
 0x2d0   : > { %2544 = vrsqrt.f32 %v1946_v12  ;;  %v1911_v54 = vmul.f32 %v4436_v50, %v4436_v50  ;;  %vm1982_vm9 = vweird.f32 %v1946_v12 }
 0x2d1   : > { %v1960_v10 = vsub.f32 1.5, %v1959_v24 }
 0x2d2   : > { %v1923_v15 = vsub.f32 %v1899_v33, %v1911_v54  ;;  %v2078_v33 = vld [vmem:[%s4441_s5 + $0x10] sm:$0xff] }
 0x2d3   : > { %v1783_v14 = vpop.xlane.xlu2 %1782  ;;  %v1961_v45 = vmul.f32 %v2541_v52, %v1960_v10 }
 0x2d4   : > { %v2543_v49 = vpop.eup %2542  ;;  %v1935_v22 = vmax.f32 %v1923_v15, 0.0  ;;  %v4446_v11 = vmul.f32 0.0051020407, %v1783_v14 }
 0x2d5   : > { %v1967_v25 = vmul.f32 %v2543_v49, %v1945_v40  ;;  %v1855_v3 = vpop.xlane.xlu1 %1854  ;;  %v1965_v28 = vsel %vm1964_vm4, %v2541_v52, %v1961_v45  ;;  %vm1973_vm5 = vweird.f32 %v2543_v49 }
 0x2d6   : > { %v2545_v29 = vpop.eup %2544  ;;  %v1947_v37 = vadd.f32 1e-05, %v1935_v22  ;;  %v1912_v5 = vmul.f32 %v4446_v11, %v4446_v11  ;;  %v1900_v4 = vmul.f32 0.0051020407, %v1855_v3  ;;  %v2088_v2 = vmul.f32 %v2076_v56, %v1965_v28  ;;  %vm1974_vm8 = vmor %vm1972_vm6, %vm1973_vm5 }
 0x2d7   : > { %v1968_v6 = vmul.f32 %v2543_v49, %v1967_v25  ;;  %v1977_v30 = vmul.f32 %v2545_v29, %v1946_v12  ;;  %vm1983_vm7 = vweird.f32 %v2545_v29  ;;  %v2101_v25 = vld [vmem:[%s4451_s22 + $0x8] sm:$0xff] }
 0x2d8   : > { %2546 = vrsqrt.f32 %v1947_v37  ;;  %v1924_v47 = vsub.f32 %v1900_v4, %v1912_v5  ;;  %2138 = vperm.xlu0 %2537, %v2088_v2   ;;  %v2112_v42 = vmul.f32 %v2088_v2, %v4423_v20  ;;  %vm1984_vm10 = vmor %vm1982_vm9, %vm1983_vm7  ;;  %vm1992_vm12 = vweird.f32 %v1947_v37 }
 0x2d9   : > { %v1969_v62 = vmul.f32 0.5, %v1968_v6  ;;  %v1978_v53 = vmul.f32 %v2545_v29, %v1977_v30 }
 0x2da   : > { %v1936_v58 = vmax.f32 %v1924_v47, 0.0  ;;  %v2124_v52 = vsub.f32 %v2100_v60, %v2112_v42 }
 0x2db   : > { %v1970_v63 = vsub.f32 1.5, %v1969_v62  ;;  %v1979_v31 = vmul.f32 0.5, %v1978_v53  ;;  %v1787_v1 = vpop.xlane.xlu2 %1786  ;;  %v2102_v62 = vld [vmem:[%s4451_s22 + $0x10] sm:$0xff]  ;;  %v2079_v53 = vld [vmem:[%s4441_s5 + $0x18] sm:$0xff] }
 0x2dc   : > { %v4457_v9 = vadd.f32 1e-05, %v1936_v58  ;;  %2222 = vperm.xlu1 %2538, %v2124_v52   ;;  %v4462_v45 = vmul.f32 0.0051020407, %v1787_v1 }
 0x2dd   : > { %v1971_v26 = vmul.f32 %v2543_v49, %v1970_v63  ;;  %v1980_v24 = vsub.f32 1.5, %v1979_v31 }
 0x2de   : > { %v2547_v54 = vpop.eup %2546  ;;  %2548 = vrsqrt.f32 %v4457_v9  ;;  %v1913_v12 = vmul.f32 %v4462_v45, %v4462_v45  ;;  %vm2002_vm15 = vweird.f32 %v4457_v9 }
 0x2df   : > { %v1975_v20 = vsel %vm1974_vm8, %v2543_v49, %v1971_v26  ;;  %v1981_v10 = vmul.f32 %v2545_v29, %v1980_v24  ;;  %v1987_v15 = vmul.f32 %v2547_v54, %v1947_v37  ;;  %vm1993_vm11 = vweird.f32 %v2547_v54 }
 0x2e0   : > { %v2089_v14 = vmul.f32 %v2077_v8, %v1975_v20  ;;  %vm1994_vm13 = vmor %vm1992_vm12, %vm1993_vm11 }
 0x2e1   : > { %v1985_v56 = vsel %vm1984_vm10, %v2545_v29, %v1981_v10  ;;  %v1988_v22 = vmul.f32 %v2547_v54, %v1987_v15  ;;  %v2103_v10 = vld [vmem:[%s4451_s22 + $0x18] sm:$0xff] }
 0x2e2   : > { %v2113_v40 = vmul.f32 %v2089_v14, %v4427_v59  ;;  %v2090_v3 = vmul.f32 %v2078_v33, %v1985_v56 }
 0x2e3   : > { %v1989_v28 = vmul.f32 0.5, %v1988_v22  ;;  %v1859_v5 = vpop.xlane.xlu2 %1858  ;;  %v1791_v4 = vpop.xlane.xlu0 %1790 }
 0x2e4   : > { %v2549_v2 = vpop.eup %2548  ;;  %v1901_v49 = vmul.f32 0.0051020407, %v1859_v5  ;;  %2143 = vperm.xlu1 %2538, %v2089_v14   ;;  %2148 = vperm.xlu2 %2539, %v2090_v3   ;;  %v2125_v6 = vsub.f32 %v2101_v25, %v2113_v40  ;;  %v2114_v59 = vmul.f32 %v2090_v3, %v4431_v0  ;;  %v4472_v52 = vmul.f32 0.0051020407, %v1791_v4  ;;  %v2080_v14 = vld [vmem:[%s4441_s5 + $0x20] sm:$0xff] }
 0x2e5   : > { %v1990_v30 = vsub.f32 1.5, %v1989_v28  ;;  %v1997_v29 = vmul.f32 %v2549_v2, %v4457_v9  ;;  %vm2003_vm14 = vweird.f32 %v2549_v2 }
 0x2e6   : > { %v1925_v60 = vsub.f32 %v1901_v49, %v1913_v12  ;;  %2227 = vperm.xlu0 %2537, %v2125_v6   ;;  %v2126_v8 = vsub.f32 %v2102_v62, %v2114_v59  ;;  %v1914_v37 = vmul.f32 %v4472_v52, %v4472_v52  ;;  %vm2004_vm0 = vmor %vm2002_vm15, %vm2003_vm14  ;;  %v2104_v12 = vld [vmem:[%s4451_s22 + $0x20] sm:$0xff] }
 0x2e7   : > { %v1991_v47 = vmul.f32 %v2547_v54, %v1990_v30  ;;  %v1998_v42 = vmul.f32 %v2549_v2, %v1997_v29 }
 0x2e8   : > { %v1937_v58 = vmax.f32 %v1925_v60, 0.0 }
 0x2e9   : > { %v1999_v63 = vmul.f32 0.5, %v1998_v42  ;;  %v1995_v31 = vsel %vm1994_vm13, %v2547_v54, %v1991_v47 }
 0x2ea   : > { %v1949_v1 = vadd.f32 1e-05, %v1937_v58  ;;  %v2091_v26 = vmul.f32 %v2079_v53, %v1995_v31 }
 0x2eb   : > { %v2000_v24 = vsub.f32 1.5, %v1999_v63  ;;  %v1795_v0 = vpop.xlane.xlu1 %1794  ;;  %v1863_v20 = vpop.xlane.xlu0 %1862 }
 0x2ec   : > { %2550 = vrsqrt.f32 %v1949_v1  ;;  %v1902_v33 = vmul.f32 0.0051020407, %v1863_v20  ;;  %2232 = vperm.xlu2 %2539, %v2126_v8   ;;  %v2115_v54 = vmul.f32 %v2091_v26, %v4436_v50  ;;  %v4480_v40 = vmul.f32 0.0051020407, %v1795_v0 }
 0x2ed   : > { %v2001_v15 = vmul.f32 %v2549_v2, %v2000_v24  ;;  %vm2012_vm3 = vweird.f32 %v1949_v1 }
 0x2ee   : > { %v1926_v56 = vsub.f32 %v1902_v33, %v1914_v37  ;;  %v2127_v22 = vsub.f32 %v2103_v10, %v2115_v54  ;;  %v1915_v50 = vmul.f32 %v4480_v40, %v4480_v40 }
 0x2ef   : > { %v2005_v25 = vsel %vm2004_vm0, %v2549_v2, %v2001_v15 }
 0x2f0   : > { %v1938_v3 = vmax.f32 %v1926_v56, 0.0  ;;  %v2092_v28 = vmul.f32 %v2080_v14, %v2005_v25  ;;  %2237 = vperm.xlu1 %2538, %v2127_v22  }
 0x2f2   : > { %v2551_v5 = vpop.eup %2550  ;;  %v1950_v4 = vadd.f32 1e-05, %v1938_v3  ;;  %v2116_v49 = vmul.f32 %v2092_v28, %v4446_v11 }
 0x2f3   : > { %v2007_v6 = vmul.f32 %v2551_v5, %v1949_v1  ;;  %v1799_v30 = vpop.xlane.xlu2 %1798  ;;  %v1867_v9 = vpop.xlane.xlu1 %1866  ;;  %vm2013_vm2 = vweird.f32 %v2551_v5 }
 0x2f4   : > { %2552 = vrsqrt.f32 %v1950_v4  ;;  %v1903_v29 = vmul.f32 0.0051020407, %v1867_v9  ;;  %2153 = vperm.xlu2 %2539, %v2091_v26   ;;  %v2128_v59 = vsub.f32 %v2104_v12, %v2116_v49  ;;  %v4486_v42 = vmul.f32 0.0051020407, %v1799_v30  ;;  %v2081_v26 = vld [vmem:[%s4441_s5 + $0x28] sm:$0xff]  ;;  %vm2014_vm4 = vmor %vm2012_vm3, %vm2013_vm2 }
 0x2f5   : > { %v2008_v2 = vmul.f32 %v2551_v5, %v2007_v6  ;;  %vm2022_vm6 = vweird.f32 %v1950_v4  ;;  %v2082_v6 = vld [vmem:[%s4441_s5 + $0x30] sm:$0xff]  ;;  %v2105_v30 = vld [vmem:[%s4451_s22 + $0x28] sm:$0xff] }
 0x2f6   : > { %v1927_v60 = vsub.f32 %v1903_v29, %v1915_v50  ;;  %2242 = vperm.xlu0 %2537, %v2128_v59   ;;  %v1916_v0 = vmul.f32 %v4486_v42, %v4486_v42 }
 0x2f7   : > { %v2009_v47 = vmul.f32 0.5, %v2008_v2 }
 0x2f8   : > { %v1939_v62 = vmax.f32 %v1927_v60, 0.0  ;;  %2158 = vperm.xlu1 %2538, %v2092_v28  }
 0x2f9   : > { %v2010_v53 = vsub.f32 1.5, %v2009_v47 }
 0x2fa   : > { %v2553_v11 = vpop.eup %2552  ;;  %v1951_v58 = vadd.f32 1e-05, %v1939_v62 }
 0x2fb   : > { %v2017_v63 = vmul.f32 %v2553_v11, %v1950_v4  ;;  %v1871_v31 = vpop.xlane.xlu2 %1870  ;;  %v1803_v8 = vpop.xlane.xlu0 %1802  ;;  %v2011_v24 = vmul.f32 %v2551_v5, %v2010_v53  ;;  %vm2023_vm5 = vweird.f32 %v2553_v11 }
 0x2fc   : > { %2554 = vrsqrt.f32 %v1951_v58  ;;  %v1904_v20 = vmul.f32 0.0051020407, %v1871_v31  ;;  %v4491_v1 = vmul.f32 0.0051020407, %v1803_v8  ;;  %vm2024_vm7 = vmor %vm2022_vm6, %vm2023_vm5  ;;  %vm2032_vm9 = vweird.f32 %v1951_v58 }
 0x2fd   : > { %v2018_v37 = vmul.f32 %v2553_v11, %v2017_v63  ;;  %v2015_v33 = vsel %vm2014_vm4, %v2551_v5, %v2011_v24 }
 0x2fe   : > { %v1928_v10 = vsub.f32 %v1904_v20, %v1916_v0  ;;  %v2093_v15 = vmul.f32 %v2081_v26, %v2015_v33  ;;  %v1917_v9 = vmul.f32 %v4491_v1, %v4491_v1  ;;  %v2083_v20 = vld [vmem:[%s4441_s5 + $0x38] sm:$0xff] }
 0x2ff   : > { %v2019_v54 = vmul.f32 0.5, %v2018_v37  ;;  %v2106_v37 = vld [vmem:[%s4451_s22 + $0x30] sm:$0xff] }
 0x300   : > { %v1940_v14 = vmax.f32 %v1928_v10, 0.0  ;;  %2163 = vperm.xlu2 %2539, %v2093_v15   ;;  %v2117_v3 = vmul.f32 %v2093_v15, %v4462_v45 }
 0x301   : > { %v2020_v56 = vsub.f32 1.5, %v2019_v54 }
 0x302   : > { %v2555_v22 = vpop.eup %2554  ;;  %v4493_v25 = vadd.f32 1e-05, %v1940_v14  ;;  %v2129_v47 = vsub.f32 %v2105_v30, %v2117_v3 }
 0x303   : > { %v2027_v28 = vmul.f32 %v2555_v22, %v1951_v58  ;;  %v1807_v12 = vpop.xlane.xlu1 %1806  ;;  %v1875_v5 = vpop.xlane.xlu0 %1874  ;;  %v2021_v49 = vmul.f32 %v2553_v11, %v2020_v56  ;;  %vm2033_vm8 = vweird.f32 %v2555_v22 }
 0x304   : > { %2556 = vrsqrt.f32 %v4493_v25  ;;  %v1905_v50 = vmul.f32 0.0051020407, %v1875_v5  ;;  %v4501_v4 = vmul.f32 0.0051020407, %v1807_v12  ;;  %vm2034_vm10 = vmor %vm2032_vm9, %vm2033_vm8  ;;  %vm2042_vm12 = vweird.f32 %v4493_v25 }
 0x305   : > { %v2028_v29 = vmul.f32 %v2555_v22, %v2027_v28  ;;  %v2025_v2 = vsel %vm2024_vm7, %v2553_v11, %v2021_v49 }
 0x306   : > { %v1929_v59 = vsub.f32 %v1905_v50, %v1917_v9  ;;  %v2094_v60 = vmul.f32 %v2082_v6, %v2025_v2  ;;  %v1918_v33 = vmul.f32 %v4501_v4, %v4501_v4  ;;  %v2107_v9 = vld [vmem:[%s4451_s22 + $0x38] sm:$0xff] }
 0x307   : > { %v2029_v45 = vmul.f32 0.5, %v2028_v29  ;;  %v2084_v29 = vld [vmem:[%s4441_s5 + $0x40] sm:$0xff] }
 0x308   : > { %v1941_v62 = vmax.f32 %v1929_v59, 0.0  ;;  %2168 = vperm.xlu1 %2538, %v2094_v60   ;;  %2247 = vperm.xlu2 %2539, %v2129_v47   ;;  %v2118_v8 = vmul.f32 %v2094_v60, %v4472_v52 }
 0x309   : > { %v2030_v53 = vsub.f32 1.5, %v2029_v45 }
 0x30a   : > { %v2557_v63 = vpop.eup %2556  ;;  %v1953_v31 = vadd.f32 1e-05, %v1941_v62  ;;  %v2130_v52 = vsub.f32 %v2106_v37, %v2118_v8  ;;  %v2085_v37 = vld [vmem:[%s4441_s5 + $0x48] sm:$0xff] }
 0x30b   : > { %v2037_v11 = vmul.f32 %v2557_v63, %v4493_v25  ;;  %v1879_v24 = vpop.xlane.xlu1 %1878  ;;  %v1811_v26 = vpop.xlane.xlu2 %1810  ;;  %v2031_v0 = vmul.f32 %v2555_v22, %v2030_v53  ;;  %vm2043_vm11 = vweird.f32 %v2557_v63 }
 0x30c   : > { %2558 = vrsqrt.f32 %v1953_v31  ;;  %v1906_v10 = vmul.f32 0.0051020407, %v1879_v24  ;;  %v4509_v28 = vmul.f32 0.0051020407, %v1811_v26  ;;  %vm2044_vm13 = vmor %vm2042_vm12, %vm2043_vm11  ;;  %vm2052_vm15 = vweird.f32 %v1953_v31 }
 0x30d   : > { %v2038_v15 = vmul.f32 %v2557_v63, %v2037_v11  ;;  %v2035_v54 = vsel %vm2034_vm10, %v2555_v22, %v2031_v0 }
 0x30e   : > { %v1930_v14 = vsub.f32 %v1906_v10, %v1918_v33  ;;  %v2095_v56 = vmul.f32 %v2083_v20, %v2035_v54  ;;  %v1919_v2 = vmul.f32 %v4509_v28, %v4509_v28 }
 0x30f   : > { %v2039_v58 = vmul.f32 0.5, %v2038_v15 }
 0x310   : > { %v1942_v3 = vmax.f32 %v1930_v14, 0.0  ;;  %2173 = vperm.xlu0 %2537, %v2095_v56   ;;  %2252 = vperm.xlu1 %2538, %v2130_v52   ;;  %v2119_v6 = vmul.f32 %v2095_v56, %v4480_v40 }
 0x311   : > { %v2040_v12 = vsub.f32 1.5, %v2039_v58 }
 0x312   : > { %v2559_v5 = vpop.eup %2558  ;;  %v1954_v49 = vadd.f32 1e-05, %v1942_v3  ;;  %v2131_v62 = vsub.f32 %v2107_v9, %v2119_v6  ;;  %v2086_v3 = vld [vmem:[%s4441_s5 + $0x50] sm:$0xff] }
 0x313   : > { %v2047_v22 = vmul.f32 %v2559_v5, %v1953_v31  ;;  %v1883_v30 = vpop.xlane.xlu2 %1882  ;;  %v2041_v50 = vmul.f32 %v2557_v63, %v2040_v12  ;;  %vm2053_vm14 = vweird.f32 %v2559_v5  ;;  %v2109_v12 = vld [vmem:[%s4451_s22 + $0x48] sm:$0xff] }
 0x314   : > { %2560 = vrsqrt.f32 %v1954_v49  ;;  %v1907_v59 = vmul.f32 0.0051020407, %v1883_v30  ;;  %vm2054_vm0 = vmor %vm2052_vm15, %vm2053_vm14  ;;  %vm2062_vm3 = vweird.f32 %v1954_v49 }
 0x315   : > { %v2048_v60 = vmul.f32 %v2559_v5, %v2047_v22  ;;  %v2045_v47 = vsel %vm2044_vm13, %v2557_v63, %v2041_v50  ;;  %v2108_v63 = vld [vmem:[%s4451_s22 + $0x40] sm:$0xff] }
 0x316   : > { %v1931_v45 = vsub.f32 %v1907_v59, %v1919_v2  ;;  %v2096_v40 = vmul.f32 %v2084_v29, %v2045_v47  ;;  %v2087_v2 = vld [vmem:[%s4441_s5 + $0x58] sm:$0xff]  ;;  %s2676_s5 = scalar_lea.hbm %s4631_s4, 384 }
 0x317   : > { %v2049_v53 = vmul.f32 0.5, %v2048_v60  ;;  %p2678_p1 = scmp.lt.s32.totalorder %s2676_s5, %s2672_s9 }
 0x318   : > { %v1943_v25 = vmax.f32 %v1931_v45, 0.0  ;;  %2257 = vperm.xlu0 %2537, %v2131_v62   ;;  %2178 = vperm.xlu2 %2539, %v2096_v40   ;;  %v2120_v26 = vmul.f32 %v2096_v40, %v4486_v42  ;;  %v2111_v62 = vld [vmem:[%s4451_s22 + $0x58] sm:$0xff] }
 0x319   : > { %v2050_v8 = vsub.f32 1.5, %v2049_v53  ;;  %p2679_p2 = por %p2678_p1, %p2677_p0 }
 0x31a   : > { %v2561_v11 = vpop.eup %2560  ;;  %v1955_v24 = vadd.f32 1e-05, %v1943_v25  ;;  %v2132_v54 = vsub.f32 %v2108_v63, %v2120_v26 }
 0x31b   : > { %v2057_v0 = vmul.f32 %v2561_v11, %v1954_v49  ;;  %v2051_v20 = vmul.f32 %v2559_v5, %v2050_v8  ;;  %vm2063_vm2 = vweird.f32 %v2561_v11  ;;  %v2110_v49 = vld [vmem:[%s4451_s22 + $0x50] sm:$0xff]  ;;  %p2680_p3 = pnand %p2679_p2, %p2675_p13 }
 0x31c   : > { %2562 = vrsqrt.f32 %v1955_v24  ;;  %vm2064_vm4 = vmor %vm2062_vm3, %vm2063_vm2  ;;  %vm2072_vm6 = vweird.f32 %v1955_v24 }
 0x31d   : > { %v2058_v33 = vmul.f32 %v2561_v11, %v2057_v0  ;;  %v2055_v10 = vsel %vm2054_vm0, %v2559_v5, %v2051_v20 }
 0x31e   : > { %v2097_v15 = vmul.f32 %v2085_v37, %v2055_v10 }
 0x31f   : > { %v2059_v14 = vmul.f32 0.5, %v2058_v33 }
 0x320   : > { %2183 = vperm.xlu1 %2538, %v2097_v15   ;;  %2262 = vperm.xlu2 %2539, %v2132_v54   ;;  %v2121_v42 = vmul.f32 %v2097_v15, %v4491_v1 }
 0x321   : > { %v2060_v56 = vsub.f32 1.5, %v2059_v14 }
 0x322   : > { %v2563_v52 = vpop.eup %2562  ;;  %v2133_v30 = vsub.f32 %v2109_v12, %v2121_v42 }
 0x323   : > { %v2067_v31 = vmul.f32 %v2563_v52, %v1955_v24  ;;  %v2061_v58 = vmul.f32 %v2561_v11, %v2060_v56  ;;  %vm2073_vm5 = vweird.f32 %v2563_v52 }
 0x324   : > { %vm2074_vm7 = vmor %vm2072_vm6, %vm2073_vm5 }
 0x325   : > { %v2068_v6 = vmul.f32 %v2563_v52, %v2067_v31  ;;  %v2065_v5 = vsel %vm2064_vm4, %v2561_v11, %v2061_v58 }
 0x326   : > { %v2098_v22 = vmul.f32 %v2086_v3, %v2065_v5 }
 0x327   : > { %v2069_v9 = vmul.f32 0.5, %v2068_v6 }
 0x328   : > { %2188 = vperm.xlu0 %2537, %v2098_v22   ;;  %2267 = vperm.xlu1 %2538, %v2133_v30   ;;  %v2122_v1 = vmul.f32 %v2098_v22, %v4501_v4 }
 0x329   : > { %v2070_v50 = vsub.f32 1.5, %v2069_v9 }
 0x32a   : > { %v2134_v60 = vsub.f32 %v2110_v49, %v2122_v1 }
 0x32b   : > { %v2071_v29 = vmul.f32 %v2563_v52, %v2070_v50 }
 0x32d   : > { %v2075_v59 = vsel %vm2074_vm7, %v2563_v52, %v2071_v29 }
 0x32e   : > { %v2099_v47 = vmul.f32 %v2087_v2, %v2075_v59 }
 0x330   : > { %2272 = vperm.xlu0 %2537, %v2134_v60   ;;  %2193 = vperm.xlu2 %2539, %v2099_v47   ;;  %v2123_v45 = vmul.f32 %v2099_v47, %v4509_v28 }
 0x332   : > { %v2135_v40 = vsub.f32 %v2111_v62, %v2123_v45 }
 0x338   : > { %2277 = vperm.xlu2 %2539, %v2135_v40  }
 0x33e   : > { %v2149_v53 = vpop.permute.xlu2 %2148 }
 0x33f   : > { %v2200_v4 = vmul.f32 %v2149_v53, %v4264_v41  ;;  %v2201_v25 = vmul.f32 %v2149_v53, %v4267_v7 }
 0x346   : > { %v2233_v8 = vpop.permute.xlu2 %2232 }
 0x347   : > { %v2284_v11 = vadd.f32 %v2233_v8, %v2200_v4  ;;  %v2285_v24 = vadd.f32 %v2233_v8, %v2201_v25 }
 0x349   : > { %v2308_v26 = vmax.f32 %v2284_v11, 0.0  ;;  %v2309_v0 = vmax.f32 %v2285_v24, 0.0 }
 0x34a   : > { %v2139_v20 = vpop.permute.xlu0 %2138 }
 0x34b   : > { %2332 = vst [vmem:[%s4533_s30 + $0x20] sm:$0xff] %v2308_v26  ;;  %v2196_v28 = vmul.f32 %v2139_v20, %v4238_v44  ;;  %v2197_v41 = vmul.f32 %v2139_v20, %v4235_v51 }
 0x34c   : > { %2333 = vst.msk [vmem:[%s4533_s30 + $0x28] sm:$0xff] %vm1763_vm1, %v2309_v0 }
 0x34e   : > { %v2223_v7 = vpop.permute.xlu1 %2222  ;;  %v2154_v15 = vpop.permute.xlu2 %2153 }
 0x34f   : > { %v2280_v37 = vadd.f32 %v2223_v7, %v2196_v28  ;;  %v2281_v63 = vadd.f32 %v2223_v7, %v2197_v41 }
 0x351   : > { %v2304_v33 = vmax.f32 %v2280_v37, 0.0  ;;  %v2305_v10 = vmax.f32 %v2281_v63, 0.0 }
 0x353   : > { %2328 = vst [vmem:[%s4533_s30] sm:$0xff] %v2304_v33 }
 0x354   : > { %2329 = vst.msk [vmem:[%s4533_s30 + $0x8] sm:$0xff] %vm1763_vm1, %v2305_v10 }
 0x356   : > { %v2144_v54 = vpop.permute.xlu1 %2143 }
 0x357   : > { %v2198_v14 = vmul.f32 %v2144_v54, %v4248_v23  ;;  %v2199_v56 = vmul.f32 %v2144_v54, %v4251_v27  ;;  %v2202_v23 = vmul.f32 %v2154_v15, %v4283_v46  ;;  %v2203_v27 = vmul.f32 %v2154_v15, %v4286_v36 }
 0x358   : > { %v2228_v52 = vpop.permute.xlu0 %2227 }
 0x359   : > { %v2282_v44 = vadd.f32 %v2228_v52, %v2198_v14  ;;  %v2283_v42 = vadd.f32 %v2228_v52, %v2199_v56 }
 0x35a   : > { %v2164_v51 = vpop.permute.xlu2 %2163 }
 0x35b   : > { %v2306_v31 = vmax.f32 %v2282_v44, 0.0  ;;  %v2307_v58 = vmax.f32 %v2283_v42, 0.0  ;;  %v2206_v3 = vmul.f32 %v2164_v51, %v4318_v38  ;;  %v2207_v12 = vmul.f32 %v2164_v51, %v4315_v17 }
 0x35d   : > { %2330 = vst [vmem:[%s4533_s30 + $0x10] sm:$0xff] %v2306_v31 }
 0x35e   : > { %2331 = vst.msk [vmem:[%s4533_s30 + $0x18] sm:$0xff] %vm1763_vm1, %v2307_v58 }
 0x362   : > { %v2248_v6 = vpop.permute.xlu2 %2247  ;;  %v2238_v5 = vpop.permute.xlu1 %2237 }
 0x363   : > { %v2290_v22 = vadd.f32 %v2248_v6, %v2206_v3  ;;  %v2291_v30 = vadd.f32 %v2248_v6, %v2207_v12  ;;  %v2286_v9 = vadd.f32 %v2238_v5, %v2202_v23  ;;  %v2287_v50 = vadd.f32 %v2238_v5, %v2203_v27 }
 0x365   : > { %v2314_v1 = vmax.f32 %v2290_v22, 0.0  ;;  %v2310_v49 = vmax.f32 %v2286_v9, 0.0  ;;  %v2311_v29 = vmax.f32 %v2287_v50, 0.0  ;;  %v2315_v38 = vmax.f32 %v2291_v30, 0.0 }
 0x367   : > { %2338 = vst [vmem:[%s4533_s30 + $0x50] sm:$0xff] %v2314_v1 }
 0x368   : > { %2334 = vst [vmem:[%s4533_s30 + $0x30] sm:$0xff] %v2310_v49  ;;  %v2243_v2 = vpop.permute.xlu0 %2242 }
 0x369   : > { %2335 = vst.msk [vmem:[%s4533_s30 + $0x38] sm:$0xff] %vm1763_vm1, %v2311_v29 }
 0x36a   : > { %2339 = vst.msk [vmem:[%s4533_s30 + $0x58] sm:$0xff] %vm1763_vm1, %v2315_v38  ;;  %v2159_v46 = vpop.permute.xlu1 %2158 }
 0x36b   : > { %v2204_v36 = vmul.f32 %v2159_v46, %v4299_v48  ;;  %v2205_v17 = vmul.f32 %v2159_v46, %v4302_v19 }
 0x36d   : > { %v2288_v59 = vadd.f32 %v2243_v2, %v2204_v36  ;;  %v2289_v60 = vadd.f32 %v2243_v2, %v2205_v17 }
 0x36f   : > { %v2312_v47 = vmax.f32 %v2288_v59, 0.0  ;;  %v2313_v45 = vmax.f32 %v2289_v60, 0.0 }
 0x371   : > { %2336 = vst [vmem:[%s4533_s30 + $0x40] sm:$0xff] %v2312_v47 }
 0x372   : > { %v2179_v62 = vpop.permute.xlu2 %2178  ;;  %2337 = vst.msk [vmem:[%s4533_s30 + $0x48] sm:$0xff] %vm1763_vm1, %v2313_v45 }
 0x373   : > { %v2212_v40 = vmul.f32 %v2179_v62, %v4364_v39  ;;  %v2213_v53 = vmul.f32 %v2179_v62, %v4360_v13 }
 0x37a   : > { %v2169_v4 = vpop.permute.xlu1 %2168  ;;  %v2263_v48 = vpop.permute.xlu2 %2262 }
 0x37b   : > { %v2296_v19 = vadd.f32 %v2263_v48, %v2212_v40  ;;  %v2297_v25 = vadd.f32 %v2263_v48, %v2213_v53  ;;  %v2208_v24 = vmul.f32 %v2169_v4, %v4332_v57  ;;  %v2209_v26 = vmul.f32 %v2169_v4, %v4328_v32 }
 0x37d   : > { %v2320_v8 = vmax.f32 %v2296_v19, 0.0  ;;  %v2321_v11 = vmax.f32 %v2297_v25, 0.0 }
 0x37f   : > { %2344 = vst [vmem:[%s4533_s30 + $0x80] sm:$0xff] %v2320_v8 }
 0x380   : > { %2345 = vst.msk [vmem:[%s4533_s30 + $0x88] sm:$0xff] %vm1763_vm1, %v2321_v11 }
 0x382   : > { %v2253_v0 = vpop.permute.xlu1 %2252  ;;  %v2174_v39 = vpop.permute.xlu0 %2173 }
 0x383   : > { %v2292_v13 = vadd.f32 %v2253_v0, %v2208_v24  ;;  %v2293_v20 = vadd.f32 %v2253_v0, %v2209_v26  ;;  %v2210_v7 = vmul.f32 %v2174_v39, %v4348_v35  ;;  %v2211_v37 = vmul.f32 %v2174_v39, %v4344_v18 }
 0x385   : > { %v2316_v28 = vmax.f32 %v2292_v13, 0.0  ;;  %v2317_v41 = vmax.f32 %v2293_v20, 0.0 }
 0x387   : > { %2340 = vst [vmem:[%s4533_s30 + $0x60] sm:$0xff] %v2316_v28 }
 0x388   : > { %2341 = vst.msk [vmem:[%s4533_s30 + $0x68] sm:$0xff] %vm1763_vm1, %v2317_v41 }
 0x38a   : > { %v2258_v63 = vpop.permute.xlu0 %2257  ;;  %v2194_v57 = vpop.permute.xlu2 %2193 }
 0x38b   : > { %v2294_v32 = vadd.f32 %v2258_v63, %v2210_v7  ;;  %v2295_v33 = vadd.f32 %v2258_v63, %v2211_v37  ;;  %v2218_v54 = vmul.f32 %v2194_v57, %v4411_v55  ;;  %v2219_v14 = vmul.f32 %v2194_v57, %v4407_v16 }
 0x38d   : > { %v2318_v10 = vmax.f32 %v2294_v32, 0.0  ;;  %v2319_v15 = vmax.f32 %v2295_v33, 0.0 }
 0x38f   : > { %2342 = vst [vmem:[%s4533_s30 + $0x70] sm:$0xff] %v2318_v10 }
 0x390   : > { %2343 = vst.msk [vmem:[%s4533_s30 + $0x78] sm:$0xff] %vm1763_vm1, %v2319_v15 }
 0x392   : > { %v2184_v56 = vpop.permute.xlu1 %2183  ;;  %v2278_v35 = vpop.permute.xlu2 %2277 }
 0x393   : > { %v2302_v18 = vadd.f32 %v2278_v35, %v2218_v54  ;;  %v2303_v52 = vadd.f32 %v2278_v35, %v2219_v14  ;;  %v2214_v51 = vmul.f32 %v2184_v56, %v4380_v21  ;;  %v2215_v31 = vmul.f32 %v2184_v56, %v4376_v61 }
 0x395   : > { %v2326_v44 = vmax.f32 %v2302_v18, 0.0  ;;  %v2327_v42 = vmax.f32 %v2303_v52, 0.0 }
 0x397   : > { %2350 = vst [vmem:[%s4533_s30 + $0xb0] sm:$0xff] %v2326_v44 }
 0x398   : > { %2351 = vst.msk [vmem:[%s4533_s30 + $0xb8] sm:$0xff] %vm1763_vm1, %v2327_v42 }
 0x39a   : > { %v2268_v55 = vpop.permute.xlu1 %2267  ;;  %v2189_v58 = vpop.permute.xlu0 %2188 }
 0x39b   : > { %v2298_v3 = vadd.f32 %v2268_v55, %v2214_v51  ;;  %v2299_v16 = vadd.f32 %v2268_v55, %v2215_v31  ;;  %v2216_v21 = vmul.f32 %v2189_v58, %v4396_v34  ;;  %v2217_v61 = vmul.f32 %v2189_v58, %v4392_v43 }
 0x39d   : > { %v2322_v12 = vmax.f32 %v2298_v3, 0.0  ;;  %v2323_v23 = vmax.f32 %v2299_v16, 0.0 }
 0x39f   : > { %2346 = vst [vmem:[%s4533_s30 + $0x90] sm:$0xff] %v2322_v12 }
 0x3a0   : > { %2347 = vst.msk [vmem:[%s4533_s30 + $0x98] sm:$0xff] %vm1763_vm1, %v2323_v23 }
 0x3a2   : > { %v2273_v27 = vpop.permute.xlu0 %2272 }
 0x3a3   : > { %v2300_v6 = vadd.f32 %v2273_v27, %v2216_v21  ;;  %v2301_v5 = vadd.f32 %v2273_v27, %v2217_v61 }
 0x3a5   : > { %v2324_v22 = vmax.f32 %v2300_v6, 0.0  ;;  %v2325_v30 = vmax.f32 %v2301_v5, 0.0 }
 0x3a7   : > { %2348 = vst [vmem:[%s4533_s30 + $0xa0] sm:$0xff] %v2324_v22 }
 0x3a8   : > { %2349 = vst.msk [vmem:[%s4533_s30 + $0xa8] sm:$0xff] %vm1763_vm1, %v2325_v30 }
 0x3a9   : > { %2683 = shalt.err (!%p2680_p3)
}
 0x3aa   : > { %s2721_s22 = smov 256   ;;  %s2722_s23 = smov 16  }
 0x3ab   : > { %2495 = dma.vmem_to_hbm [thread:$0]  (%p2786_p5), %s2367_s29, 3072, %s2369_s19, %s2353_s11, %s2721_s22, %s2721_s22, %s2722_s23  }
 0x3ac PF: > { %p2501_p4 = scmp.ge.s32.totalorder %s2718_s18, 2  ;;  %s2383_s27 = sand.u32 1, %s2706_s15  }
 0x3ad   : > { %s2384_s30 = scalar_lea.sflag [#allocation3], %s2383_s27 }
 0x3ae   : > { %p2498_p7 = pnand %p2501_p4, %p2790_p6 }
 0x3b0   : > { %p2499_p8 = pneg %p2498_p7 }
 0x3b2   : > { %2701 = dma.done.wait (%p2499_p8), %s2384_s30, 3072  }
 0x3b3   : > { %2703 = vsyncadd (%p2499_p8), %s2384_s30, 4294964224  ;;  %p14_p9 = scmp.ge.s32.totalorder %s2773_s21, 4   ;;  %s4657_s15 = smov %s2710_s16 }
 0x3b4   : > { %s4658_s16 = smov %s2714_s17  ;;  %s4659_s17 = smov %s2784_s24 }
 0x3b5   : > { %s4660_s18 = smov %s2773_s21  ;;  %16 = sbr.rel (!%p14_p9) target bundleno = 3 (0x3), region = 77 }
 0x3ba   :  { %2390 = vsyncpa [#allocation3], 1 }
 0x3bb   :  { %2392 = vsyncpa [#allocation3 + $0x1], 1 }

</bundles_post_ra>
